<compile_context>
chip_gen: v7x
topology: tpu7x:2x2x1
jax: 0.10.0
libtpu: 0.0.40
codegen_flags: <defaults>
</compile_context>

<pallas_src>
import jax
import jax.numpy as jnp
from jax import lax
from jax.experimental import pallas as pl
from jax.experimental.pallas import tpu as pltpu

RNN_SIZE = 64
INPUT_SIZE = 64
N_CELLS = 25
N_FEAT = 4
HEAD_DIMS = (3, 3, 2, 25, 8)      # color, shape, act, abs_loc, rel_loc
HEAD_TOTAL = sum(HEAD_DIMS)       # 41
REF_HID = 32
SLAB_W = 128                      # lane-dense packed output width
OFFSETS = jnp.array([(-1, 0), (1, 0), (0, 1), (0, -1),
                     (-1, -1), (-1, 1), (1, -1), (1, 1)], dtype=jnp.int32)


def _softmax_lane(z):
    """Numerically-stable softmax over the last (lane) axis."""
    z = z - jnp.max(z, axis=-1, keepdims=True)
    e = jnp.exp(z)
    return e * pl.reciprocal(jnp.sum(e, axis=-1, keepdims=True), approx=True)


# ----------------------------------------------------------------------------
# Fused kernel: LSTM-over-time + last-hidden select + all linear heads +
# ref_obj_att MLP, one invocation, one lane-dense (B, 128) output slab.
# Slab columns: [color 0:3 | shape 3:6 | act 6:8 | abs 8:33 | rel 33:41 |
#                att 41:66 | zero pad 66:128]
# ----------------------------------------------------------------------------
def _fused_kernel(sel_ref, x_ref,
                  wih_ref, whh_ref, blstm_ref,
                  wheads_ref, bheads_ref,
                  canvas_ref, w1i_ref, w1c_ref, b1_ref, w2_ref, b2_ref,
                  out_ref):
    T, B, _ = x_ref.shape

    # LSTM weights stay in registers/VMEM for the whole unrolled loop.
    w_ih = wih_ref[...]        # (64, 256), gate columns ordered [i|f|o|g]
    w_hh = whh_ref[...]        # (64, 256)
    b_l = blstm_ref[...]       # (1, 256)

    def step(t, carry):
        h, c, emb = carry
        x = x_ref[t]                                             # (B, 64)
        gates = (jnp.dot(x, w_ih, preferred_element_type=jnp.float32)
                 + jnp.dot(h, w_hh, preferred_element_type=jnp.float32)
                 + b_l)                                          # (B, 256)
        sig = jax.nn.sigmoid(gates[:, :3 * RNN_SIZE])            # i|f|o (192)
        g_g = jnp.tanh(gates[:, 3 * RNN_SIZE:])                  # g (64)
        i_g = sig[:, :RNN_SIZE]
        f_g = sig[:, RNN_SIZE:2 * RNN_SIZE]
        o_g = sig[:, 2 * RNN_SIZE:3 * RNN_SIZE]
        c_new = f_g * c + i_g * g_g
        h_new = o_g * jnp.tanh(c_new)
        # capture hidden at each example's last non-zero token (sel is one-hot
        # over time per example) -> no [T,B,64] output needed.
        emb_new = emb + sel_ref[t] * h_new                       # (B,1)*(B,64)
        return h_new, c_new, emb_new

    zeros = jnp.zeros((B, RNN_SIZE), jnp.float32)
    _, _, emb = lax.fori_loop(0, T, step, (zeros, zeros, zeros), unroll=True)

    # ---- fused linear heads (color|shape|act|abs_loc|rel_loc) -------------
    logits = (jnp.dot(emb, wheads_ref[...], preferred_element_type=jnp.float32)
              + bheads_ref[...])                                 # (B, 41)
    pieces = []
    off = 0
    for d in HEAD_DIMS:
        pieces.append(_softmax_lane(logits[:, off:off + d]))
        off += d

    # ---- ref_obj_att MLP: [inst_emb ; canvas_cell] -> 32 -> ReLU -> 1 ------
    canvas2d = canvas_ref[...]                                   # (B*25, 4)
    inst_part = jnp.dot(emb, w1i_ref[...],
                        preferred_element_type=jnp.float32)      # (B, 32)
    canvas_part = jnp.dot(canvas2d, w1c_ref[...],
                          preferred_element_type=jnp.float32)    # (B*25, 32)
    h1 = jnp.maximum(canvas_part.reshape(B, N_CELLS, REF_HID)
                     + inst_part[:, None, :]
                     + b1_ref[...][None], 0.0)                   # (B, 25, 32)
    # second layer (32 -> 1) as a lane reduction so attention logits land as
    # (B, 25) with cells on the lane axis.
    att = jnp.sum(h1 * w2_ref[...].reshape(1, 1, REF_HID), axis=-1) \
        + b2_ref[...]                                            # (B, 25)
    pieces.append(_softmax_lane(att))

    pad = jnp.zeros((B, SLAB_W - (HEAD_TOTAL + N_CELLS)), jnp.float32)
    out_ref[...] = jnp.concatenate(pieces + [pad], axis=-1)      # dense store


def fused_forward(params, inst, canvas_updated):
    """InstEncoder + all heads + ref attention in one pallas_call."""
    B, T = inst.shape
    x_tbh = params['embed'][inst.T]                              # (T, B, 64)
    idx = jnp.arange(T, dtype=jnp.int32)
    last_ix = jnp.max(jnp.where(inst != 0, idx[None, :], -1), axis=1)   # (B,)
    sel = (idx[:, None] == last_ix[None, :]).astype(jnp.float32)[:, :, None]
    canvas_f = canvas_updated.astype(jnp.float32).reshape(B * N_CELLS, N_FEAT)

    slab = pl.pallas_call(
        _fused_kernel,
        out_shape=jax.ShapeDtypeStruct((B, SLAB_W), jnp.float32),
        grid_spec=pltpu.PrefetchScalarGridSpec(
            num_scalar_prefetch=0,
            grid=(1,),
            in_specs=[
                pl.BlockSpec((T, B, 1), lambda i: (0, 0, 0)),                # sel
                pl.BlockSpec((T, B, INPUT_SIZE), lambda i: (0, 0, 0)),       # x
                pl.BlockSpec((INPUT_SIZE, 4 * RNN_SIZE), lambda i: (0, 0)),  # w_ih
                pl.BlockSpec((RNN_SIZE, 4 * RNN_SIZE), lambda i: (0, 0)),    # w_hh
                pl.BlockSpec((1, 4 * RNN_SIZE), lambda i: (0, 0)),           # b_lstm
                pl.BlockSpec((RNN_SIZE, HEAD_TOTAL), lambda i: (0, 0)),      # w_heads
                pl.BlockSpec((1, HEAD_TOTAL), lambda i: (0, 0)),             # b_heads
                pl.BlockSpec((B * N_CELLS, N_FEAT), lambda i: (0, 0)),       # canvas
                pl.BlockSpec((RNN_SIZE, REF_HID), lambda i: (0, 0)),         # ref_w1_inst
                pl.BlockSpec((N_FEAT, REF_HID), lambda i: (0, 0)),           # ref_w1_canvas
                pl.BlockSpec((1, REF_HID), lambda i: (0, 0)),                # ref_b1
                pl.BlockSpec((1, REF_HID), lambda i: (0, 0)),                # ref_w2 (transposed)
                pl.BlockSpec((1, 1), lambda i: (0, 0)),                      # ref_b2
            ],
            out_specs=pl.BlockSpec((B, SLAB_W), lambda i: (0, 0)),
        ),
        compiler_params=pltpu.CompilerParams(
            dimension_semantics=("arbitrary",)),
    )(sel, x_tbh, params['w_ih'], params['w_hh'], params['b_lstm'],
      params['w_heads'], params['b_heads'],
      canvas_f, params['ref_w1_inst'], params['ref_w1_canvas'],
      params['ref_b1'], params['ref_w2_t'], params['ref_b2'])

    outs = []
    off = 0
    for d in HEAD_DIMS + (N_CELLS,):
        outs.append(slab[:, off:off + d])
        off += d
    return tuple(outs)   # color_p, shape_p, act_p, absloc_p, relloc_p, att_w


# ----------------------------------------------------------------------------
# Parameter init (deterministic, synthetic).
# ----------------------------------------------------------------------------
def init_params(key, vocab_size):
    ks = jax.random.split(key, 10)

    def nrm(k, shape, scale=0.1):
        return scale * jax.random.normal(k, shape, dtype=jnp.float32)

    p = {}
    p['embed'] = nrm(ks[0], (vocab_size + 1, INPUT_SIZE))
    # LSTM weights pre-transposed; synthetic gate ordering is [i|f|o|g].
    p['w_ih'] = nrm(ks[1], (INPUT_SIZE, 4 * RNN_SIZE))
    p['w_hh'] = nrm(ks[2], (RNN_SIZE, 4 * RNN_SIZE))
    p['b_lstm'] = nrm(ks[3], (1, 4 * RNN_SIZE), 0.01)      # bias_ih + bias_hh
    p['w_heads'] = nrm(ks[4], (RNN_SIZE, HEAD_TOTAL))      # color|shape|act|abs|rel
    p['b_heads'] = nrm(ks[5], (1, HEAD_TOTAL), 0.01)
    w1 = nrm(ks[6], (RNN_SIZE + N_FEAT, REF_HID))          # fc_ref_obj Linear(68,32)
    p['ref_w1_inst'] = w1[:RNN_SIZE]                       # (64, 32)
    p['ref_w1_canvas'] = w1[RNN_SIZE:]                     # (4, 32)
    p['ref_b1'] = nrm(ks[7], (1, REF_HID), 0.01)
    p['ref_w2_t'] = nrm(ks[8], (1, REF_HID))               # Linear(32,1) transposed
    p['ref_b2'] = nrm(ks[9], (1, 1), 0.01)
    return p


# ----------------------------------------------------------------------------
# One dialog step (Shape2DPainterNet body), vectorized over the batch.
# Categorical sampling / reward / canvas-update glue stays in JAX.
# TODO(synk): sampling + canvas update could be folded into the kernel with
# pltpu.prng_random_bits (Gumbel trick) for further launch-overhead savings.
# ----------------------------------------------------------------------------
def painter_step(params, inst, target, inst_type, gt_act,
                 canvas_updated, final_canvas, init_canvas, key, eval_mode):
    B = inst.shape[0]
    k_color, k_shape, k_act, k_abs, k_rel, k_att = jax.random.split(key, 6)

    (color_p, shape_p, act_p, absloc_p, relloc_p, att_w) = fused_forward(
        params, inst, canvas_updated)                      # single Pallas call

    def sample(k, probs):
        s = jax.random.categorical(k, jnp.log(probs + 1e-20), axis=-1)
        lp = jnp.log(jnp.take_along_axis(probs, s[:, None], axis=1)[:, 0] + 1e-20)
        return s.astype(jnp.int32), lp

    color_sample, color_lp = sample(k_color, color_p)
    shape_sample, shape_lp = sample(k_shape, shape_p)
    act_sample, act_lp = sample(k_act, act_p)              # pred_act = True
    act_reward = ((act_sample == gt_act).astype(jnp.float32) - 0.5) * 2.0
    ref_type = (inst_type - 1).astype(jnp.int32)           # pred_ref_type = False

    # absolute-location branch (used where ref_type == 0)
    abs_loc, abs_lp = sample(k_abs, absloc_p)

    # relative-location branch (used where ref_type == 1)
    rel_dir, rel_lp = sample(k_rel, relloc_p)
    att_sample, att_lp = sample(k_att, att_w)
    ref_obj = jnp.take_along_axis(canvas_updated,
                                  att_sample[:, None, None], axis=1)[:, 0]
    off = OFFSETS[rel_dir]
    # NOTE: matches the PyTorch reference exactly: no column-bounds check and
    # ref_obj may come from an empty (-2) cell; the 0..24 validity check below
    # is the only guard, as in the original.
    rel_loc = (ref_obj[:, 2] + off[:, 0]) * 5 + (ref_obj[:, 3] + off[:, 1])

    loc_predict = jnp.where(ref_type == 0, abs_loc, rel_loc).astype(jnp.int32)
    loc_lp = jnp.where(ref_type == 0, abs_lp, rel_lp)

    # rewards (same semantics as the reference python loop)
    valid = (loc_predict >= 0) & (loc_predict < N_CELLS)
    loc_c = jnp.clip(loc_predict, 0, N_CELLS - 1)
    fin_cell = jnp.take_along_axis(final_canvas, loc_c[:, None, None], axis=1)[:, 0]
    ini_cell = jnp.take_along_axis(init_canvas, loc_c[:, None, None], axis=1)[:, 0]
    predict_target = jnp.where((act_sample == 0)[:, None], fin_cell, ini_cell)

    target_match = jnp.all(predict_target[:, 2:] == target[:, 2:], axis=1)
    target_reward = jnp.where(valid & target_match, 1.0, -1.0)
    occupied = predict_target.sum(axis=1) >= 0             # -2 empty encoding, as in reference
    loc_reward = jnp.where(valid & occupied, 1.0, -1.0)
    give_cs = valid & occupied & (act_sample == 0)
    color_reward = jnp.where(
        give_cs, jnp.where(color_sample == predict_target[:, 0], 1.0, -1.0), 0.0)
    shape_reward = jnp.where(
        give_cs, jnp.where(shape_sample == predict_target[:, 1], 1.0, -1.0), 0.0)

    # canvas update (vectorized version of the per-example python loop)
    new_cell = jnp.stack([color_sample, shape_sample, loc_c // 5, loc_c % 5],
                         axis=1).astype(canvas_updated.dtype)
    if eval_mode:
        add_mask = valid & (act_sample == 0)
        del_mask = valid & (act_sample == 1)
    else:
        add_mask = ((act_sample == 0) & (loc_reward > 0)
                    & (color_reward > 0) & (shape_reward > 0))
        del_mask = (act_sample == 1) & (loc_reward > 0)
    onehot = (jnp.arange(N_CELLS)[None, :] == loc_c[:, None])
    write_add = (add_mask[:, None] & onehot)[:, :, None]
    write_del = (del_mask[:, None] & onehot)[:, :, None]
    canvas_updated = jnp.where(write_add, new_cell[:, None, :], canvas_updated)
    canvas_updated = jnp.where(write_del,
                               jnp.full_like(canvas_updated, -2), canvas_updated)

    step_aux = dict(color_log_probs=color_lp, shape_log_probs=shape_lp,
                    loc_log_probs=loc_lp, act_log_probs=act_lp,
                    att_log_probs=att_lp, loc_rewards=loc_reward,
                    color_rewards=color_reward, shape_rewards=shape_reward,
                    act_rewards=act_reward, target_rewards=target_reward)
    return canvas_updated, step_aux


def painter_forward(params, dialog, eval_mode, key):
    # TODO(synk): inst_str debug decoding via ix_to_word is string-only and
    # does not affect compute; omitted.
    final_canvas = dialog[-1][1]
    init_canvas = dialog[0][6]
    canvas_updated = init_canvas
    aux = {k: [] for k in ['color_log_probs', 'shape_log_probs', 'loc_log_probs',
                           'act_log_probs', 'att_log_probs', 'loc_rewards',
                           'color_rewards', 'shape_rewards', 'act_rewards',
                           'target_rewards']}
    for step in dialog:
        inst, _cur, target, _ref, _, inst_type, _prev, gt_act = step
        key, sub = jax.random.split(key)
        canvas_updated, step_aux = painter_step(
            params, inst, target, inst_type, gt_act,
            canvas_updated, final_canvas, init_canvas, sub, eval_mode)
        for k, v in step_aux.items():
            aux[k].append(v)
    success = (((canvas_updated == final_canvas).sum(axis=2) == 4)
               .sum(axis=1) == N_CELLS).astype(jnp.float32)
    aux['success_reward'] = (success - 0.5) * 2.0
    return jnp.mean(success), aux


# ----------------------------------------------------------------------------
if __name__ == "__main__":
    key = jax.random.PRNGKey(0)
    vocab_size = 16
    B, T = 4, 8
    pkey, dkey = jax.random.split(key)
    params = init_params(pkey, vocab_size)

    dk = jax.random.split(dkey, 6)

    def rand_canvas(k):
        filled = jax.random.bernoulli(k, 0.5, (B, N_CELLS))
        colors = jax.random.randint(jax.random.fold_in(k, 1), (B, N_CELLS), 0, 3)
        shapes = jax.random.randint(jax.random.fold_in(k, 2), (B, N_CELLS), 0, 3)
        rows = jnp.broadcast_to(jnp.arange(N_CELLS) // 5, (B, N_CELLS))
        cols = jnp.broadcast_to(jnp.arange(N_CELLS) % 5, (B, N_CELLS))
        cells = jnp.stack([colors, shapes, rows, cols], axis=2)
        return jnp.where(filled[:, :, None], cells, -2).astype(jnp.int32)

    def rand_inst(k):
        toks = jax.random.randint(k, (B, T), 1, vocab_size + 1)
        lens = jax.random.randint(jax.random.fold_in(k, 7), (B,), 3, T + 1)
        mask = jnp.arange(T)[None, :] < lens[:, None]
        return jnp.where(mask, toks, 0).astype(jnp.int32)

    init_canvas = rand_canvas(dk[0])
    mid_canvas = rand_canvas(dk[1])
    final_canvas = rand_canvas(dk[2])

    def make_step(k, canvas, prev_canvas):
        inst = rand_inst(k)
        tgt_ix = jax.random.randint(jax.random.fold_in(k, 3), (B, 1, 1), 0, N_CELLS)
        target = jnp.take_along_axis(canvas, tgt_ix, axis=1)[:, 0]
        inst_type = jax.random.randint(jax.random.fold_in(k, 4), (B,), 1, 3).astype(jnp.int32)
        gt_act = jax.random.randint(jax.random.fold_in(k, 5), (B,), 0, 2).astype(jnp.int32)
        return (inst, canvas, target, None, None, inst_type, prev_canvas, gt_act)

    dialog = [make_step(dk[3], mid_canvas, init_canvas),
              make_step(dk[4], final_canvas, mid_canvas)]

    success_mean, aux = painter_forward(params, dialog, eval_mode=True,
                                        key=jax.random.PRNGKey(42))
    success_mean = jax.block_until_ready(success_mean)
    _ = float(success_mean)
    print("KERNEL_OK")
</pallas_src>

<mosaic_0001>
module attributes {stable_mosaic.version = 11 : i64} {
  func.func @_fused_kernel(%arg0: i32, %arg1: memref<8x4x1xf32, #tpu.memory_space<vmem>>, %arg2: memref<8x4x64xf32, #tpu.memory_space<vmem>>, %arg3: memref<64x256xf32, #tpu.memory_space<vmem>>, %arg4: memref<64x256xf32, #tpu.memory_space<vmem>>, %arg5: memref<1x256xf32, #tpu.memory_space<vmem>>, %arg6: memref<64x41xf32, #tpu.memory_space<vmem>>, %arg7: memref<1x41xf32, #tpu.memory_space<vmem>>, %arg8: memref<100x4xf32, #tpu.memory_space<vmem>>, %arg9: memref<64x32xf32, #tpu.memory_space<vmem>>, %arg10: memref<4x32xf32, #tpu.memory_space<vmem>>, %arg11: memref<1x32xf32, #tpu.memory_space<vmem>>, %arg12: memref<1x32xf32, #tpu.memory_space<vmem>>, %arg13: memref<1x1xf32, #tpu.memory_space<vmem>>, %arg14: memref<4x128xf32, #tpu.memory_space<vmem>>) attributes {dimension_semantics = [#tpu.dimension_semantics<arbitrary>], iteration_bounds = array<i64: 1>, scalar_prefetch = 0 : i64, scratch_operands = 0 : i64, tpu.core_type = #tpu.core_type<tc>, window_params = [{pipeline_mode = #tpu.pipeline_mode<synchronous>, transform_indices = @transform_0, window_bounds = array<i64: 8, 4, 1>}, {pipeline_mode = #tpu.pipeline_mode<synchronous>, transform_indices = @transform_1, window_bounds = array<i64: 8, 4, 64>}, {pipeline_mode = #tpu.pipeline_mode<synchronous>, transform_indices = @transform_2, window_bounds = array<i64: 64, 256>}, {pipeline_mode = #tpu.pipeline_mode<synchronous>, transform_indices = @transform_3, window_bounds = array<i64: 64, 256>}, {pipeline_mode = #tpu.pipeline_mode<synchronous>, transform_indices = @transform_4, window_bounds = array<i64: 1, 256>}, {pipeline_mode = #tpu.pipeline_mode<synchronous>, transform_indices = @transform_5, window_bounds = array<i64: 64, 41>}, {pipeline_mode = #tpu.pipeline_mode<synchronous>, transform_indices = @transform_6, window_bounds = array<i64: 1, 41>}, {pipeline_mode = #tpu.pipeline_mode<synchronous>, transform_indices = @transform_7, window_bounds = array<i64: 100, 4>}, {pipeline_mode = #tpu.pipeline_mode<synchronous>, transform_indices = @transform_8, window_bounds = array<i64: 64, 32>}, {pipeline_mode = #tpu.pipeline_mode<synchronous>, transform_indices = @transform_9, window_bounds = array<i64: 4, 32>}, {pipeline_mode = #tpu.pipeline_mode<synchronous>, transform_indices = @transform_10, window_bounds = array<i64: 1, 32>}, {pipeline_mode = #tpu.pipeline_mode<synchronous>, transform_indices = @transform_11, window_bounds = array<i64: 1, 32>}, {pipeline_mode = #tpu.pipeline_mode<synchronous>, transform_indices = @transform_12, window_bounds = array<i64: 1, 1>}, {pipeline_mode = #tpu.pipeline_mode<synchronous>, transform_indices = @transform_13, window_bounds = array<i64: 4, 128>}]} {
    %c0 = arith.constant 0 : index
    %c0_0 = arith.constant 0 : index
    %0 = vector.load %arg3[%c0, %c0_0] : memref<64x256xf32, #tpu.memory_space<vmem>>, vector<64x256xf32>
    %c0_1 = arith.constant 0 : index
    %c0_2 = arith.constant 0 : index
    %1 = vector.load %arg4[%c0_1, %c0_2] : memref<64x256xf32, #tpu.memory_space<vmem>>, vector<64x256xf32>
    %c0_3 = arith.constant 0 : index
    %c0_4 = arith.constant 0 : index
    %2 = vector.load %arg5[%c0_3, %c0_4] : memref<1x256xf32, #tpu.memory_space<vmem>>, vector<1x256xf32>
    %cst = arith.constant 0.000000e+00 : f32
    %3 = vector.broadcast %cst : f32 to vector<4x64xf32>
    %c0_i32 = arith.constant 0 : i32
    %4 = arith.index_cast %c0_i32 : i32 to index
    %c0_5 = arith.constant 0 : index
    %c0_6 = arith.constant 0 : index
    %5 = vector.load %arg2[%4, %c0_5, %c0_6] : memref<8x4x64xf32, #tpu.memory_space<vmem>>, vector<1x4x64xf32>
    %6 = vector.shape_cast %5 : vector<1x4x64xf32> to vector<4x64xf32>
    %cst_7 = arith.constant dense<0.000000e+00> : vector<4x256xf32>
    %7 = tpu.matmul %6, %0, %cst_7 {dimension_numbers = #tpu.dot_dimension_numbers<[1], [0], [0], [1], [0, 0, 1, 1], [], []>} : vector<4x64xf32>, vector<64x256xf32>, vector<4x256xf32> -> vector<4x256xf32>
    %cst_8 = arith.constant dense<0.000000e+00> : vector<4x256xf32>
    %8 = tpu.matmul %3, %1, %cst_8 {dimension_numbers = #tpu.dot_dimension_numbers<[1], [0], [0], [1], [0, 0, 1, 1], [], []>} : vector<4x64xf32>, vector<64x256xf32>, vector<4x256xf32> -> vector<4x256xf32>
    %9 = arith.addf %7, %8 : vector<4x256xf32>
    %10 = vector.broadcast %2 : vector<1x256xf32> to vector<4x256xf32>
    %11 = arith.addf %9, %10 : vector<4x256xf32>
    %12 = vector.extract_strided_slice %11 {offsets = [0, 0], sizes = [4, 192], strides = [1, 1]} : vector<4x256xf32> to vector<4x192xf32>
    %13 = arith.negf %12 : vector<4x192xf32>
    %14 = math.exp %13 : vector<4x192xf32>
    %cst_9 = arith.constant 1.000000e+00 : f32
    %15 = vector.broadcast %cst_9 : f32 to vector<4x192xf32>
    %16 = arith.addf %15, %14 : vector<4x192xf32>
    %17 = arith.divf %15, %16 : vector<4x192xf32>
    %18 = vector.extract_strided_slice %11 {offsets = [0, 192], sizes = [4, 64], strides = [1, 1]} : vector<4x256xf32> to vector<4x64xf32>
    %19 = math.tanh %18 : vector<4x64xf32>
    %20 = vector.extract_strided_slice %17 {offsets = [0, 0], sizes = [4, 64], strides = [1, 1]} : vector<4x192xf32> to vector<4x64xf32>
    %21 = vector.extract_strided_slice %17 {offsets = [0, 64], sizes = [4, 64], strides = [1, 1]} : vector<4x192xf32> to vector<4x64xf32>
    %22 = vector.extract_strided_slice %17 {offsets = [0, 128], sizes = [4, 64], strides = [1, 1]} : vector<4x192xf32> to vector<4x64xf32>
    %23 = arith.mulf %21, %3 : vector<4x64xf32>
    %24 = arith.mulf %20, %19 : vector<4x64xf32>
    %25 = arith.addf %23, %24 : vector<4x64xf32>
    %26 = math.tanh %25 : vector<4x64xf32>
    %27 = arith.mulf %22, %26 : vector<4x64xf32>
    %28 = arith.index_cast %c0_i32 : i32 to index
    %c0_10 = arith.constant 0 : index
    %c0_11 = arith.constant 0 : index
    %29 = vector.load %arg1[%28, %c0_10, %c0_11] : memref<8x4x1xf32, #tpu.memory_space<vmem>>, vector<1x4x1xf32>
    %30 = vector.shape_cast %29 : vector<1x4x1xf32> to vector<4x1xf32>
    %31 = vector.broadcast %30 : vector<4x1xf32> to vector<4x64xf32>
    %32 = arith.mulf %31, %27 : vector<4x64xf32>
    %33 = arith.addf %3, %32 : vector<4x64xf32>
    %c1_i32 = arith.constant 1 : i32
    %34 = arith.index_cast %c1_i32 : i32 to index
    %c0_12 = arith.constant 0 : index
    %c0_13 = arith.constant 0 : index
    %35 = vector.load %arg2[%34, %c0_12, %c0_13] : memref<8x4x64xf32, #tpu.memory_space<vmem>>, vector<1x4x64xf32>
    %36 = vector.shape_cast %35 : vector<1x4x64xf32> to vector<4x64xf32>
    %cst_14 = arith.constant dense<0.000000e+00> : vector<4x256xf32>
    %37 = tpu.matmul %36, %0, %cst_14 {dimension_numbers = #tpu.dot_dimension_numbers<[1], [0], [0], [1], [0, 0, 1, 1], [], []>} : vector<4x64xf32>, vector<64x256xf32>, vector<4x256xf32> -> vector<4x256xf32>
    %cst_15 = arith.constant dense<0.000000e+00> : vector<4x256xf32>
    %38 = tpu.matmul %27, %1, %cst_15 {dimension_numbers = #tpu.dot_dimension_numbers<[1], [0], [0], [1], [0, 0, 1, 1], [], []>} : vector<4x64xf32>, vector<64x256xf32>, vector<4x256xf32> -> vector<4x256xf32>
    %39 = arith.addf %37, %38 : vector<4x256xf32>
    %40 = vector.broadcast %2 : vector<1x256xf32> to vector<4x256xf32>
    %41 = arith.addf %39, %40 : vector<4x256xf32>
    %42 = vector.extract_strided_slice %41 {offsets = [0, 0], sizes = [4, 192], strides = [1, 1]} : vector<4x256xf32> to vector<4x192xf32>
    %43 = arith.negf %42 : vector<4x192xf32>
    %44 = math.exp %43 : vector<4x192xf32>
    %cst_16 = arith.constant 1.000000e+00 : f32
    %45 = vector.broadcast %cst_16 : f32 to vector<4x192xf32>
    %46 = arith.addf %45, %44 : vector<4x192xf32>
    %47 = arith.divf %45, %46 : vector<4x192xf32>
    %48 = vector.extract_strided_slice %41 {offsets = [0, 192], sizes = [4, 64], strides = [1, 1]} : vector<4x256xf32> to vector<4x64xf32>
    %49 = math.tanh %48 : vector<4x64xf32>
    %50 = vector.extract_strided_slice %47 {offsets = [0, 0], sizes = [4, 64], strides = [1, 1]} : vector<4x192xf32> to vector<4x64xf32>
    %51 = vector.extract_strided_slice %47 {offsets = [0, 64], sizes = [4, 64], strides = [1, 1]} : vector<4x192xf32> to vector<4x64xf32>
    %52 = vector.extract_strided_slice %47 {offsets = [0, 128], sizes = [4, 64], strides = [1, 1]} : vector<4x192xf32> to vector<4x64xf32>
    %53 = arith.mulf %51, %25 : vector<4x64xf32>
    %54 = arith.mulf %50, %49 : vector<4x64xf32>
    %55 = arith.addf %53, %54 : vector<4x64xf32>
    %56 = math.tanh %55 : vector<4x64xf32>
    %57 = arith.mulf %52, %56 : vector<4x64xf32>
    %58 = arith.index_cast %c1_i32 : i32 to index
    %c0_17 = arith.constant 0 : index
    %c0_18 = arith.constant 0 : index
    %59 = vector.load %arg1[%58, %c0_17, %c0_18] : memref<8x4x1xf32, #tpu.memory_space<vmem>>, vector<1x4x1xf32>
    %60 = vector.shape_cast %59 : vector<1x4x1xf32> to vector<4x1xf32>
    %61 = vector.broadcast %60 : vector<4x1xf32> to vector<4x64xf32>
    %62 = arith.mulf %61, %57 : vector<4x64xf32>
    %63 = arith.addf %33, %62 : vector<4x64xf32>
    %c2_i32 = arith.constant 2 : i32
    %64 = arith.index_cast %c2_i32 : i32 to index
    %c0_19 = arith.constant 0 : index
    %c0_20 = arith.constant 0 : index
    %65 = vector.load %arg2[%64, %c0_19, %c0_20] : memref<8x4x64xf32, #tpu.memory_space<vmem>>, vector<1x4x64xf32>
    %66 = vector.shape_cast %65 : vector<1x4x64xf32> to vector<4x64xf32>
    %cst_21 = arith.constant dense<0.000000e+00> : vector<4x256xf32>
    %67 = tpu.matmul %66, %0, %cst_21 {dimension_numbers = #tpu.dot_dimension_numbers<[1], [0], [0], [1], [0, 0, 1, 1], [], []>} : vector<4x64xf32>, vector<64x256xf32>, vector<4x256xf32> -> vector<4x256xf32>
    %cst_22 = arith.constant dense<0.000000e+00> : vector<4x256xf32>
    %68 = tpu.matmul %57, %1, %cst_22 {dimension_numbers = #tpu.dot_dimension_numbers<[1], [0], [0], [1], [0, 0, 1, 1], [], []>} : vector<4x64xf32>, vector<64x256xf32>, vector<4x256xf32> -> vector<4x256xf32>
    %69 = arith.addf %67, %68 : vector<4x256xf32>
    %70 = vector.broadcast %2 : vector<1x256xf32> to vector<4x256xf32>
    %71 = arith.addf %69, %70 : vector<4x256xf32>
    %72 = vector.extract_strided_slice %71 {offsets = [0, 0], sizes = [4, 192], strides = [1, 1]} : vector<4x256xf32> to vector<4x192xf32>
    %73 = arith.negf %72 : vector<4x192xf32>
    %74 = math.exp %73 : vector<4x192xf32>
    %cst_23 = arith.constant 1.000000e+00 : f32
    %75 = vector.broadcast %cst_23 : f32 to vector<4x192xf32>
    %76 = arith.addf %75, %74 : vector<4x192xf32>
    %77 = arith.divf %75, %76 : vector<4x192xf32>
    %78 = vector.extract_strided_slice %71 {offsets = [0, 192], sizes = [4, 64], strides = [1, 1]} : vector<4x256xf32> to vector<4x64xf32>
    %79 = math.tanh %78 : vector<4x64xf32>
    %80 = vector.extract_strided_slice %77 {offsets = [0, 0], sizes = [4, 64], strides = [1, 1]} : vector<4x192xf32> to vector<4x64xf32>
    %81 = vector.extract_strided_slice %77 {offsets = [0, 64], sizes = [4, 64], strides = [1, 1]} : vector<4x192xf32> to vector<4x64xf32>
    %82 = vector.extract_strided_slice %77 {offsets = [0, 128], sizes = [4, 64], strides = [1, 1]} : vector<4x192xf32> to vector<4x64xf32>
    %83 = arith.mulf %81, %55 : vector<4x64xf32>
    %84 = arith.mulf %80, %79 : vector<4x64xf32>
    %85 = arith.addf %83, %84 : vector<4x64xf32>
    %86 = math.tanh %85 : vector<4x64xf32>
    %87 = arith.mulf %82, %86 : vector<4x64xf32>
    %88 = arith.index_cast %c2_i32 : i32 to index
    %c0_24 = arith.constant 0 : index
    %c0_25 = arith.constant 0 : index
    %89 = vector.load %arg1[%88, %c0_24, %c0_25] : memref<8x4x1xf32, #tpu.memory_space<vmem>>, vector<1x4x1xf32>
    %90 = vector.shape_cast %89 : vector<1x4x1xf32> to vector<4x1xf32>
    %91 = vector.broadcast %90 : vector<4x1xf32> to vector<4x64xf32>
    %92 = arith.mulf %91, %87 : vector<4x64xf32>
    %93 = arith.addf %63, %92 : vector<4x64xf32>
    %c3_i32 = arith.constant 3 : i32
    %94 = arith.index_cast %c3_i32 : i32 to index
    %c0_26 = arith.constant 0 : index
    %c0_27 = arith.constant 0 : index
    %95 = vector.load %arg2[%94, %c0_26, %c0_27] : memref<8x4x64xf32, #tpu.memory_space<vmem>>, vector<1x4x64xf32>
    %96 = vector.shape_cast %95 : vector<1x4x64xf32> to vector<4x64xf32>
    %cst_28 = arith.constant dense<0.000000e+00> : vector<4x256xf32>
    %97 = tpu.matmul %96, %0, %cst_28 {dimension_numbers = #tpu.dot_dimension_numbers<[1], [0], [0], [1], [0, 0, 1, 1], [], []>} : vector<4x64xf32>, vector<64x256xf32>, vector<4x256xf32> -> vector<4x256xf32>
    %cst_29 = arith.constant dense<0.000000e+00> : vector<4x256xf32>
    %98 = tpu.matmul %87, %1, %cst_29 {dimension_numbers = #tpu.dot_dimension_numbers<[1], [0], [0], [1], [0, 0, 1, 1], [], []>} : vector<4x64xf32>, vector<64x256xf32>, vector<4x256xf32> -> vector<4x256xf32>
    %99 = arith.addf %97, %98 : vector<4x256xf32>
    %100 = vector.broadcast %2 : vector<1x256xf32> to vector<4x256xf32>
    %101 = arith.addf %99, %100 : vector<4x256xf32>
    %102 = vector.extract_strided_slice %101 {offsets = [0, 0], sizes = [4, 192], strides = [1, 1]} : vector<4x256xf32> to vector<4x192xf32>
    %103 = arith.negf %102 : vector<4x192xf32>
    %104 = math.exp %103 : vector<4x192xf32>
    %cst_30 = arith.constant 1.000000e+00 : f32
    %105 = vector.broadcast %cst_30 : f32 to vector<4x192xf32>
    %106 = arith.addf %105, %104 : vector<4x192xf32>
    %107 = arith.divf %105, %106 : vector<4x192xf32>
    %108 = vector.extract_strided_slice %101 {offsets = [0, 192], sizes = [4, 64], strides = [1, 1]} : vector<4x256xf32> to vector<4x64xf32>
    %109 = math.tanh %108 : vector<4x64xf32>
    %110 = vector.extract_strided_slice %107 {offsets = [0, 0], sizes = [4, 64], strides = [1, 1]} : vector<4x192xf32> to vector<4x64xf32>
    %111 = vector.extract_strided_slice %107 {offsets = [0, 64], sizes = [4, 64], strides = [1, 1]} : vector<4x192xf32> to vector<4x64xf32>
    %112 = vector.extract_strided_slice %107 {offsets = [0, 128], sizes = [4, 64], strides = [1, 1]} : vector<4x192xf32> to vector<4x64xf32>
    %113 = arith.mulf %111, %85 : vector<4x64xf32>
    %114 = arith.mulf %110, %109 : vector<4x64xf32>
    %115 = arith.addf %113, %114 : vector<4x64xf32>
    %116 = math.tanh %115 : vector<4x64xf32>
    %117 = arith.mulf %112, %116 : vector<4x64xf32>
    %118 = arith.index_cast %c3_i32 : i32 to index
    %c0_31 = arith.constant 0 : index
    %c0_32 = arith.constant 0 : index
    %119 = vector.load %arg1[%118, %c0_31, %c0_32] : memref<8x4x1xf32, #tpu.memory_space<vmem>>, vector<1x4x1xf32>
    %120 = vector.shape_cast %119 : vector<1x4x1xf32> to vector<4x1xf32>
    %121 = vector.broadcast %120 : vector<4x1xf32> to vector<4x64xf32>
    %122 = arith.mulf %121, %117 : vector<4x64xf32>
    %123 = arith.addf %93, %122 : vector<4x64xf32>
    %c4_i32 = arith.constant 4 : i32
    %124 = arith.index_cast %c4_i32 : i32 to index
    %c0_33 = arith.constant 0 : index
    %c0_34 = arith.constant 0 : index
    %125 = vector.load %arg2[%124, %c0_33, %c0_34] : memref<8x4x64xf32, #tpu.memory_space<vmem>>, vector<1x4x64xf32>
    %126 = vector.shape_cast %125 : vector<1x4x64xf32> to vector<4x64xf32>
    %cst_35 = arith.constant dense<0.000000e+00> : vector<4x256xf32>
    %127 = tpu.matmul %126, %0, %cst_35 {dimension_numbers = #tpu.dot_dimension_numbers<[1], [0], [0], [1], [0, 0, 1, 1], [], []>} : vector<4x64xf32>, vector<64x256xf32>, vector<4x256xf32> -> vector<4x256xf32>
    %cst_36 = arith.constant dense<0.000000e+00> : vector<4x256xf32>
    %128 = tpu.matmul %117, %1, %cst_36 {dimension_numbers = #tpu.dot_dimension_numbers<[1], [0], [0], [1], [0, 0, 1, 1], [], []>} : vector<4x64xf32>, vector<64x256xf32>, vector<4x256xf32> -> vector<4x256xf32>
    %129 = arith.addf %127, %128 : vector<4x256xf32>
    %130 = vector.broadcast %2 : vector<1x256xf32> to vector<4x256xf32>
    %131 = arith.addf %129, %130 : vector<4x256xf32>
    %132 = vector.extract_strided_slice %131 {offsets = [0, 0], sizes = [4, 192], strides = [1, 1]} : vector<4x256xf32> to vector<4x192xf32>
    %133 = arith.negf %132 : vector<4x192xf32>
    %134 = math.exp %133 : vector<4x192xf32>
    %cst_37 = arith.constant 1.000000e+00 : f32
    %135 = vector.broadcast %cst_37 : f32 to vector<4x192xf32>
    %136 = arith.addf %135, %134 : vector<4x192xf32>
    %137 = arith.divf %135, %136 : vector<4x192xf32>
    %138 = vector.extract_strided_slice %131 {offsets = [0, 192], sizes = [4, 64], strides = [1, 1]} : vector<4x256xf32> to vector<4x64xf32>
    %139 = math.tanh %138 : vector<4x64xf32>
    %140 = vector.extract_strided_slice %137 {offsets = [0, 0], sizes = [4, 64], strides = [1, 1]} : vector<4x192xf32> to vector<4x64xf32>
    %141 = vector.extract_strided_slice %137 {offsets = [0, 64], sizes = [4, 64], strides = [1, 1]} : vector<4x192xf32> to vector<4x64xf32>
    %142 = vector.extract_strided_slice %137 {offsets = [0, 128], sizes = [4, 64], strides = [1, 1]} : vector<4x192xf32> to vector<4x64xf32>
    %143 = arith.mulf %141, %115 : vector<4x64xf32>
    %144 = arith.mulf %140, %139 : vector<4x64xf32>
    %145 = arith.addf %143, %144 : vector<4x64xf32>
    %146 = math.tanh %145 : vector<4x64xf32>
    %147 = arith.mulf %142, %146 : vector<4x64xf32>
    %148 = arith.index_cast %c4_i32 : i32 to index
    %c0_38 = arith.constant 0 : index
    %c0_39 = arith.constant 0 : index
    %149 = vector.load %arg1[%148, %c0_38, %c0_39] : memref<8x4x1xf32, #tpu.memory_space<vmem>>, vector<1x4x1xf32>
    %150 = vector.shape_cast %149 : vector<1x4x1xf32> to vector<4x1xf32>
    %151 = vector.broadcast %150 : vector<4x1xf32> to vector<4x64xf32>
    %152 = arith.mulf %151, %147 : vector<4x64xf32>
    %153 = arith.addf %123, %152 : vector<4x64xf32>
    %c5_i32 = arith.constant 5 : i32
    %154 = arith.index_cast %c5_i32 : i32 to index
    %c0_40 = arith.constant 0 : index
    %c0_41 = arith.constant 0 : index
    %155 = vector.load %arg2[%154, %c0_40, %c0_41] : memref<8x4x64xf32, #tpu.memory_space<vmem>>, vector<1x4x64xf32>
    %156 = vector.shape_cast %155 : vector<1x4x64xf32> to vector<4x64xf32>
    %cst_42 = arith.constant dense<0.000000e+00> : vector<4x256xf32>
    %157 = tpu.matmul %156, %0, %cst_42 {dimension_numbers = #tpu.dot_dimension_numbers<[1], [0], [0], [1], [0, 0, 1, 1], [], []>} : vector<4x64xf32>, vector<64x256xf32>, vector<4x256xf32> -> vector<4x256xf32>
    %cst_43 = arith.constant dense<0.000000e+00> : vector<4x256xf32>
    %158 = tpu.matmul %147, %1, %cst_43 {dimension_numbers = #tpu.dot_dimension_numbers<[1], [0], [0], [1], [0, 0, 1, 1], [], []>} : vector<4x64xf32>, vector<64x256xf32>, vector<4x256xf32> -> vector<4x256xf32>
    %159 = arith.addf %157, %158 : vector<4x256xf32>
    %160 = vector.broadcast %2 : vector<1x256xf32> to vector<4x256xf32>
    %161 = arith.addf %159, %160 : vector<4x256xf32>
    %162 = vector.extract_strided_slice %161 {offsets = [0, 0], sizes = [4, 192], strides = [1, 1]} : vector<4x256xf32> to vector<4x192xf32>
    %163 = arith.negf %162 : vector<4x192xf32>
    %164 = math.exp %163 : vector<4x192xf32>
    %cst_44 = arith.constant 1.000000e+00 : f32
    %165 = vector.broadcast %cst_44 : f32 to vector<4x192xf32>
    %166 = arith.addf %165, %164 : vector<4x192xf32>
    %167 = arith.divf %165, %166 : vector<4x192xf32>
    %168 = vector.extract_strided_slice %161 {offsets = [0, 192], sizes = [4, 64], strides = [1, 1]} : vector<4x256xf32> to vector<4x64xf32>
    %169 = math.tanh %168 : vector<4x64xf32>
    %170 = vector.extract_strided_slice %167 {offsets = [0, 0], sizes = [4, 64], strides = [1, 1]} : vector<4x192xf32> to vector<4x64xf32>
    %171 = vector.extract_strided_slice %167 {offsets = [0, 64], sizes = [4, 64], strides = [1, 1]} : vector<4x192xf32> to vector<4x64xf32>
    %172 = vector.extract_strided_slice %167 {offsets = [0, 128], sizes = [4, 64], strides = [1, 1]} : vector<4x192xf32> to vector<4x64xf32>
    %173 = arith.mulf %171, %145 : vector<4x64xf32>
    %174 = arith.mulf %170, %169 : vector<4x64xf32>
    %175 = arith.addf %173, %174 : vector<4x64xf32>
    %176 = math.tanh %175 : vector<4x64xf32>
    %177 = arith.mulf %172, %176 : vector<4x64xf32>
    %178 = arith.index_cast %c5_i32 : i32 to index
    %c0_45 = arith.constant 0 : index
    %c0_46 = arith.constant 0 : index
    %179 = vector.load %arg1[%178, %c0_45, %c0_46] : memref<8x4x1xf32, #tpu.memory_space<vmem>>, vector<1x4x1xf32>
    %180 = vector.shape_cast %179 : vector<1x4x1xf32> to vector<4x1xf32>
    %181 = vector.broadcast %180 : vector<4x1xf32> to vector<4x64xf32>
    %182 = arith.mulf %181, %177 : vector<4x64xf32>
    %183 = arith.addf %153, %182 : vector<4x64xf32>
    %c6_i32 = arith.constant 6 : i32
    %184 = arith.index_cast %c6_i32 : i32 to index
    %c0_47 = arith.constant 0 : index
    %c0_48 = arith.constant 0 : index
    %185 = vector.load %arg2[%184, %c0_47, %c0_48] : memref<8x4x64xf32, #tpu.memory_space<vmem>>, vector<1x4x64xf32>
    %186 = vector.shape_cast %185 : vector<1x4x64xf32> to vector<4x64xf32>
    %cst_49 = arith.constant dense<0.000000e+00> : vector<4x256xf32>
    %187 = tpu.matmul %186, %0, %cst_49 {dimension_numbers = #tpu.dot_dimension_numbers<[1], [0], [0], [1], [0, 0, 1, 1], [], []>} : vector<4x64xf32>, vector<64x256xf32>, vector<4x256xf32> -> vector<4x256xf32>
    %cst_50 = arith.constant dense<0.000000e+00> : vector<4x256xf32>
    %188 = tpu.matmul %177, %1, %cst_50 {dimension_numbers = #tpu.dot_dimension_numbers<[1], [0], [0], [1], [0, 0, 1, 1], [], []>} : vector<4x64xf32>, vector<64x256xf32>, vector<4x256xf32> -> vector<4x256xf32>
    %189 = arith.addf %187, %188 : vector<4x256xf32>
    %190 = vector.broadcast %2 : vector<1x256xf32> to vector<4x256xf32>
    %191 = arith.addf %189, %190 : vector<4x256xf32>
    %192 = vector.extract_strided_slice %191 {offsets = [0, 0], sizes = [4, 192], strides = [1, 1]} : vector<4x256xf32> to vector<4x192xf32>
    %193 = arith.negf %192 : vector<4x192xf32>
    %194 = math.exp %193 : vector<4x192xf32>
    %cst_51 = arith.constant 1.000000e+00 : f32
    %195 = vector.broadcast %cst_51 : f32 to vector<4x192xf32>
    %196 = arith.addf %195, %194 : vector<4x192xf32>
    %197 = arith.divf %195, %196 : vector<4x192xf32>
    %198 = vector.extract_strided_slice %191 {offsets = [0, 192], sizes = [4, 64], strides = [1, 1]} : vector<4x256xf32> to vector<4x64xf32>
    %199 = math.tanh %198 : vector<4x64xf32>
    %200 = vector.extract_strided_slice %197 {offsets = [0, 0], sizes = [4, 64], strides = [1, 1]} : vector<4x192xf32> to vector<4x64xf32>
    %201 = vector.extract_strided_slice %197 {offsets = [0, 64], sizes = [4, 64], strides = [1, 1]} : vector<4x192xf32> to vector<4x64xf32>
    %202 = vector.extract_strided_slice %197 {offsets = [0, 128], sizes = [4, 64], strides = [1, 1]} : vector<4x192xf32> to vector<4x64xf32>
    %203 = arith.mulf %201, %175 : vector<4x64xf32>
    %204 = arith.mulf %200, %199 : vector<4x64xf32>
    %205 = arith.addf %203, %204 : vector<4x64xf32>
    %206 = math.tanh %205 : vector<4x64xf32>
    %207 = arith.mulf %202, %206 : vector<4x64xf32>
    %208 = arith.index_cast %c6_i32 : i32 to index
    %c0_52 = arith.constant 0 : index
    %c0_53 = arith.constant 0 : index
    %209 = vector.load %arg1[%208, %c0_52, %c0_53] : memref<8x4x1xf32, #tpu.memory_space<vmem>>, vector<1x4x1xf32>
    %210 = vector.shape_cast %209 : vector<1x4x1xf32> to vector<4x1xf32>
    %211 = vector.broadcast %210 : vector<4x1xf32> to vector<4x64xf32>
    %212 = arith.mulf %211, %207 : vector<4x64xf32>
    %213 = arith.addf %183, %212 : vector<4x64xf32>
    %c7_i32 = arith.constant 7 : i32
    %214 = arith.index_cast %c7_i32 : i32 to index
    %c0_54 = arith.constant 0 : index
    %c0_55 = arith.constant 0 : index
    %215 = vector.load %arg2[%214, %c0_54, %c0_55] : memref<8x4x64xf32, #tpu.memory_space<vmem>>, vector<1x4x64xf32>
    %216 = vector.shape_cast %215 : vector<1x4x64xf32> to vector<4x64xf32>
    %cst_56 = arith.constant dense<0.000000e+00> : vector<4x256xf32>
    %217 = tpu.matmul %216, %0, %cst_56 {dimension_numbers = #tpu.dot_dimension_numbers<[1], [0], [0], [1], [0, 0, 1, 1], [], []>} : vector<4x64xf32>, vector<64x256xf32>, vector<4x256xf32> -> vector<4x256xf32>
    %cst_57 = arith.constant dense<0.000000e+00> : vector<4x256xf32>
    %218 = tpu.matmul %207, %1, %cst_57 {dimension_numbers = #tpu.dot_dimension_numbers<[1], [0], [0], [1], [0, 0, 1, 1], [], []>} : vector<4x64xf32>, vector<64x256xf32>, vector<4x256xf32> -> vector<4x256xf32>
    %219 = arith.addf %217, %218 : vector<4x256xf32>
    %220 = vector.broadcast %2 : vector<1x256xf32> to vector<4x256xf32>
    %221 = arith.addf %219, %220 : vector<4x256xf32>
    %222 = vector.extract_strided_slice %221 {offsets = [0, 0], sizes = [4, 192], strides = [1, 1]} : vector<4x256xf32> to vector<4x192xf32>
    %223 = arith.negf %222 : vector<4x192xf32>
    %224 = math.exp %223 : vector<4x192xf32>
    %cst_58 = arith.constant 1.000000e+00 : f32
    %225 = vector.broadcast %cst_58 : f32 to vector<4x192xf32>
    %226 = arith.addf %225, %224 : vector<4x192xf32>
    %227 = arith.divf %225, %226 : vector<4x192xf32>
    %228 = vector.extract_strided_slice %221 {offsets = [0, 192], sizes = [4, 64], strides = [1, 1]} : vector<4x256xf32> to vector<4x64xf32>
    %229 = math.tanh %228 : vector<4x64xf32>
    %230 = vector.extract_strided_slice %227 {offsets = [0, 0], sizes = [4, 64], strides = [1, 1]} : vector<4x192xf32> to vector<4x64xf32>
    %231 = vector.extract_strided_slice %227 {offsets = [0, 64], sizes = [4, 64], strides = [1, 1]} : vector<4x192xf32> to vector<4x64xf32>
    %232 = vector.extract_strided_slice %227 {offsets = [0, 128], sizes = [4, 64], strides = [1, 1]} : vector<4x192xf32> to vector<4x64xf32>
    %233 = arith.mulf %231, %205 : vector<4x64xf32>
    %234 = arith.mulf %230, %229 : vector<4x64xf32>
    %235 = arith.addf %233, %234 : vector<4x64xf32>
    %236 = math.tanh %235 : vector<4x64xf32>
    %237 = arith.mulf %232, %236 : vector<4x64xf32>
    %238 = arith.index_cast %c7_i32 : i32 to index
    %c0_59 = arith.constant 0 : index
    %c0_60 = arith.constant 0 : index
    %239 = vector.load %arg1[%238, %c0_59, %c0_60] : memref<8x4x1xf32, #tpu.memory_space<vmem>>, vector<1x4x1xf32>
    %240 = vector.shape_cast %239 : vector<1x4x1xf32> to vector<4x1xf32>
    %241 = vector.broadcast %240 : vector<4x1xf32> to vector<4x64xf32>
    %242 = arith.mulf %241, %237 : vector<4x64xf32>
    %243 = arith.addf %213, %242 : vector<4x64xf32>
    %c8_i32 = arith.constant 8 : i32
    %c0_61 = arith.constant 0 : index
    %c0_62 = arith.constant 0 : index
    %244 = vector.load %arg6[%c0_61, %c0_62] : memref<64x41xf32, #tpu.memory_space<vmem>>, vector<64x41xf32>
    %cst_63 = arith.constant dense<0.000000e+00> : vector<4x41xf32>
    %245 = tpu.matmul %243, %244, %cst_63 {dimension_numbers = #tpu.dot_dimension_numbers<[1], [0], [0], [1], [0, 0, 1, 1], [], []>} : vector<4x64xf32>, vector<64x41xf32>, vector<4x41xf32> -> vector<4x41xf32>
    %c0_64 = arith.constant 0 : index
    %c0_65 = arith.constant 0 : index
    %246 = vector.load %arg7[%c0_64, %c0_65] : memref<1x41xf32, #tpu.memory_space<vmem>>, vector<1x41xf32>
    %247 = vector.broadcast %246 : vector<1x41xf32> to vector<4x41xf32>
    %248 = arith.addf %245, %247 : vector<4x41xf32>
    %249 = vector.extract_strided_slice %248 {offsets = [0, 0], sizes = [4, 3], strides = [1, 1]} : vector<4x41xf32> to vector<4x3xf32>
    %cst_66 = arith.constant dense<0xFF800000> : vector<4xf32>
    %250 = vector.multi_reduction <maximumf>, %249, %cst_66 [1] : vector<4x3xf32> to vector<4xf32>
    %251 = vector.shape_cast %250 : vector<4xf32> to vector<4x1xf32>
    %252 = vector.broadcast %251 : vector<4x1xf32> to vector<4x3xf32>
    %253 = arith.subf %249, %252 : vector<4x3xf32>
    %254 = math.exp %253 : vector<4x3xf32>
    %cst_67 = arith.constant dense<0.000000e+00> : vector<4xf32>
    %255 = vector.multi_reduction <add>, %254, %cst_67 [1] : vector<4x3xf32> to vector<4xf32>
    %256 = vector.shape_cast %255 : vector<4xf32> to vector<4x1xf32>
    %257 = tpu.reciprocal %256 {approx = true} : vector<4x1xf32> -> vector<4x1xf32>
    %258 = vector.broadcast %257 : vector<4x1xf32> to vector<4x3xf32>
    %259 = arith.mulf %254, %258 : vector<4x3xf32>
    %260 = vector.extract_strided_slice %248 {offsets = [0, 3], sizes = [4, 3], strides = [1, 1]} : vector<4x41xf32> to vector<4x3xf32>
    %cst_68 = arith.constant dense<0xFF800000> : vector<4xf32>
    %261 = vector.multi_reduction <maximumf>, %260, %cst_68 [1] : vector<4x3xf32> to vector<4xf32>
    %262 = vector.shape_cast %261 : vector<4xf32> to vector<4x1xf32>
    %263 = vector.broadcast %262 : vector<4x1xf32> to vector<4x3xf32>
    %264 = arith.subf %260, %263 : vector<4x3xf32>
    %265 = math.exp %264 : vector<4x3xf32>
    %cst_69 = arith.constant dense<0.000000e+00> : vector<4xf32>
    %266 = vector.multi_reduction <add>, %265, %cst_69 [1] : vector<4x3xf32> to vector<4xf32>
    %267 = vector.shape_cast %266 : vector<4xf32> to vector<4x1xf32>
    %268 = tpu.reciprocal %267 {approx = true} : vector<4x1xf32> -> vector<4x1xf32>
    %269 = vector.broadcast %268 : vector<4x1xf32> to vector<4x3xf32>
    %270 = arith.mulf %265, %269 : vector<4x3xf32>
    %271 = vector.extract_strided_slice %248 {offsets = [0, 6], sizes = [4, 2], strides = [1, 1]} : vector<4x41xf32> to vector<4x2xf32>
    %cst_70 = arith.constant dense<0xFF800000> : vector<4xf32>
    %272 = vector.multi_reduction <maximumf>, %271, %cst_70 [1] : vector<4x2xf32> to vector<4xf32>
    %273 = vector.shape_cast %272 : vector<4xf32> to vector<4x1xf32>
    %274 = vector.broadcast %273 : vector<4x1xf32> to vector<4x2xf32>
    %275 = arith.subf %271, %274 : vector<4x2xf32>
    %276 = math.exp %275 : vector<4x2xf32>
    %cst_71 = arith.constant dense<0.000000e+00> : vector<4xf32>
    %277 = vector.multi_reduction <add>, %276, %cst_71 [1] : vector<4x2xf32> to vector<4xf32>
    %278 = vector.shape_cast %277 : vector<4xf32> to vector<4x1xf32>
    %279 = tpu.reciprocal %278 {approx = true} : vector<4x1xf32> -> vector<4x1xf32>
    %280 = vector.broadcast %279 : vector<4x1xf32> to vector<4x2xf32>
    %281 = arith.mulf %276, %280 : vector<4x2xf32>
    %282 = vector.extract_strided_slice %248 {offsets = [0, 8], sizes = [4, 25], strides = [1, 1]} : vector<4x41xf32> to vector<4x25xf32>
    %cst_72 = arith.constant dense<0xFF800000> : vector<4xf32>
    %283 = vector.multi_reduction <maximumf>, %282, %cst_72 [1] : vector<4x25xf32> to vector<4xf32>
    %284 = vector.shape_cast %283 : vector<4xf32> to vector<4x1xf32>
    %285 = vector.broadcast %284 : vector<4x1xf32> to vector<4x25xf32>
    %286 = arith.subf %282, %285 : vector<4x25xf32>
    %287 = math.exp %286 : vector<4x25xf32>
    %cst_73 = arith.constant dense<0.000000e+00> : vector<4xf32>
    %288 = vector.multi_reduction <add>, %287, %cst_73 [1] : vector<4x25xf32> to vector<4xf32>
    %289 = vector.shape_cast %288 : vector<4xf32> to vector<4x1xf32>
    %290 = tpu.reciprocal %289 {approx = true} : vector<4x1xf32> -> vector<4x1xf32>
    %291 = vector.broadcast %290 : vector<4x1xf32> to vector<4x25xf32>
    %292 = arith.mulf %287, %291 : vector<4x25xf32>
    %293 = vector.extract_strided_slice %248 {offsets = [0, 33], sizes = [4, 8], strides = [1, 1]} : vector<4x41xf32> to vector<4x8xf32>
    %cst_74 = arith.constant dense<0xFF800000> : vector<4xf32>
    %294 = vector.multi_reduction <maximumf>, %293, %cst_74 [1] : vector<4x8xf32> to vector<4xf32>
    %295 = vector.shape_cast %294 : vector<4xf32> to vector<4x1xf32>
    %296 = vector.broadcast %295 : vector<4x1xf32> to vector<4x8xf32>
    %297 = arith.subf %293, %296 : vector<4x8xf32>
    %298 = math.exp %297 : vector<4x8xf32>
    %cst_75 = arith.constant dense<0.000000e+00> : vector<4xf32>
    %299 = vector.multi_reduction <add>, %298, %cst_75 [1] : vector<4x8xf32> to vector<4xf32>
    %300 = vector.shape_cast %299 : vector<4xf32> to vector<4x1xf32>
    %301 = tpu.reciprocal %300 {approx = true} : vector<4x1xf32> -> vector<4x1xf32>
    %302 = vector.broadcast %301 : vector<4x1xf32> to vector<4x8xf32>
    %303 = arith.mulf %298, %302 : vector<4x8xf32>
    %c0_76 = arith.constant 0 : index
    %c0_77 = arith.constant 0 : index
    %304 = vector.load %arg8[%c0_76, %c0_77] : memref<100x4xf32, #tpu.memory_space<vmem>>, vector<100x4xf32>
    %c0_78 = arith.constant 0 : index
    %c0_79 = arith.constant 0 : index
    %305 = vector.load %arg9[%c0_78, %c0_79] : memref<64x32xf32, #tpu.memory_space<vmem>>, vector<64x32xf32>
    %cst_80 = arith.constant dense<0.000000e+00> : vector<4x32xf32>
    %306 = tpu.matmul %243, %305, %cst_80 {dimension_numbers = #tpu.dot_dimension_numbers<[1], [0], [0], [1], [0, 0, 1, 1], [], []>} : vector<4x64xf32>, vector<64x32xf32>, vector<4x32xf32> -> vector<4x32xf32>
    %c0_81 = arith.constant 0 : index
    %c0_82 = arith.constant 0 : index
    %307 = vector.load %arg10[%c0_81, %c0_82] : memref<4x32xf32, #tpu.memory_space<vmem>>, vector<4x32xf32>
    %cst_83 = arith.constant dense<0.000000e+00> : vector<100x32xf32>
    %308 = tpu.matmul %304, %307, %cst_83 {dimension_numbers = #tpu.dot_dimension_numbers<[1], [0], [0], [1], [0, 0, 1, 1], [], []>} : vector<100x4xf32>, vector<4x32xf32>, vector<100x32xf32> -> vector<100x32xf32>
    %309 = vector.shape_cast %308 : vector<100x32xf32> to vector<4x25x32xf32>
    %310 = vector.shape_cast %306 : vector<4x32xf32> to vector<4x1x32xf32>
    %311 = vector.broadcast %310 : vector<4x1x32xf32> to vector<4x25x32xf32>
    %312 = arith.addf %309, %311 : vector<4x25x32xf32>
    %c0_84 = arith.constant 0 : index
    %c0_85 = arith.constant 0 : index
    %313 = vector.load %arg11[%c0_84, %c0_85] : memref<1x32xf32, #tpu.memory_space<vmem>>, vector<1x32xf32>
    %314 = vector.shape_cast %313 : vector<1x32xf32> to vector<1x1x32xf32>
    %315 = vector.broadcast %314 : vector<1x1x32xf32> to vector<4x25x32xf32>
    %316 = arith.addf %312, %315 : vector<4x25x32xf32>
    %cst_86 = arith.constant 0.000000e+00 : f32
    %317 = vector.broadcast %cst_86 : f32 to vector<4x25x32xf32>
    %318 = arith.maximumf %316, %317 : vector<4x25x32xf32>
    %c0_87 = arith.constant 0 : index
    %c0_88 = arith.constant 0 : index
    %319 = vector.load %arg12[%c0_87, %c0_88] : memref<1x32xf32, #tpu.memory_space<vmem>>, vector<1x32xf32>
    %320 = vector.shape_cast %319 : vector<1x32xf32> to vector<1x1x32xf32>
    %321 = vector.broadcast %320 : vector<1x1x32xf32> to vector<4x25x32xf32>
    %322 = arith.mulf %318, %321 : vector<4x25x32xf32>
    %cst_89 = arith.constant dense<0.000000e+00> : vector<4x25xf32>
    %323 = vector.multi_reduction <add>, %322, %cst_89 [2] : vector<4x25x32xf32> to vector<4x25xf32>
    %c0_90 = arith.constant 0 : index
    %c0_91 = arith.constant 0 : index
    %324 = vector.load %arg13[%c0_90, %c0_91] : memref<1x1xf32, #tpu.memory_space<vmem>>, vector<1x1xf32>
    %325 = vector.broadcast %324 : vector<1x1xf32> to vector<4x25xf32>
    %326 = arith.addf %323, %325 : vector<4x25xf32>
    %cst_92 = arith.constant dense<0xFF800000> : vector<4xf32>
    %327 = vector.multi_reduction <maximumf>, %326, %cst_92 [1] : vector<4x25xf32> to vector<4xf32>
    %328 = vector.shape_cast %327 : vector<4xf32> to vector<4x1xf32>
    %329 = vector.broadcast %328 : vector<4x1xf32> to vector<4x25xf32>
    %330 = arith.subf %326, %329 : vector<4x25xf32>
    %331 = math.exp %330 : vector<4x25xf32>
    %cst_93 = arith.constant dense<0.000000e+00> : vector<4xf32>
    %332 = vector.multi_reduction <add>, %331, %cst_93 [1] : vector<4x25xf32> to vector<4xf32>
    %333 = vector.shape_cast %332 : vector<4xf32> to vector<4x1xf32>
    %334 = tpu.reciprocal %333 {approx = true} : vector<4x1xf32> -> vector<4x1xf32>
    %335 = vector.broadcast %334 : vector<4x1xf32> to vector<4x25xf32>
    %336 = arith.mulf %331, %335 : vector<4x25xf32>
    %cst_94 = arith.constant 0.000000e+00 : f32
    %337 = vector.broadcast %cst_94 : f32 to vector<4x62xf32>
    %338 = tpu.concatenate %259, %270, %281, %292, %303, %336, %337 in 1 : vector<4x3xf32>, vector<4x3xf32>, vector<4x2xf32>, vector<4x25xf32>, vector<4x8xf32>, vector<4x25xf32>, vector<4x62xf32> -> vector<4x128xf32>
    %c0_95 = arith.constant 0 : index
    %c0_96 = arith.constant 0 : index
    %339 = vector.load %arg14[%c0_95, %c0_96] : memref<4x128xf32, #tpu.memory_space<vmem>>, vector<4x128xf32>
    tpu.vector_store %arg14[%c0_95, %c0_96], %338 {strides = array<i32>} : memref<4x128xf32, #tpu.memory_space<vmem>>, vector<4x128xf32>,
    return
  }
  func.func @transform_0(%arg0: i32) -> (i32, i32, i32) {
    %c0_i32 = arith.constant 0 : i32
    %c0_i32_0 = arith.constant 0 : i32
    %c0_i32_1 = arith.constant 0 : i32
    %c0_i32_2 = arith.constant 0 : i32
    return %c0_i32, %c0_i32_0, %c0_i32_1 : i32, i32, i32
  }
  func.func @transform_1(%arg0: i32) -> (i32, i32, i32) {
    %c0_i32 = arith.constant 0 : i32
    %c0_i32_0 = arith.constant 0 : i32
    %c0_i32_1 = arith.constant 0 : i32
    %c0_i32_2 = arith.constant 0 : i32
    return %c0_i32, %c0_i32_0, %c0_i32_1 : i32, i32, i32
  }
  func.func @transform_2(%arg0: i32) -> (i32, i32) {
    %c0_i32 = arith.constant 0 : i32
    %c0_i32_0 = arith.constant 0 : i32
    %c0_i32_1 = arith.constant 0 : i32
    return %c0_i32, %c0_i32_0 : i32, i32
  }
  func.func @transform_3(%arg0: i32) -> (i32, i32) {
    %c0_i32 = arith.constant 0 : i32
    %c0_i32_0 = arith.constant 0 : i32
    %c0_i32_1 = arith.constant 0 : i32
    return %c0_i32, %c0_i32_0 : i32, i32
  }
  func.func @transform_4(%arg0: i32) -> (i32, i32) {
    %c0_i32 = arith.constant 0 : i32
    %c0_i32_0 = arith.constant 0 : i32
    %c0_i32_1 = arith.constant 0 : i32
    return %c0_i32, %c0_i32_0 : i32, i32
  }
  func.func @transform_5(%arg0: i32) -> (i32, i32) {
    %c0_i32 = arith.constant 0 : i32
    %c0_i32_0 = arith.constant 0 : i32
    %c0_i32_1 = arith.constant 0 : i32
    return %c0_i32, %c0_i32_0 : i32, i32
  }
  func.func @transform_6(%arg0: i32) -> (i32, i32) {
    %c0_i32 = arith.constant 0 : i32
    %c0_i32_0 = arith.constant 0 : i32
    %c0_i32_1 = arith.constant 0 : i32
    return %c0_i32, %c0_i32_0 : i32, i32
  }
  func.func @transform_7(%arg0: i32) -> (i32, i32) {
    %c0_i32 = arith.constant 0 : i32
    %c0_i32_0 = arith.constant 0 : i32
    %c0_i32_1 = arith.constant 0 : i32
    return %c0_i32, %c0_i32_0 : i32, i32
  }
  func.func @transform_8(%arg0: i32) -> (i32, i32) {
    %c0_i32 = arith.constant 0 : i32
    %c0_i32_0 = arith.constant 0 : i32
    %c0_i32_1 = arith.constant 0 : i32
    return %c0_i32, %c0_i32_0 : i32, i32
  }
  func.func @transform_9(%arg0: i32) -> (i32, i32) {
    %c0_i32 = arith.constant 0 : i32
    %c0_i32_0 = arith.constant 0 : i32
    %c0_i32_1 = arith.constant 0 : i32
    return %c0_i32, %c0_i32_0 : i32, i32
  }
  func.func @transform_10(%arg0: i32) -> (i32, i32) {
    %c0_i32 = arith.constant 0 : i32
    %c0_i32_0 = arith.constant 0 : i32
    %c0_i32_1 = arith.constant 0 : i32
    return %c0_i32, %c0_i32_0 : i32, i32
  }
  func.func @transform_11(%arg0: i32) -> (i32, i32) {
    %c0_i32 = arith.constant 0 : i32
    %c0_i32_0 = arith.constant 0 : i32
    %c0_i32_1 = arith.constant 0 : i32
    return %c0_i32, %c0_i32_0 : i32, i32
  }
  func.func @transform_12(%arg0: i32) -> (i32, i32) {
    %c0_i32 = arith.constant 0 : i32
    %c0_i32_0 = arith.constant 0 : i32
    %c0_i32_1 = arith.constant 0 : i32
    return %c0_i32, %c0_i32_0 : i32, i32
  }
  func.func @transform_13(%arg0: i32) -> (i32, i32) {
    %c0_i32 = arith.constant 0 : i32
    %c0_i32_0 = arith.constant 0 : i32
    %c0_i32_1 = arith.constant 0 : i32
    return %c0_i32, %c0_i32_0 : i32, i32
  }
}

</mosaic_0001>

<bundles_post_ra>
// kernel: tpu_custom_call.1
= control target key start
LH: loop header
LB: loop body
LE: loop exit
PB: predicated region body
PF: predicated region fallthrough
CT: control target
= control target key end

     0   :  { %s7757_s0 = inlined_call_operand.vmem [shape: f32[8,4,1], index: 0, kind: input, shape index: {}]   ;;  %s7758_s1 = inlined_call_operand.vmem [shape: f32[8,4,64], index: 1, kind: input, shape index: {}]   ;;  %s7759_s2 = inlined_call_operand.vmem [shape: f32[64,256], index: 2, kind: input, shape index: {}]   ;;  %s7760_s3 = inlined_call_operand.vmem [shape: f32[64,256], index: 3, kind: input, shape index: {}]   ;;  %s7761_s4 = inlined_call_operand.vmem [shape: f32[1,256], index: 4, kind: input, shape index: {}]   ;;  %s7762_s5 = inlined_call_operand.vmem [shape: f32[64,41], index: 5, kind: input, shape index: {}]   ;;  %s7763_s6 = inlined_call_operand.hbm [shape: f32[1,41], index: 6, kind: input, shape index: {}]   ;;  %s7764_s7 = inlined_call_operand.vmem [shape: f32[100,4], index: 7, kind: input, shape index: {}]   ;;  %s7765_s8 = inlined_call_operand.vmem [shape: f32[64,32], index: 8, kind: input, shape index: {}]   ;;  %s7766_s9 = inlined_call_operand.vmem [shape: f32[4,32], index: 9, kind: input, shape index: {}]   ;;  %s7767_s10 = inlined_call_operand.vmem [shape: f32[1,32], index: 10, kind: input, shape index: {}]   ;;  %s7768_s11 = inlined_call_operand.vmem [shape: f32[1,32], index: 11, kind: input, shape index: {}]   ;;  %s7769_s12 = inlined_call_operand.<no memory space> [shape: f32[1,1], index: 12, kind: input, shape index: {}]   ;;  %s7770_s13 = inlined_call_operand.hbm [shape: f32[4,128], index: 13, kind: output, shape index: {}]  }
   0x1   :  { %v18_v0 = vstv %s7769_s12 }
   0x2   :  { %19 = vst [vmem:[#allocation2] sm:$0x1] %v18_v0 }
   0x3   :  { %20 = vsyncpa [#allocation4], 0 }
   0x4   :  { %21 = vsyncpa [#allocation5], 0  ;;  %s5648_s27 = smov [#allocation3]   ;;  %s5600_s14 = scalar_lea.hbm %s7763_s6, 16 }
   0x5   :  { %s40_s28 = sshll.u32 %s5648_s27, 4  ;;  %p5601_p0 = scmp.ne.s32.totalorder %s7763_s6, %s5600_s14  ;;  %s41_s28 = int_to_ptr.vmem [resolvable:$true] %s40_s28 }
   0x6   :  { %p5604_p1 = scmp.lt.u32.totalorder %s5600_s14, %s7763_s6 }
   0x8   :  { %p5606_p2 = pnand %p5604_p1, %p5601_p0 }
   0xa   :  { %5609 = shalt.err (!%p5606_p2)
}
   0xb   :  { %s5610_s12 = scalar_lea.vmem %s41_s28, 16  ;;  %s5614_s19 = scalar_lea.vmem %s41_s28, 32 }
   0xc   :  { %p5611_p3 = scmp.ne.s32.totalorder %s41_s28, %s5610_s12  ;;  %p5615_p4 = scmp.lt.s32.totalorder %s41_s28, %s41_s28 }
   0xd   :  { %p5616_p5 = scmp.lt.s32.totalorder %s5614_s19, %s5610_s12 }
   0xf   :  { %p5617_p6 = por %p5616_p5, %p5615_p4 }
  0x11   :  { %p5618_p7 = pnand %p5617_p6, %p5611_p3 }
  0x13   :  { %5621 = shalt.err (!%p5618_p7)
}
  0x14   :  { %43 = dma.hbm_to_vmem [thread:$0]  %s7763_s6, 16, %s41_s28, [#allocation4]  }
  0x15   :  { %5644 = dma.done.wait [#allocation4], 16  }
  0x16   :  { %5645 = vsyncadd [#allocation4], 4294967280  ;;  %v5649_v1 = vmov 0.0   ;;  %v76_v2 = vld [vmem:[%s7760_s3 + $0x8] sm:$0xff]  ;;  %v78_v3 = vld [vmem:[%s7760_s3 + $0x18] sm:$0xff]  ;;  %vm93_vm0 = vcmask 523264   ;;  %v7771_v51 = vlaneseq }
  0x17   :  { %161 = vmatprep.mubr.f32.mxu0 %v5649_v1  ;;  %362 = vmatprep.mubr.f32.mxu1 %v5649_v1  ;;  %v75_v4 = vld [vmem:[%s7760_s3] sm:$0xff]  ;;  %v5756_v5 = vpack.c.bf16 %v78_v3, %v76_v2  ;;  %v77_v6 = vld [vmem:[%s7760_s3 + $0x10] sm:$0xff]  ;;  %v80_v7 = vld [vmem:[%s7760_s3 + $0x28] sm:$0xff]  ;;  %s5650_s29 = smov 64   ;;  %vm5653_vm1 = vmmov 0   ;;  %vm1929_vm2 = vcmask 1043456  }
  0x18   :  { %v82_v8 = vld [vmem:[%s7760_s3 + $0x38] sm:$0xff]  ;;  %v5767_v9 = vpack.c.bf16 %v77_v6, %v75_v4  ;;  %v79_v11 = vld [vmem:[%s7760_s3 + $0x20] sm:$0xff]  ;;  %v81_v12 = vld [vmem:[%s7760_s3 + $0x30] sm:$0xff]  ;;  %v5917_v52 = vshrl.u32 %v7771_v51, 7  ;;  %vm1889_vm3 = vcmask 31744   ;;  %vm4353_vm4 = vcmask 253952  }
  0x19   :  { %v5769_v10 = vpack.c.bf16 %v82_v8, %v80_v7  ;;  %v84_v13 = vld [vmem:[%s7760_s3 + $0x48] sm:$0xff]  ;;  %5139 = vmatprep.subr.bf16.mxu0 %v5756_v5  ;;  %v86_v14 = vld [vmem:[%s7760_s3 + $0x58] sm:$0xff]  ;;  %5171 = vmatprep.subr.bf16.mxu1 %v5756_v5  ;;  %v5786_v15 = vpack.c.bf16 %v81_v12, %v79_v11  ;;  %v83_v17 = vld [vmem:[%s7760_s3 + $0x40] sm:$0xff]  ;;  %vm4343_vm5 = vcmask 261120   ;;  %vm1718_vm6 = vcmask 19456   ;;  %s5658_s27 = smov 95  }
  0x1a   :  { %5141 = vmatpush1.bf16.msra.mxu0 %v5767_v9  ;;  %5173 = vmatpush1.bf16.msra.mxu1 %v5767_v9  ;;  %v5790_v16 = vpack.c.bf16 %v86_v14, %v84_v13  ;;  %v85_v18 = vld [vmem:[%s7760_s3 + $0x50] sm:$0xff]  ;;  %v88_v19 = vld [vmem:[%s7760_s3 + $0x68] sm:$0xff]  ;;  %v90_v20 = vld [vmem:[%s7760_s3 + $0x78] sm:$0xff]  ;;  %7829 = vst [vmem:[#allocation9_spill] sm:$0xff] %v5917_v52  ;;  %v5920_v53 = vsub.s32 1, %v5917_v52  ;;  %v5931_v60 = vsub.s32 0, %v5917_v52 }
  0x1b   :  { %5143 = vmatprep.subr.bf16.mxu0 %v5769_v10  ;;  %5175 = vmatprep.subr.bf16.mxu1 %v5769_v10  ;;  %v5806_v21 = vpack.c.bf16 %v85_v18, %v83_v17  ;;  %v5810_v22 = vpack.c.bf16 %v90_v20, %v88_v19  ;;  %v87_v23 = vld [vmem:[%s7760_s3 + $0x60] sm:$0xff]  ;;  %v89_v24 = vld [vmem:[%s7760_s3 + $0x70] sm:$0xff]  ;;  %v60_v25 = vld [vmem:[%s7759_s2 + $0x8] sm:$0xff]  ;;  %vm1730_vm7 = vcmask 44056   ;;  %vm4446_vm8 = vcmask 130112  }
  0x1c   :  { %v62_v26 = vld [vmem:[%s7759_s2 + $0x18] sm:$0xff]  ;;  %v5826_v27 = vpack.c.bf16 %v89_v24, %v87_v23  ;;  %v59_v29 = vld [vmem:[%s7759_s2] sm:$0xff]  ;;  %v61_v30 = vld [vmem:[%s7759_s2 + $0x10] sm:$0xff]  ;;  %7830 = vst [vmem:[#allocation10_spill] sm:$0xff] %v5920_v53  ;;  %vm4453_vm9 = vcmask 195712   ;;  %vm4460_vm10 = vcmask 261312  }
  0x1d   :  { %v5830_v28 = vpack.c.bf16 %v62_v26, %v60_v25  ;;  %v64_v31 = vld [vmem:[%s7759_s2 + $0x28] sm:$0xff]  ;;  %v66_v32 = vld [vmem:[%s7759_s2 + $0x38] sm:$0xff]  ;;  %v5846_v33 = vpack.c.bf16 %v61_v30, %v59_v29  ;;  %v63_v35 = vld [vmem:[%s7759_s2 + $0x20] sm:$0xff]  ;;  %7831 = vst [vmem:[#allocation11_spill] sm:$0xff] %v5931_v60  ;;  %vm4519_vm11 = vcmask 1041409   ;;  %vm4521_vm12 = vcmask 1042434  }
  0x1e   :  { %5145 = vmatpush1.bf16.msra.mxu0 %v5786_v15  ;;  %5177 = vmatpush1.bf16.msra.mxu1 %v5786_v15  ;;  %v5850_v34 = vpack.c.bf16 %v66_v32, %v64_v31  ;;  %v65_v36 = vld [vmem:[%s7759_s2 + $0x30] sm:$0xff]  ;;  %v68_v37 = vld [vmem:[%s7759_s2 + $0x48] sm:$0xff]  ;;  %v70_v38 = vld [vmem:[%s7759_s2 + $0x58] sm:$0xff]  ;;  %vm4523_vm13 = vcmask 1043459   ;;  %vm1774_vm14 = vcmask 199680   ;;  %vm1746_vm15 = vcmask 60464  }
  0x1f   :  { %5147 = vmatprep.subr.bf16.mxu0 %v5790_v16  ;;  %5179 = vmatprep.subr.bf16.mxu1 %v5790_v16  ;;  %v5867_v39 = vpack.c.bf16 %v65_v36, %v63_v35  ;;  %v5871_v40 = vpack.c.bf16 %v70_v38, %v68_v37  ;;  %v67_v41 = vld [vmem:[%s7759_s2 + $0x40] sm:$0xff]  ;;  %v69_v42 = vld [vmem:[%s7759_s2 + $0x50] sm:$0xff]  ;;  %v72_v43 = vld [vmem:[%s7759_s2 + $0x68] sm:$0xff] }
  0x20   :  { %v74_v44 = vld [vmem:[%s7759_s2 + $0x78] sm:$0xff]  ;;  %v5886_v45 = vpack.c.bf16 %v69_v42, %v67_v41  ;;  %v71_v47 = vld [vmem:[%s7759_s2 + $0x60] sm:$0xff]  ;;  %v73_v48 = vld [vmem:[%s7759_s2 + $0x70] sm:$0xff] }
  0x21   :  { %v5889_v46 = vpack.c.bf16 %v74_v44, %v72_v43  ;;  %v5898_v49 = vpack.c.bf16 %v73_v48, %v71_v47  ;;  %v92_v50 = vld [vmem:[%s7758_s1] sm:$0xf]  ;;  %v4965_v23 = vld [vmem:[%s7758_s1 + $0x4] sm:$0xf] }
  0x22   :  { %5149 = vmatpush1.bf16.msra.mxu0 %v5806_v21  ;;  %5181 = vmatpush1.bf16.msra.mxu1 %v5806_v21  ;;  %v91_v54 = vld [vmem:[%s7761_s4] sm:$0x3] }
  0x23   :  { %5151 = vmatprep.subr.bf16.mxu0 %v5810_v22  ;;  %5183 = vmatprep.subr.bf16.mxu1 %v5810_v22  ;;  %v5926_v55 = vrot.slane %v91_v54, %v5920_v53  ;;  %v5934_v61 = vrot.slane %v91_v54, %v5931_v60 }
  0x26   :  { %5153 = vmatpush1.bf16.msra.mxu0 %v5826_v27  ;;  %5185 = vmatpush1.bf16.msra.mxu1 %v5826_v27 }
  0x27   :  { %5155 = vmatprep.subr.bf16.mxu0 %v5830_v28  ;;  %5187 = vmatprep.subr.bf16.mxu1 %v5830_v28 }
  0x29   :  { %162 = vmatmul.mubr.f32.vlgmr.msra.gmra.mrb[0].mxu0 %v5649_v1 }
  0x2a   :  { %5157 = vmatpush1.bf16.msra.mxu0 %v5846_v33  ;;  %235 = vmatprep.mubr.f32.mxu0 %v5649_v1 }
  0x2b   :  { %5159 = vmatprep.subr.bf16.mxu0 %v5850_v34 }
  0x2e   :  { %5161 = vmatpush1.bf16.msra.mxu0 %v5867_v39 }
  0x2f   :  { %5163 = vmatprep.subr.bf16.mxu0 %v5871_v40 }
  0x32   :  { %5165 = vmatpush1.bf16.msra.mxu0 %v5886_v45 }
  0x33   :  { %5167 = vmatprep.subr.bf16.mxu0 %v5889_v46 }
  0x36   :  { %5169 = vmatpush1.bf16.msra.mxu0 %v5898_v49 }
  0x37   :  { %5203 = vmatprep.subr.bf16.mxu0 %v5756_v5 }
  0x39   :  { %4962 = vmatmul.mubr.msk.f32.vlgmr.msra.gmra.mrb[0].mxu0 %vm93_vm0, %v92_v50 }
  0x3a   :  { %5205 = vmatpush1.bf16.msra.mxu0 %v5767_v9  ;;  %553 = vmatprep.mubr.f32.mxu0 %v5649_v1 }
  0x3b   :  { %5207 = vmatprep.subr.bf16.mxu0 %v5769_v10 }
  0x3e   :  { %5209 = vmatpush1.bf16.msra.mxu0 %v5786_v15 }
  0x3f   :  { %5211 = vmatprep.subr.bf16.mxu0 %v5790_v16 }
  0x42   :  { %5213 = vmatpush1.bf16.msra.mxu0 %v5806_v21 }
  0x43   :  { %5215 = vmatprep.subr.bf16.mxu0 %v5810_v22 }
  0x46   :  { %5217 = vmatpush1.bf16.msra.mxu0 %v5826_v27 }
  0x47   :  { %5219 = vmatprep.subr.bf16.mxu0 %v5830_v28 }
 0x10c   :  { %v237_v56 = vpop.f32.mrb[0].mxu0 }
 0x10d   :  { %v239_v57 = vpop.f32.mrb[1].mxu0  ;;  %v253_v62 = vadd.f32 %v5934_v61, %v237_v56 }
 0x10e   :  { %v254_v58 = vadd.f32 %v5926_v55, %v239_v57 }
 0x10f   :  { %v4963_v63 = vmul.f32 -1.442695, %v253_v62 }
 0x110   :  { %5450 = vtanh.f32 %v254_v58  ;;  %v4964_v13 = vmul.f32 -1.442695, %v254_v58  ;;  %v4971_v58 = vld [vmem:[%s7758_s1 + $0x8] sm:$0xf] }
 0x111   :  { %5452 = vpow2.f32 %v4963_v63 }
 0x11a   :  { %v5451_v59 = vpop.eup %5450 }
 0x11b   :  { %270 = vrot.lane.b32.xlu0 %v5451_v59, %s5650_s29  ;;  %v5453_v0 = vpop.eup %5452 }
 0x11c   :  { %v261_v2 = vadd.f32 1.0, %v5453_v0 }
 0x11e   :  { %5454 = vrcp.f32 %v261_v2 }
 0x128   :  { %v5455_v3 = vpop.eup %5454 }
 0x129   :  { %v268_v7 = vmul.f32 0.0, %v5455_v3 }
 0x18d   :  { %v271_v4 = vpop.permute.xlu0 %270 }
 0x18e   :  { %v273_v6 = vmul.f32 %v5455_v3, %v271_v4 }
 0x190   :  { %275 = vrot.lane.b32.xlu0 %v273_v6, %s5650_s29 }
 0x202   :  { %v276_v8 = vpop.permute.xlu0 %275 }
 0x203   :  { %v278_v11 = vadd.f32 %v276_v8, %v268_v7 }
 0x205   :  { %5456 = vtanh.f32 %v278_v11 }
 0x206   :  { %5458 = vpow2.f32 %v4964_v13 }
 0x20f   :  { %v5457_v12 = vpop.eup %5456 }
 0x210   :  { %281 = vrot.lane.b32.xlu1 %v5457_v12, %s5650_s29  ;;  %v5459_v14 = vpop.eup %5458 }
 0x211   :  { %v262_v17 = vadd.f32 1.0, %v5459_v14 }
 0x213   :  { %5460 = vrcp.f32 %v262_v17 }
 0x21d   :  { %v5461_v18 = vpop.eup %5460 }
 0x282   :  { %v282_v19 = vpop.permute.xlu1 %281 }
 0x283   :  { %v5939_v20 = vmul.f32 %v5461_v18, %v282_v19 }
 0x285   :  { %4966 = vmatmul.mubr.msk.f32.vlgmr.msra.gmra.mrb[0].mxu1 %vm93_vm0, %v5939_v20 }
 0x286   :  { %5189 = vmatpush1.bf16.msra.mxu1 %v5846_v33  ;;  %436 = vmatprep.mubr.f32.mxu1 %v5649_v1 }
 0x287   :  { %5191 = vmatprep.subr.bf16.mxu1 %v5850_v34 }
 0x28a   :  { %5193 = vmatpush1.bf16.msra.mxu1 %v5867_v39 }
 0x28b   :  { %5195 = vmatprep.subr.bf16.mxu1 %v5871_v40 }
 0x28e   :  { %5197 = vmatpush1.bf16.msra.mxu1 %v5886_v45 }
 0x28f   :  { %5199 = vmatprep.subr.bf16.mxu1 %v5889_v46 }
 0x292   :  { %5201 = vmatpush1.bf16.msra.mxu1 %v5898_v49 }
 0x293   :  { %5235 = vmatprep.subr.bf16.mxu1 %v5756_v5 }
 0x295   :  { %4967 = vmatmul.mubr.msk.f32.vlgmr.msra.gmra.mrb[0].mxu1 %vm93_vm0, %v4965_v23 }
 0x296   :  { %5237 = vmatpush1.bf16.msra.mxu1 %v5767_v9  ;;  %744 = vmatprep.mubr.f32.mxu1 %v5649_v1 }
 0x297   :  { %5239 = vmatprep.subr.bf16.mxu1 %v5769_v10 }
 0x29a   :  { %5241 = vmatpush1.bf16.msra.mxu1 %v5786_v15 }
 0x29b   :  { %5243 = vmatprep.subr.bf16.mxu1 %v5790_v16 }
 0x29e   :  { %5245 = vmatpush1.bf16.msra.mxu1 %v5806_v21 }
 0x29f   :  { %5247 = vmatprep.subr.bf16.mxu1 %v5810_v22 }
 0x2a2   :  { %5249 = vmatpush1.bf16.msra.mxu1 %v5826_v27 }
 0x2a3   :  { %5251 = vmatprep.subr.bf16.mxu1 %v5830_v28 }
 0x368   :  { %v438_v24 = vpop.f32.mrb[0].mxu1 }
 0x369   :  { %v440_v25 = vpop.f32.mrb[1].mxu1  ;;  %v443_v30 = vadd.f32 %v438_v24, %v5934_v61 }
 0x36a   :  { %v444_v26 = vadd.f32 %v440_v25, %v5926_v55 }
 0x36b   :  { %v4968_v31 = vmul.f32 -1.442695, %v443_v30 }
 0x36c   :  { %5462 = vtanh.f32 %v444_v26  ;;  %v4969_v47 = vmul.f32 -1.442695, %v444_v26 }
 0x36d   :  { %5464 = vpow2.f32 %v4968_v31 }
 0x376   :  { %v5463_v29 = vpop.eup %5462 }
 0x377   :  { %460 = vrot.lane.b32.xlu1 %v5463_v29, %s5650_s29  ;;  %v5465_v32 = vpop.eup %5464  ;;  %v4977_v29 = vld [vmem:[%s7758_s1 + $0xc] sm:$0xf] }
 0x378   :  { %v451_v35 = vadd.f32 1.0, %v5465_v32 }
 0x37a   :  { %5466 = vrcp.f32 %v451_v35 }
 0x384   :  { %v5467_v36 = vpop.eup %5466 }
 0x385   :  { %v458_v41 = vmul.f32 %v5467_v36, %v278_v11 }
 0x3e9   :  { %v461_v37 = vpop.permute.xlu1 %460 }
 0x3ea   :  { %v463_v38 = vmul.f32 %v5467_v36, %v461_v37 }
 0x3ec   :  { %465 = vrot.lane.b32.xlu0 %v463_v38, %s5650_s29 }
 0x45e   :  { %v466_v42 = vpop.permute.xlu0 %465 }
 0x45f   :  { %v468_v43 = vadd.f32 %v466_v42, %v458_v41 }
 0x461   :  { %5468 = vtanh.f32 %v468_v43 }
 0x462   :  { %5470 = vpow2.f32 %v4969_v47 }
 0x46b   :  { %v5469_v44 = vpop.eup %5468 }
 0x46c   :  { %471 = vrot.lane.b32.xlu1 %v5469_v44, %s5650_s29  ;;  %v5471_v48 = vpop.eup %5470 }
 0x46d   :  { %v452_v50 = vadd.f32 1.0, %v5471_v48 }
 0x46f   :  { %5472 = vrcp.f32 %v452_v50 }
 0x479   :  { %v5473_v54 = vpop.eup %5472 }
 0x4de   :  { %v472_v56 = vpop.permute.xlu1 %471 }
 0x4df   :  { %v5970_v57 = vmul.f32 %v5473_v54, %v472_v56 }
 0x4e1   :  { %4972 = vmatmul.mubr.msk.f32.vlgmr.msra.gmra.mrb[2].mxu0 %vm93_vm0, %v5970_v57 }
 0x4e2   :  { %5221 = vmatpush1.bf16.msra.mxu0 %v5846_v33  ;;  %627 = vmatprep.mubr.f32.mxu0 %v5649_v1 }
 0x4e3   :  { %5223 = vmatprep.subr.bf16.mxu0 %v5850_v34 }
 0x4e6   :  { %5225 = vmatpush1.bf16.msra.mxu0 %v5867_v39 }
 0x4e7   :  { %5227 = vmatprep.subr.bf16.mxu0 %v5871_v40 }
 0x4ea   :  { %5229 = vmatpush1.bf16.msra.mxu0 %v5886_v45 }
 0x4eb   :  { %5231 = vmatprep.subr.bf16.mxu0 %v5889_v46 }
 0x4ee   :  { %5233 = vmatpush1.bf16.msra.mxu0 %v5898_v49 }
 0x4ef   :  { %5267 = vmatprep.subr.bf16.mxu0 %v5756_v5 }
 0x4f1   :  { %4973 = vmatmul.mubr.msk.f32.vlgmr.msra.gmra.mrb[2].mxu0 %vm93_vm0, %v4971_v58 }
 0x4f2   :  { %5269 = vmatpush1.bf16.msra.mxu0 %v5767_v9  ;;  %935 = vmatprep.mubr.f32.mxu0 %v5649_v1 }
 0x4f3   :  { %5271 = vmatprep.subr.bf16.mxu0 %v5769_v10 }
 0x4f6   :  { %5273 = vmatpush1.bf16.msra.mxu0 %v5786_v15 }
 0x4f7   :  { %5275 = vmatprep.subr.bf16.mxu0 %v5790_v16 }
 0x4fa   :  { %5277 = vmatpush1.bf16.msra.mxu0 %v5806_v21 }
 0x4fb   :  { %5279 = vmatprep.subr.bf16.mxu0 %v5810_v22 }
 0x4fe   :  { %5281 = vmatpush1.bf16.msra.mxu0 %v5826_v27 }
 0x4ff   :  { %5283 = vmatprep.subr.bf16.mxu0 %v5830_v28 }
 0x5c4   :  { %v629_v59 = vpop.f32.mrb[2].mxu0 }
 0x5c5   :  { %v631_v62 = vpop.f32.mrb[3].mxu0  ;;  %v634_v2 = vadd.f32 %v629_v59, %v5934_v61 }
 0x5c6   :  { %v635_v63 = vadd.f32 %v631_v62, %v5926_v55 }
 0x5c7   :  { %v4974_v3 = vmul.f32 -1.442695, %v634_v2  ;;  %v4983_v2 = vld [vmem:[%s7758_s1 + $0x10] sm:$0xf] }
 0x5c8   :  { %5474 = vtanh.f32 %v635_v63  ;;  %v4975_v18 = vmul.f32 -1.442695, %v635_v63 }
 0x5c9   :  { %5476 = vpow2.f32 %v4974_v3 }
 0x5d2   :  { %v5475_v0 = vpop.eup %5474 }
 0x5d3   :  { %651 = vrot.lane.b32.xlu0 %v5475_v0, %s5650_s29  ;;  %v5477_v4 = vpop.eup %5476 }
 0x5d4   :  { %v642_v6 = vadd.f32 1.0, %v5477_v4 }
 0x5d6   :  { %5478 = vrcp.f32 %v642_v6 }
 0x5e0   :  { %v5479_v7 = vpop.eup %5478 }
 0x5e1   :  { %v649_v12 = vmul.f32 %v5479_v7, %v468_v43 }
 0x645   :  { %v652_v8 = vpop.permute.xlu0 %651 }
 0x646   :  { %v654_v11 = vmul.f32 %v5479_v7, %v652_v8 }
 0x648   :  { %656 = vrot.lane.b32.xlu1 %v654_v11, %s5650_s29 }
 0x6ba   :  { %v657_v13 = vpop.permute.xlu1 %656 }
 0x6bb   :  { %v659_v14 = vadd.f32 %v657_v13, %v649_v12 }
 0x6bd   :  { %5480 = vtanh.f32 %v659_v14 }
 0x6be   :  { %5482 = vpow2.f32 %v4975_v18 }
 0x6c7   :  { %v5481_v17 = vpop.eup %5480 }
 0x6c8   :  { %662 = vrot.lane.b32.xlu0 %v5481_v17, %s5650_s29  ;;  %v5483_v19 = vpop.eup %5482 }
 0x6c9   :  { %v643_v23 = vadd.f32 1.0, %v5483_v19 }
 0x6cb   :  { %5484 = vrcp.f32 %v643_v23 }
 0x6d5   :  { %v5485_v24 = vpop.eup %5484 }
 0x73a   :  { %v663_v25 = vpop.permute.xlu0 %662 }
 0x73b   :  { %v6001_v26 = vmul.f32 %v5485_v24, %v663_v25 }
 0x73d   :  { %4978 = vmatmul.mubr.msk.f32.vlgmr.msra.gmra.mrb[2].mxu1 %vm93_vm0, %v6001_v26 }
 0x73e   :  { %5253 = vmatpush1.bf16.msra.mxu1 %v5846_v33  ;;  %818 = vmatprep.mubr.f32.mxu1 %v5649_v1 }
 0x73f   :  { %5255 = vmatprep.subr.bf16.mxu1 %v5850_v34 }
 0x742   :  { %5257 = vmatpush1.bf16.msra.mxu1 %v5867_v39 }
 0x743   :  { %5259 = vmatprep.subr.bf16.mxu1 %v5871_v40 }
 0x746   :  { %5261 = vmatpush1.bf16.msra.mxu1 %v5886_v45 }
 0x747   :  { %5263 = vmatprep.subr.bf16.mxu1 %v5889_v46 }
 0x74a   :  { %5265 = vmatpush1.bf16.msra.mxu1 %v5898_v49 }
 0x74b   :  { %5299 = vmatprep.subr.bf16.mxu1 %v5756_v5 }
 0x74d   :  { %4979 = vmatmul.mubr.msk.f32.vlgmr.msra.gmra.mrb[2].mxu1 %vm93_vm0, %v4977_v29 }
 0x74e   :  { %5301 = vmatpush1.bf16.msra.mxu1 %v5767_v9  ;;  %1126 = vmatprep.mubr.f32.mxu1 %v5649_v1 }
 0x74f   :  { %5303 = vmatprep.subr.bf16.mxu1 %v5769_v10 }
 0x752   :  { %5305 = vmatpush1.bf16.msra.mxu1 %v5786_v15 }
 0x753   :  { %5307 = vmatprep.subr.bf16.mxu1 %v5790_v16 }
 0x756   :  { %5309 = vmatpush1.bf16.msra.mxu1 %v5806_v21 }
 0x757   :  { %5311 = vmatprep.subr.bf16.mxu1 %v5810_v22 }
 0x75a   :  { %5313 = vmatpush1.bf16.msra.mxu1 %v5826_v27 }
 0x75b   :  { %5315 = vmatprep.subr.bf16.mxu1 %v5830_v28 }
 0x820   :  { %v820_v30 = vpop.f32.mrb[2].mxu1 }
 0x821   :  { %v822_v31 = vpop.f32.mrb[3].mxu1  ;;  %v825_v36 = vadd.f32 %v820_v30, %v5934_v61 }
 0x822   :  { %v826_v32 = vadd.f32 %v822_v31, %v5926_v55 }
 0x823   :  { %v4980_v37 = vmul.f32 -1.442695, %v825_v36 }
 0x824   :  { %5486 = vtanh.f32 %v826_v32  ;;  %v4981_v56 = vmul.f32 -1.442695, %v826_v32 }
 0x825   :  { %5488 = vpow2.f32 %v4980_v37  ;;  %v4989_v37 = vld [vmem:[%s7758_s1 + $0x14] sm:$0xf] }
 0x82e   :  { %v5487_v35 = vpop.eup %5486 }
 0x82f   :  { %842 = vrot.lane.b32.xlu1 %v5487_v35, %s5650_s29  ;;  %v5489_v38 = vpop.eup %5488 }
 0x830   :  { %v833_v41 = vadd.f32 1.0, %v5489_v38 }
 0x832   :  { %5490 = vrcp.f32 %v833_v41 }
 0x83c   :  { %v5491_v42 = vpop.eup %5490 }
 0x83d   :  { %v840_v47 = vmul.f32 %v5491_v42, %v659_v14 }
 0x8a1   :  { %v843_v43 = vpop.permute.xlu1 %842 }
 0x8a2   :  { %v845_v44 = vmul.f32 %v5491_v42, %v843_v43 }
 0x8a4   :  { %847 = vrot.lane.b32.xlu0 %v845_v44, %s5650_s29 }
 0x916   :  { %v848_v48 = vpop.permute.xlu0 %847 }
 0x917   :  { %v850_v50 = vadd.f32 %v848_v48, %v840_v47 }
 0x919   :  { %5492 = vtanh.f32 %v850_v50 }
 0x91a   :  { %5494 = vpow2.f32 %v4981_v56 }
 0x923   :  { %v5493_v54 = vpop.eup %5492 }
 0x924   :  { %853 = vrot.lane.b32.xlu1 %v5493_v54, %s5650_s29  ;;  %v5495_v58 = vpop.eup %5494 }
 0x925   :  { %v834_v59 = vadd.f32 1.0, %v5495_v58 }
 0x927   :  { %5496 = vrcp.f32 %v834_v59 }
 0x931   :  { %v5497_v62 = vpop.eup %5496 }
 0x996   :  { %v854_v63 = vpop.permute.xlu1 %853 }
 0x997   :  { %v6032_v0 = vmul.f32 %v5497_v62, %v854_v63  ;;  %v4995_v62 = vld [vmem:[%s7758_s1 + $0x18] sm:$0xf] }
 0x999   :  { %4984 = vmatmul.mubr.msk.f32.vlgmr.msra.gmra.mrb[4].mxu0 %vm93_vm0, %v6032_v0 }
 0x99a   :  { %5285 = vmatpush1.bf16.msra.mxu0 %v5846_v33  ;;  %1009 = vmatprep.mubr.f32.mxu0 %v5649_v1 }
 0x99b   :  { %5287 = vmatprep.subr.bf16.mxu0 %v5850_v34 }
 0x99e   :  { %5289 = vmatpush1.bf16.msra.mxu0 %v5867_v39 }
 0x99f   :  { %5291 = vmatprep.subr.bf16.mxu0 %v5871_v40 }
 0x9a2   :  { %5293 = vmatpush1.bf16.msra.mxu0 %v5886_v45 }
 0x9a3   :  { %5295 = vmatprep.subr.bf16.mxu0 %v5889_v46 }
 0x9a6   :  { %5297 = vmatpush1.bf16.msra.mxu0 %v5898_v49 }
 0x9a7   :  { %5331 = vmatprep.subr.bf16.mxu0 %v5756_v5 }
 0x9a9   :  { %4985 = vmatmul.mubr.msk.f32.vlgmr.msra.gmra.mrb[4].mxu0 %vm93_vm0, %v4983_v2 }
 0x9aa   :  { %5333 = vmatpush1.bf16.msra.mxu0 %v5767_v9  ;;  %1317 = vmatprep.mubr.f32.mxu0 %v5649_v1 }
 0x9ab   :  { %5335 = vmatprep.subr.bf16.mxu0 %v5769_v10 }
 0x9ae   :  { %5337 = vmatpush1.bf16.msra.mxu0 %v5786_v15 }
 0x9af   :  { %5339 = vmatprep.subr.bf16.mxu0 %v5790_v16 }
 0x9b2   :  { %5341 = vmatpush1.bf16.msra.mxu0 %v5806_v21 }
 0x9b3   :  { %5343 = vmatprep.subr.bf16.mxu0 %v5810_v22 }
 0x9b6   :  { %5345 = vmatpush1.bf16.msra.mxu0 %v5826_v27 }
 0x9b7   :  { %5347 = vmatprep.subr.bf16.mxu0 %v5830_v28 }
 0xa7c   :  { %v1011_v3 = vpop.f32.mrb[4].mxu0 }
 0xa7d   :  { %v1013_v4 = vpop.f32.mrb[5].mxu0  ;;  %v1016_v8 = vadd.f32 %v1011_v3, %v5934_v61 }
 0xa7e   :  { %v1017_v6 = vadd.f32 %v1013_v4, %v5926_v55 }
 0xa7f   :  { %v4986_v11 = vmul.f32 -1.442695, %v1016_v8 }
 0xa80   :  { %5498 = vtanh.f32 %v1017_v6  ;;  %v4987_v29 = vmul.f32 -1.442695, %v1017_v6 }
 0xa81   :  { %5500 = vpow2.f32 %v4986_v11 }
 0xa8a   :  { %v5499_v7 = vpop.eup %5498 }
 0xa8b   :  { %1033 = vrot.lane.b32.xlu0 %v5499_v7, %s5650_s29  ;;  %v5501_v12 = vpop.eup %5500 }
 0xa8c   :  { %v1024_v13 = vadd.f32 1.0, %v5501_v12 }
 0xa8e   :  { %5502 = vrcp.f32 %v1024_v13 }
 0xa98   :  { %v5503_v14 = vpop.eup %5502 }
 0xa99   :  { %v1031_v19 = vmul.f32 %v5503_v14, %v850_v50 }
 0xafd   :  { %v1034_v17 = vpop.permute.xlu0 %1033 }
 0xafe   :  { %v1036_v18 = vmul.f32 %v5503_v14, %v1034_v17 }
 0xb00   :  { %1038 = vrot.lane.b32.xlu1 %v1036_v18, %s5650_s29 }
 0xb72   :  { %v1039_v23 = vpop.permute.xlu1 %1038 }
 0xb73   :  { %v1041_v24 = vadd.f32 %v1039_v23, %v1031_v19 }
 0xb75   :  { %5504 = vtanh.f32 %v1041_v24 }
 0xb76   :  { %5506 = vpow2.f32 %v4987_v29 }
 0xb7f   :  { %v5505_v25 = vpop.eup %5504 }
 0xb80   :  { %1044 = vrot.lane.b32.xlu0 %v5505_v25, %s5650_s29  ;;  %v5507_v30 = vpop.eup %5506 }
 0xb81   :  { %v1025_v31 = vadd.f32 1.0, %v5507_v30 }
 0xb83   :  { %5508 = vrcp.f32 %v1025_v31 }
 0xb8d   :  { %v5509_v32 = vpop.eup %5508 }
 0xbf2   :  { %v1045_v35 = vpop.permute.xlu0 %1044 }
 0xbf3   :  { %v6063_v36 = vmul.f32 %v5509_v32, %v1045_v35  ;;  %v5001_v35 = vld [vmem:[%s7758_s1 + $0x1c] sm:$0xf] }
 0xbf5   :  { %4990 = vmatmul.mubr.msk.f32.vlgmr.msra.gmra.mrb[4].mxu1 %vm93_vm0, %v6063_v36 }
 0xbf6   :  { %5317 = vmatpush1.bf16.msra.mxu1 %v5846_v33  ;;  %1200 = vmatprep.mubr.f32.mxu1 %v5649_v1 }
 0xbf7   :  { %5319 = vmatprep.subr.bf16.mxu1 %v5850_v34 }
 0xbfa   :  { %5321 = vmatpush1.bf16.msra.mxu1 %v5867_v39 }
 0xbfb   :  { %5323 = vmatprep.subr.bf16.mxu1 %v5871_v40 }
 0xbfe   :  { %5325 = vmatpush1.bf16.msra.mxu1 %v5886_v45 }
 0xbff   :  { %5327 = vmatprep.subr.bf16.mxu1 %v5889_v46 }
 0xc02   :  { %5329 = vmatpush1.bf16.msra.mxu1 %v5898_v49 }
 0xc03   :  { %5363 = vmatprep.subr.bf16.mxu1 %v5756_v5 }
 0xc05   :  { %4991 = vmatmul.mubr.msk.f32.vlgmr.msra.gmra.mrb[4].mxu1 %vm93_vm0, %v4989_v37 }
 0xc06   :  { %5365 = vmatpush1.bf16.msra.mxu1 %v5767_v9  ;;  %1508 = vmatprep.mubr.f32.mxu1 %v5649_v1 }
 0xc07   :  { %5367 = vmatprep.subr.bf16.mxu1 %v5769_v10 }
 0xc0a   :  { %5369 = vmatpush1.bf16.msra.mxu1 %v5786_v15 }
 0xc0b   :  { %5371 = vmatprep.subr.bf16.mxu1 %v5790_v16 }
 0xc0e   :  { %5373 = vmatpush1.bf16.msra.mxu1 %v5806_v21 }
 0xc0f   :  { %5375 = vmatprep.subr.bf16.mxu1 %v5810_v22 }
 0xc12   :  { %5377 = vmatpush1.bf16.msra.mxu1 %v5826_v27 }
 0xc13   :  { %5379 = vmatprep.subr.bf16.mxu1 %v5830_v28 }
 0xcd8   :  { %v1202_v5 = vpop.f32.mrb[4].mxu1 }
 0xcd9   :  { %v1204_v38 = vpop.f32.mrb[5].mxu1  ;;  %v1207_v10 = vadd.f32 %v1202_v5, %v5934_v61  ;;  %v5006_v5 = vld [vmem:[%s7757_s0 + $0x1c] sm:$0xf] }
 0xcda   :  { %v1208_v9 = vadd.f32 %v1204_v38, %v5926_v55 }
 0xcdb   :  { %v4992_v15 = vmul.f32 -1.442695, %v1207_v10 }
 0xcdc   :  { %5510 = vtanh.f32 %v1208_v9  ;;  %v4993_v48 = vmul.f32 -1.442695, %v1208_v9 }
 0xcdd   :  { %5512 = vpow2.f32 %v4992_v15 }
 0xce6   :  { %v5511_v41 = vpop.eup %5510 }
 0xce7   :  { %1224 = vrot.lane.b32.xlu1 %v5511_v41, %s5650_s29  ;;  %v5513_v16 = vpop.eup %5512 }
 0xce8   :  { %v1215_v21 = vadd.f32 1.0, %v5513_v16 }
 0xcea   :  { %5514 = vrcp.f32 %v1215_v21 }
 0xcf4   :  { %v5515_v22 = vpop.eup %5514 }
 0xcf5   :  { %v1222_v28 = vmul.f32 %v5515_v22, %v1041_v24 }
 0xd59   :  { %v1225_v42 = vpop.permute.xlu1 %1224 }
 0xd5a   :  { %v1227_v27 = vmul.f32 %v5515_v22, %v1225_v42  ;;  %v4970_v22 = vld [vmem:[%s7757_s0 + $0x4] sm:$0xf]  ;;  %v4988_v42 = vld [vmem:[%s7757_s0 + $0x10] sm:$0xf] }
 0xd5c   :  { %1229 = vrot.lane.b32.xlu0 %v1227_v27, %s5650_s29  ;;  %v1630_v27 = vld [vmem:[%s7762_s5] sm:$0xff] }
 0xdce   :  { %v1230_v43 = vpop.permute.xlu0 %1229 }
 0xdcf   :  { %v1232_v44 = vadd.f32 %v1230_v43, %v1222_v28  ;;  %v1631_v28 = vld [vmem:[%s7762_s5 + $0x8] sm:$0xff]  ;;  %v1810_v43 = vld [vmem:[%s7765_s8] sm:$0xff] }
 0xdd1   :  { %5516 = vtanh.f32 %v1232_v44 }
 0xdd2   :  { %5518 = vpow2.f32 %v4993_v48  ;;  %v1811_v48 = vld [vmem:[%s7765_s8 + $0x8] sm:$0xff] }
 0xddb   :  { %v5517_v47 = vpop.eup %5516 }
 0xddc   :  { %1235 = vrot.lane.b32.xlu1 %v5517_v47, %s5650_s29  ;;  %v5519_v50 = vpop.eup %5518  ;;  %v5395_v47 = vpack.c.bf16 %v1631_v28, %v1630_v27 }
 0xddd   :  { %v1216_v54 = vadd.f32 1.0, %v5519_v50  ;;  %v1632_v50 = vld [vmem:[%s7762_s5 + $0x10] sm:$0xff] }
 0xddf   :  { %5520 = vrcp.f32 %v1216_v54  ;;  %v1633_v54 = vld [vmem:[%s7762_s5 + $0x18] sm:$0xff] }
 0xde9   :  { %v5521_v56 = vpop.eup %5520 }
 0xe4e   :  { %v1236_v58 = vpop.permute.xlu1 %1235 }
 0xe4f   :  { %v6094_v59 = vmul.f32 %v5521_v56, %v1236_v58  ;;  %v5407_v56 = vpack.c.bf16 %v1811_v48, %v1810_v43  ;;  %v1812_v58 = vld [vmem:[%s7765_s8 + $0x10] sm:$0xff]  ;;  %v1888_v43 = vld [vmem:[%s7766_s9] sm:$0xf]  ;;  %v1806_v48 = vld [vmem:[%s7764_s7 + $0x48] sm:$0xff]  ;;  %s5659_s9 = smov [#allocation6]  }
 0xe50   :  { %s4953_s6 = sshll.u32 %s5659_s9, 4  ;;  %s4954_s6 = int_to_ptr.vmem [resolvable:$true] %s4953_s6 }
 0xe51   :  { %4996 = vmatmul.mubr.msk.f32.vlgmr.msra.gmra.mrb[6].mxu0 %vm93_vm0, %v6094_v59  ;;  %s5622_s2 = scalar_lea.vmem %s4954_s6, 64  ;;  %p5627_p9 = scmp.lt.s32.totalorder %s4954_s6, %s4954_s6 }
 0xe52   :  { %5349 = vmatpush1.bf16.msra.mxu0 %v5846_v33  ;;  %1391 = vmatprep.mubr.f32.mxu0 %v5649_v1  ;;  %p5623_p8 = scmp.ne.s32.totalorder %s4954_s6, %s5622_s2  ;;  %p5628_p10 = scmp.lt.s32.totalorder %s5622_s2, %s5622_s2 }
 0xe53   :  { %5351 = vmatprep.subr.bf16.mxu0 %v5850_v34 }
 0xe54   :  { %p5629_p11 = por %p5628_p10, %p5627_p9 }
 0xe56   :  { %5353 = vmatpush1.bf16.msra.mxu0 %v5867_v39  ;;  %p5630_p12 = pnand %p5629_p11, %p5623_p8 }
 0xe57   :  { %5355 = vmatprep.subr.bf16.mxu0 %v5871_v40 }
 0xe5a   :  { %5357 = vmatpush1.bf16.msra.mxu0 %v5886_v45 }
 0xe5b   :  { %5359 = vmatprep.subr.bf16.mxu0 %v5889_v46 }
 0xe5e   :  { %5361 = vmatpush1.bf16.msra.mxu0 %v5898_v49 }
 0xe61   :  { %4997 = vmatmul.mubr.msk.f32.vlgmr.msra.gmra.mrb[6].mxu0 %vm93_vm0, %v4995_v62  ;;  %v1813_v62 = vld [vmem:[%s7765_s8 + $0x18] sm:$0xff] }
 0xe62   :  { %5075 = vmatprep.mubr.msk.f32.mxu0 %vm5653_vm1, %v5649_v1 }
 0xf34   :  { %v1393_v63 = vpop.f32.mrb[6].mxu0 }
 0xf35   :  { %v1395_v2 = vpop.f32.mrb[7].mxu0  ;;  %v1398_v6 = vadd.f32 %v1393_v63, %v5934_v61  ;;  %v5398_v63 = vpack.c.bf16 %v1633_v54, %v1632_v50  ;;  %v1800_v50 = vld [vmem:[%s7764_s7 + $0x18] sm:$0xff]  ;;  %v1807_v54 = vld [vmem:[%s7764_s7 + $0x50] sm:$0xff] }
 0xf36   :  { %v1399_v3 = vadd.f32 %v1395_v2, %v5926_v55  ;;  %v5410_v2 = vpack.c.bf16 %v1813_v62, %v1812_v58  ;;  %v1808_v58 = vld [vmem:[%s7764_s7 + $0x58] sm:$0xff]  ;;  %v1802_v62 = vld [vmem:[%s7764_s7 + $0x28] sm:$0xff] }
 0xf37   :  { %v4998_v7 = vmul.f32 -1.442695, %v1398_v6  ;;  %v1814_v6 = vld [vmem:[%s7765_s8 + $0x20] sm:$0xff] }
 0xf38   :  { %5522 = vtanh.f32 %v1399_v3  ;;  %v4999_v24 = vmul.f32 -1.442695, %v1399_v3  ;;  %v1634_v3 = vld [vmem:[%s7762_s5 + $0x20] sm:$0xff] }
 0xf39   :  { %5524 = vpow2.f32 %v4998_v7  ;;  %v1815_v7 = vld [vmem:[%s7765_s8 + $0x28] sm:$0xff] }
 0xf42   :  { %v5523_v4 = vpop.eup %5522 }
 0xf43   :  { %1415 = vrot.lane.b32.xlu0 %v5523_v4, %s5650_s29  ;;  %v5525_v8 = vpop.eup %5524  ;;  %v1635_v4 = vld [vmem:[%s7762_s5 + $0x28] sm:$0xff] }
 0xf44   :  { %v1406_v11 = vadd.f32 1.0, %v5525_v8  ;;  %v5401_v8 = vpack.c.bf16 %v1635_v4, %v1634_v3  ;;  %v5654_v3 = vmov 1966171168  }
 0xf45   :  { %v2078_v4 = vunpack.c.l.s4 %v5654_v3 }
 0xf46   :  { %5526 = vrcp.f32 %v1406_v11  ;;  %v5413_v11 = vpack.c.bf16 %v1815_v7, %v1814_v6  ;;  %v5024_v6 = vld [vmem:[%s7767_s10] ss:$0 sm:$0xff]  ;;  %s5656_s10 = smov 122  }
 0xf47   :  { %v2079_v7 = vunpack.c.0.s8 %v2078_v4 }
 0xf50   :  { %v5527_v12 = vpop.eup %5526 }
 0xf51   :  { %v1413_v17 = vmul.f32 %v5527_v12, %v1232_v44  ;;  %v5652_v44 = vmov 0.0|0.0  }
 0xf52   :  { %5394 = vmatprep.subr.bf16.mxu0 %v5652_v44 }
 0xf53   :  { %5396 = vmatpush3.bf16.msra.mxu0 %v5395_v47  ;;  %v1799_v47 = vld [vmem:[%s7764_s7 + $0x10] sm:$0xff] }
 0xf54   :  { %5397 = vmatprep.subr.bf16.mxu0 %v5652_v44 }
 0xf57   :  { %5399 = vmatpush3.bf16.msra.mxu0 %v5398_v63  ;;  %v1809_v63 = vld [vmem:[%s7764_s7 + $0x60] sm:$0xf] }
 0xf58   :  { %5400 = vmatprep.subr.bf16.mxu0 %v5652_v44 }
 0xf5b   :  { %5402 = vmatpush3.bf16.msra.mxu0 %v5401_v8  ;;  %v5025_v8 = vld [vmem:[%s7768_s11] ss:$0 sm:$0xff]  ;;  %s5657_s11 = smov 120  }
 0xf5c   :  { %5403 = vmatprep.subr.bf16.mxu0 %v5652_v44 }
 0xfb5   :  { %v1416_v13 = vpop.permute.xlu0 %1415 }
 0xfb6   :  { %v1418_v14 = vmul.f32 %v5527_v12, %v1416_v13 }
 0xfb8   :  { %1420 = vrot.lane.b32.xlu1 %v1418_v14, %s5650_s29 }
0x102a   :  { %v1421_v18 = vpop.permute.xlu1 %1420 }
0x102b   :  { %v6114_v19 = vadd.f32 %v1421_v18, %v1413_v17  ;;  %v1636_v17 = vld [vmem:[%s7762_s5 + $0x30] sm:$0xff]  ;;  %v1637_v18 = vld [vmem:[%s7762_s5 + $0x38] sm:$0xff] }
0x102d   :  { %5528 = vtanh.f32 %v6114_v19 }
0x102e   :  { %5530 = vpow2.f32 %v4999_v24  ;;  %v5404_v24 = vpack.c.bf16 %v1637_v18, %v1636_v17 }
0x1030   :  { %5405 = vmatpush3.bf16.msra.mxu0 %v5404_v24 }
0x1031   :  { %5097 = vmatprep.subr.mxu0 %v5649_v1 }
0x1037   :  { %v5529_v23 = vpop.eup %5528 }
0x1038   :  { %1426 = vrot.lane.b32.xlu0 %v5529_v23, %s5650_s29  ;;  %v5531_v25 = vpop.eup %5530  ;;  %v1816_v23 = vld [vmem:[%s7765_s8 + $0x30] sm:$0xff] }
0x1039   :  { %v1407_v29 = vadd.f32 1.0, %v5531_v25  ;;  %v1817_v25 = vld [vmem:[%s7765_s8 + $0x38] sm:$0xff] }
0x103b   :  { %5532 = vrcp.f32 %v1407_v29 }
0x1045   :  { %v5533_v30 = vpop.eup %5532 }
0x10aa   :  { %v1427_v31 = vpop.permute.xlu0 %1426 }
0x10ab   :  { %v6118_v32 = vmul.f32 %v5533_v30, %v1427_v31 }
0x10ad   :  { %5002 = vmatmul.mubr.msk.f32.vlgmr.msra.gmra.mrb[6].mxu1 %vm93_vm0, %v6118_v32 }
0x10ae   :  { %5381 = vmatpush1.bf16.msra.mxu1 %v5846_v33  ;;  %1582 = vmatprep.mubr.f32.mxu1 %v5649_v1  ;;  %v5651_v33 = vmov 0  }
0x10af   :  { %5383 = vmatprep.subr.bf16.mxu1 %v5850_v34  ;;  %5448 = vset.pattern.permute.xlu1 %v5651_v33 }
0x10b0   :  { %5449 = vset.pattern.permute.xlu0 %v5651_v33 }
0x10b2   :  { %5385 = vmatpush1.bf16.msra.mxu1 %v5867_v39 }
0x10b3   :  { %5387 = vmatprep.subr.bf16.mxu1 %v5871_v40 }
0x10b6   :  { %5389 = vmatpush1.bf16.msra.mxu1 %v5886_v45  ;;  %v285_v45 = vld [vmem:[%s7757_s0] sm:$0xf] }
0x10b7   :  { %5391 = vmatprep.subr.bf16.mxu1 %v5889_v46  ;;  %v4976_v46 = vld [vmem:[%s7757_s0 + $0x8] sm:$0xf] }
0x10ba   :  { %5393 = vmatpush1.bf16.msra.mxu1 %v5898_v49  ;;  %v4982_v49 = vld [vmem:[%s7757_s0 + $0xc] sm:$0xf] }
0x10bb   :  { %5406 = vmatprep.subr.bf16.mxu1 %v5652_v44 }
0x10bd   :  { %5003 = vmatmul.mubr.msk.f32.vlgmr.msra.gmra.mrb[6].mxu1 %vm93_vm0, %v5001_v35 }
0x10be   :  { %5408 = vmatpush3.bf16.msra.mxu1 %v5407_v56  ;;  %5094 = vmatprep.mubr.msk.f32.mxu1 %vm5653_vm1, %v5649_v1  ;;  %v1801_v56 = vld [vmem:[%s7764_s7 + $0x20] sm:$0xff] }
0x10bf   :  { %5409 = vmatprep.subr.bf16.mxu1 %v5652_v44 }
0x10c2   :  { %5411 = vmatpush3.bf16.msra.mxu1 %v5410_v2  ;;  %v1803_v2 = vld [vmem:[%s7764_s7 + $0x30] sm:$0xff] }
0x10c3   :  { %5412 = vmatprep.subr.bf16.mxu1 %v5652_v44 }
0x10c6   :  { %5414 = vmatpush3.bf16.msra.mxu1 %v5413_v11  ;;  %v3163_v11 = vcombine.high %v5024_v6, %v5024_v6 }
0x10c7   :  { %5415 = vmatprep.subr.bf16.mxu1 %v5652_v44  ;;  %v1805_v44 = vld [vmem:[%s7764_s7 + $0x40] sm:$0xff] }
0x1190   :  { %v1584_v34 = vpop.f32.mrb[6].mxu1 }
0x1191   :  { %v1586_v37 = vpop.f32.mrb[7].mxu1  ;;  %v1589_v38 = vadd.f32 %v1584_v34, %v5934_v61  ;;  %v5000_v61 = vld [vmem:[%s7757_s0 + $0x18] sm:$0xf] }
0x1192   :  { %v6135_v39 = vadd.f32 %v1586_v37, %v5926_v55  ;;  %v4994_v55 = vld [vmem:[%s7757_s0 + $0x14] sm:$0xf] }
0x1193   :  { %v5004_v9 = vmul.f32 -1.442695, %v1589_v38 }
0x1194   :  { %5534 = vtanh.f32 %v6135_v39  ;;  %v5005_v30 = vmul.f32 -1.442695, %v6135_v39 }
0x1195   :  { %5536 = vpow2.f32 %v5004_v9 }
0x119e   :  { %v5535_v40 = vpop.eup %5534 }
0x119f   :  { %1606 = vrot.lane.b32.xlu1 %v5535_v40, %s5650_s29  ;;  %v5537_v41 = vpop.eup %5536 }
0x11a0   :  { %v1597_v10 = vadd.f32 1.0, %v5537_v41 }
0x11a2   :  { %5538 = vrcp.f32 %v1597_v10 }
0x11a3   :  { %288 = vperm.xlu1 %5448, %v285_v45  }
0x11a7   :  { %670 = vperm.xlu1 %5448, %v4976_v46  }
0x11ab   :  { %861 = vperm.xlu1 %5448, %v4982_v49  }
0x11ac   :  { %v5539_v15 = vpop.eup %5538 }
0x11ad   :  { %v1604_v12 = vmul.f32 %v5539_v15, %v6114_v19  ;;  %v5416_v19 = vpack.c.bf16 %v1817_v25, %v1816_v23 }
0x11af   :  { %1243 = vperm.xlu1 %5448, %v4994_v55   ;;  %5417 = vmatpush3.bf16.msra.mxu1 %v5416_v19 }
0x11b0   :  { %5418 = vmatprep.subr.mxu1 %v5649_v1 }
0x11b3   :  { %1625 = vperm.xlu1 %5448, %v5006_v5  }
0x1211   :  { %v1607_v16 = vpop.permute.xlu1 %1606 }
0x1212   :  { %v1609_v21 = vmul.f32 %v5539_v15, %v1607_v16 }
0x1214   :  { %1611 = vrot.lane.b32.xlu0 %v1609_v21, %s5650_s29 }
0x1218   :  { %479 = vperm.xlu0 %5449, %v4970_v22  }
0x121c   :  { %1052 = vperm.xlu0 %5449, %v4988_v42  }
0x1220   :  { %1434 = vperm.xlu0 %5449, %v5000_v61  }
0x1222   :  { %v289_v31 = vpop.permute.xlu1 %288 }
0x1223   :  { %v291_v37 = vmul.f32 %v289_v31, %v5939_v20 }
0x1226   :  { %v671_v34 = vpop.permute.xlu1 %670 }
0x1227   :  { %v673_v46 = vmul.f32 %v671_v34, %v6001_v26 }
0x122a   :  { %v862_v55 = vpop.permute.xlu1 %861 }
0x122b   :  { %v864_v38 = vmul.f32 %v862_v55, %v6032_v0 }
0x122e   :  { %v1244_v10 = vpop.permute.xlu1 %1243 }
0x122f   :  { %v1246_v16 = vmul.f32 %v1244_v10, %v6094_v59  ;;  %v1804_v59 = vld [vmem:[%s7764_s7 + $0x38] sm:$0xff] }
0x1232   :  { %v1626_v61 = vpop.permute.xlu1 %1625 }
0x1286   :  { %v1612_v13 = vpop.permute.xlu0 %1611 }
0x1287   :  { %v1614_v14 = vadd.f32 %v1612_v13, %v1604_v12  ;;  %v3426_v12 = vcombine.high %v5025_v8, %v5025_v8 }
0x1289   :  { %5540 = vtanh.f32 %v1614_v14 }
0x128a   :  { %5542 = vpow2.f32 %v5005_v30 }
0x1293   :  { %v5541_v29 = vpop.eup %5540 }
0x1294   :  { %1617 = vrot.lane.b32.xlu0 %v5541_v29, %s5650_s29  ;;  %v5543_v40 = vpop.eup %5542 }
0x1295   :  { %v1598_v49 = vadd.f32 1.0, %v5543_v40 }
0x1297   :  { %v480_v35 = vpop.permute.xlu0 %479  ;;  %5544 = vrcp.f32 %v1598_v49 }
0x1298   :  { %v482_v33 = vmul.f32 %v480_v35, %v5970_v57 }
0x129a   :  { %v483_v45 = vadd.f32 %v482_v33, %v291_v37 }
0x129b   :  { %v1053_v9 = vpop.permute.xlu0 %1052 }
0x129c   :  { %v674_v5 = vadd.f32 %v673_v46, %v483_v45  ;;  %v1055_v41 = vmul.f32 %v1053_v9, %v6063_v36  ;;  %v1797_v36 = vld [vmem:[%s7764_s7] sm:$0xff] }
0x129e   :  { %v865_v39 = vadd.f32 %v864_v38, %v674_v5 }
0x129f   :  { %v1435_v57 = vpop.permute.xlu0 %1434 }
0x12a0   :  { %v1056_v15 = vadd.f32 %v1055_v41, %v865_v39  ;;  %v1437_v26 = vmul.f32 %v1435_v57, %v6118_v32  ;;  %v1798_v32 = vld [vmem:[%s7764_s7 + $0x8] sm:$0xff]  ;;  %s5655_s7 = smov 125  }
0x12a1   :  { %v5545_v21 = vpop.eup %5544 }
0x12a2   :  { %v1247_v20 = vadd.f32 %v1246_v16, %v1056_v15 }
0x12a4   :  { %v1438_v27 = vadd.f32 %v1437_v26, %v1247_v20 }
0x1306   :  { %v1618_v22 = vpop.permute.xlu0 %1617 }
0x1307   :  { %v1620_v42 = vmul.f32 %v5545_v21, %v1618_v22 }
0x1309   :  { %v1628_v28 = vmul.f32 %v1626_v61, %v1620_v42 }
0x130b   :  { %v1629_v0 = vadd.f32 %v1628_v28, %v1438_v27 }
0x130d   :  { %5076 = vmatmul.mubr.msk.f32.vlgmr.msra.gmra.mrb[8].mxu0 %vm93_vm0, %v1629_v0  ;;  %5095 = vmatmul.mubr.msk.f32.vlgmr.msra.gmra.mrb[8].mxu1 %vm93_vm0, %v1629_v0  ;;  %vm1763_vm0 = vcmask 265280  }
0x130e   :  { %5098 = vmatpush3.msk.msra.mxu0 %vm1929_vm2, %v1888_v43  ;;  %5419 = vmatpush3.msk.msra.mxu1 %vm1929_vm2, %v1888_v43  ;;  %vm1757_vm2 = vcmask 11264  }
0x130f   :  { %5099 = vmatprep.mubr.msk.f32.mxu0 %vm5653_vm1, %v5649_v1  ;;  %5120 = vmatprep.mubr.msk.f32.mxu1 %vm5653_vm1, %v5649_v1 }
0x1311   :  { %5100 = vmatmul.mubr.msk.f32.vlgmr.msra.gmra.mrb[10].mxu0 %vm1889_vm3, %v1797_v36  ;;  %5121 = vmatmul.mubr.msk.f32.vlgmr.msra.gmra.mrb[10].mxu1 %vm1889_vm3, %v1804_v59 }
0x1312   :  { %5102 = vmatprep.mubr.msk.f32.mxu0 %vm5653_vm1, %v5649_v1  ;;  %5123 = vmatprep.mubr.msk.f32.mxu1 %vm5653_vm1, %v5649_v1 }
0x1315   :  { %5103 = vmatmul.mubr.msk.f32.gmra.mrb[12].mxu0 %vm1889_vm3, %v1798_v32  ;;  %5124 = vmatmul.mubr.msk.f32.gmra.mrb[12].mxu1 %vm1889_vm3, %v1805_v44 }
0x1316   :  { %5105 = vmatprep.mubr.msk.f32.mxu0 %vm5653_vm1, %v5649_v1  ;;  %5126 = vmatprep.mubr.msk.f32.mxu1 %vm5653_vm1, %v5649_v1 }
0x1319   :  { %5106 = vmatmul.mubr.msk.f32.gmra.mrb[14].mxu0 %vm1889_vm3, %v1799_v47  ;;  %5127 = vmatmul.mubr.msk.f32.gmra.mrb[14].mxu1 %vm1889_vm3, %v1806_v48 }
0x131a   :  { %5108 = vmatprep.mubr.msk.f32.mxu0 %vm5653_vm1, %v5649_v1  ;;  %5129 = vmatprep.mubr.msk.f32.mxu1 %vm5653_vm1, %v5649_v1 }
0x131d   :  { %5109 = vmatmul.mubr.msk.f32.gmra.mrb[16].mxu0 %vm1889_vm3, %v1800_v50  ;;  %5130 = vmatmul.mubr.msk.f32.gmra.mrb[16].mxu1 %vm1889_vm3, %v1807_v54 }
0x131e   :  { %5111 = vmatprep.mubr.msk.f32.mxu0 %vm5653_vm1, %v5649_v1  ;;  %5132 = vmatprep.mubr.msk.f32.mxu1 %vm5653_vm1, %v5649_v1 }
0x1321   :  { %5112 = vmatmul.mubr.msk.f32.gmra.mrb[18].mxu0 %vm1889_vm3, %v1801_v56  ;;  %5133 = vmatmul.mubr.msk.f32.gmra.mrb[18].mxu1 %vm1889_vm3, %v1808_v58 }
0x1322   :  { %5114 = vmatprep.mubr.msk.f32.mxu0 %vm5653_vm1, %v5649_v1  ;;  %5135 = vmatprep.mubr.msk.f32.mxu1 %vm5653_vm1, %v5649_v1 }
0x1325   :  { %5115 = vmatmul.mubr.msk.f32.gmra.mrb[20].mxu0 %vm1889_vm3, %v1802_v62  ;;  %5136 = vmatmul.mubr.msk.f32.gmra.mrb[20].mxu1 %vm1889_vm3, %v1809_v63 }
0x1326   :  { %5117 = vmatprep.mubr.msk.f32.mxu0 %vm5653_vm1, %v5649_v1  ;;  %v6319_v1 = vsub.s32 %v2079_v7, %v5917_v52  ;;  %vm1780_vm1 = vcmask 331016  }
0x1328   :  { %v3170_v13 = vrot.slane %v5024_v6, %v6319_v1  ;;  %v3177_v14 = vrot.slane %v3163_v11, %v6319_v1  ;;  %v3433_v17 = vrot.slane %v5025_v8, %v6319_v1  ;;  %v3440_v18 = vrot.slane %v3426_v12, %v6319_v1 }
0x1329   :  { %5118 = vmatmul.mubr.msk.f32.gmra.mrb[22].mxu0 %vm1889_vm3, %v1803_v2  ;;  %vm4934_vm3 = vcmask 23552  }
0x132a   :  { %v3178_v23 = vcombine.high %v3170_v13, %v3170_v13  ;;  %v3179_v24 = vcombine.high %v3177_v14, %v3177_v14  ;;  %v3441_v25 = vcombine.high %v3433_v17, %v3433_v17  ;;  %v3442_v19 = vcombine.high %v3440_v18, %v3440_v18 }
0x132b   :  { %v6326_v29 = vrot.slane %v3170_v13, %v6319_v1  ;;  %v6331_v35 = vrot.slane %v3177_v14, %v6319_v1  ;;  %v6340_v37 = vrot.slane %v3433_v17, %v6319_v1  ;;  %v6344_v49 = vrot.slane %v3440_v18, %v6319_v1 }
0x132c   :  { %v6334_v33 = vrot.slane %v3178_v23, %v6319_v1  ;;  %v6337_v34 = vrot.slane %v3179_v24, %v6319_v1  ;;  %v6347_v55 = vrot.slane %v3441_v25, %v6319_v1  ;;  %v6350_v5 = vrot.slane %v3442_v19, %v6319_v1 }
0x132d   :  { %7833 = vst [vmem:[#allocation13_spill] sm:$0xff] %v6344_v49  ;;  %v6355_v39 = vcombine.high %v6326_v29, %v6326_v29  ;;  %v6359_v10 = vcombine.high %v6331_v35, %v6331_v35  ;;  %v6371_v16 = vcombine.high %v6340_v37, %v6340_v37  ;;  %v6380_v0 = vcombine.high %v6344_v49, %v6344_v49 }
0x132e   :  { %7834 = vst [vmem:[#allocation14_spill] sm:$0xff] %v6350_v5  ;;  %v6363_v15 = vcombine.high %v6334_v33, %v6334_v33  ;;  %v6367_v57 = vcombine.high %v6337_v34, %v6337_v34  ;;  %v6384_v43 = vcombine.high %v6350_v5, %v6350_v5  ;;  %v6388_v36 = vcombine.high %v6347_v55, %v6347_v55 }
0x1330   :  { %7835 = vst [vmem:[#allocation15_spill] sm:$0xff] %v6388_v36 }
0x13e0   :  { %v6328_v30 = vpop.f32.mrb[8].mxu0  ;;  %v1884_v31 = vpop.f32.mrb[8].mxu1 }
0x13e1   :  { %7832 = vst [vmem:[#allocation12_spill] sm:$0xff] %v6328_v30  ;;  %v2795_v40 = vrot.slane %v1884_v31, %v6319_v1  ;;  %v5077_v45 = vpop.f32.mrb[9].mxu0  ;;  %v5096_v46 = vpop.f32.mrb[9].mxu1 }
0x13e3   :  { %v2796_v38 = vcombine.high %v2795_v40, %v2795_v40  ;;  %v2803_v9 = vrot.slane %v2795_v40, %v6319_v1 }
0x13e4   :  { %v1999_v41 = vpop.f32.mrb[10].mxu0  ;;  %v6373_v20 = vpop.f32.mrb[10].mxu1 }
0x13e5   :  { %v2810_v21 = vrot.slane %v2796_v38, %v6319_v1  ;;  %v2811_v22 = vcombine.high %v2803_v9, %v2803_v9  ;;  %v2816_v26 = vrot.slane %v2803_v9, %v5931_v60  ;;  %v2076_v42 = vcombine.high %v1999_v41, %v1999_v41  ;;  %v5101_v61 = vpop.f32.mrb[11].mxu0  ;;  %v5122_v27 = vpop.f32.mrb[11].mxu1 }
0x13e6   :  { %v2083_v28 = vrot.slane %v1999_v41, %v6319_v1  ;;  %v6398_v56 = vrot.slane %v6373_v20, %v6319_v1 }
0x13e7   :  { %v2812_v59 = vcombine.high %v2810_v21, %v2810_v21  ;;  %v2820_v32 = vrot.slane %v2810_v21, %v5931_v60  ;;  %v2824_v44 = vrot.slane %v2811_v22, %v5931_v60  ;;  %v2829_v47 = vcombine.high %v2816_v26, %v2816_v26 }
0x13e8   :  { %v2836_v48 = vrot.slane %v2816_v26, %v6319_v1  ;;  %v2090_v50 = vrot.slane %v2076_v42, %v6319_v1  ;;  %v6400_v58 = vpop.f32.mrb[12].mxu0  ;;  %v6402_v62 = vpop.f32.mrb[12].mxu1  ;;  %v2091_v4 = vcombine.high %v2083_v28, %v2083_v28  ;;  %v2099_v13 = vrot.slane %v2083_v28, %v6319_v1 }
0x13e9   :  { %v2843_v63 = vrot.slane %v2829_v47, %v6319_v1  ;;  %v2878_v2 = vcombine.high %v2820_v32, %v2820_v32  ;;  %v2885_v3 = vrot.slane %v2820_v32, %v6319_v1  ;;  %v5104_v6 = vpop.f32.mrb[13].mxu0  ;;  %v5125_v7 = vpop.f32.mrb[13].mxu1  ;;  %v2927_v11 = vcombine.high %v2824_v44, %v2824_v44 }
0x13ea   :  { %v2844_v8 = vcombine.high %v2836_v48, %v2836_v48  ;;  %v2934_v12 = vrot.slane %v2824_v44, %v6319_v1  ;;  %v2828_v14 = vrot.slane %v2812_v59, %v5931_v60  ;;  %v6411_v24 = vrot.slane %v2836_v48, %v6319_v1 }
0x13eb   :  { %v2845_v17 = vcombine.high %v2843_v63, %v2843_v63  ;;  %v2892_v18 = vrot.slane %v2878_v2, %v6319_v1  ;;  %v2893_v23 = vcombine.high %v2885_v3, %v2885_v3  ;;  %v6414_v25 = vrot.slane %v2843_v63, %v6319_v1 }
0x13ec   :  { %v2941_v19 = vrot.slane %v2927_v11, %v6319_v1  ;;  %v2942_v31 = vcombine.high %v2934_v12, %v2934_v12  ;;  %v6417_v40 = vpop.f32.mrb[14].mxu0  ;;  %v6419_v45 = vpop.f32.mrb[14].mxu1  ;;  %v6422_v46 = vrot.slane %v2844_v8, %v6319_v1  ;;  %v6428_v41 = vrot.slane %v2885_v3, %v6319_v1 }
0x13ed   :  { %v6425_v38 = vrot.slane %v2845_v17, %v6319_v1  ;;  %v2894_v9 = vcombine.high %v2892_v18, %v2892_v18  ;;  %v5107_v21 = vpop.f32.mrb[15].mxu0  ;;  %v5128_v22 = vpop.f32.mrb[15].mxu1  ;;  %v6431_v26 = vrot.slane %v2892_v18, %v6319_v1  ;;  %v6434_v42 = vrot.slane %v2893_v23, %v6319_v1 }
0x13ee   :  { %v2943_v61 = vcombine.high %v2941_v19, %v2941_v19  ;;  %v6437_v27 = vrot.slane %v2934_v12, %v6319_v1  ;;  %v6440_v28 = vrot.slane %v2941_v19, %v6319_v1  ;;  %v2976_v59 = vcombine.high %v2828_v14, %v2828_v14 }
0x13ef   :  { %v2983_v32 = vrot.slane %v2828_v14, %v6319_v1  ;;  %v2092_v44 = vcombine.high %v2090_v50, %v2090_v50  ;;  %v6444_v47 = vrot.slane %v2894_v9, %v6319_v1  ;;  %v6447_v48 = vrot.slane %v2942_v31, %v6319_v1 }
0x13f0   :  { %v2106_v63 = vrot.slane %v2090_v50, %v6319_v1  ;;  %v2113_v2 = vrot.slane %v2091_v4, %v6319_v1  ;;  %v6451_v3 = vpop.f32.mrb[16].mxu0  ;;  %v6453_v6 = vpop.f32.mrb[16].mxu1  ;;  %v6456_v7 = vrot.slane %v2943_v61, %v6319_v1  ;;  %v6459_v8 = vrot.slane %v2976_v59, %v6319_v1 }
0x13f1   :  { %7836 = vst [vmem:[#allocation16_spill] sm:$0xff] %v6444_v47  ;;  %v2120_v11 = vrot.slane %v2092_v44, %v6319_v1  ;;  %v2121_v12 = vcombine.high %v2099_v13, %v2099_v13  ;;  %v5110_v14 = vpop.f32.mrb[17].mxu0  ;;  %v5131_v17 = vpop.f32.mrb[17].mxu1  ;;  %v2991_v18 = vcombine.high %v2983_v32, %v2983_v32  ;;  %v6463_v50 = vrot.slane %v2983_v32, %v6319_v1 }
0x13f2   :  { %7837 = vst [vmem:[#allocation17_spill] sm:$0xff] %v6459_v8  ;;  %v6467_v4 = vcombine.high %v6411_v24, %v6411_v24  ;;  %v6471_v23 = vcombine.high %v6414_v25, %v6414_v25  ;;  %v2122_v31 = vcombine.high %v2106_v63, %v2106_v63  ;;  %v2123_v9 = vcombine.high %v2113_v2, %v2113_v2 }
0x13f3   :  { %v2124_v21 = vcombine.high %v2120_v11, %v2120_v11  ;;  %v6477_v22 = vcombine.high %v6422_v46, %v6422_v46  ;;  %v6481_v61 = vcombine.high %v6425_v38, %v6425_v38  ;;  %v3057_v59 = vadd.f32 %v6411_v24, %v2099_v13 }
0x13f4   :  { %v3058_v32 = vadd.f32 %v6422_v46, %v2113_v2  ;;  %v6485_v44 = vpop.f32.mrb[18].mxu0  ;;  %v6487_v14 = vpop.f32.mrb[18].mxu1  ;;  %v3059_v17 = vadd.f32 %v6467_v4, %v2121_v12  ;;  %v3061_v51 = vadd.f32 %v6414_v25, %v2106_v63  ;;  %v3062_v19 = vadd.f32 %v6425_v38, %v2120_v11 }
0x13f5   :  { %7838 = vst [vmem:[#allocation18_spill] sm:$0xff] %v6485_v44  ;;  %7839 = vst [vmem:[#allocation19_spill] sm:$0xff] %v6487_v14  ;;  %v3063_v54 = vadd.f32 %v6471_v23, %v2122_v31  ;;  %v5113_v53 = vpop.f32.mrb[19].mxu0  ;;  %v5134_v60 = vpop.f32.mrb[19].mxu1  ;;  %v3060_v52 = vadd.f32 %v6477_v22, %v2123_v9  ;;  %v3064_v13 = vadd.f32 %v6481_v61, %v2124_v21 }
0x13f6   :  { %v3220_v2 = vadd.f32 %v6326_v29, %v3057_v59  ;;  %v3221_v30 = vadd.f32 %v6334_v33, %v3058_v32  ;;  %v3222_v14 = vadd.f32 %v6355_v39, %v3059_v17  ;;  %v3224_v12 = vadd.f32 %v6331_v35, %v3061_v51 }
0x13f7   :  { %v6500_v63 = vadd.f32 %v6337_v34, %v3062_v19  ;;  %v6503_v11 = vadd.f32 %v6359_v10, %v3063_v54  ;;  %v6506_v53 = vadd.f32 %v6363_v15, %v3060_v52  ;;  %v6509_v60 = vadd.f32 %v6367_v57, %v3064_v13 }
0x13f8   :  { %v3320_v31 = vmax.f32 %v3220_v2, 0.0  ;;  %v3321_v9 = vmax.f32 %v3221_v30, 0.0  ;;  %v6511_v21 = vpop.f32.mrb[20].mxu0  ;;  %v6513_v59 = vpop.f32.mrb[20].mxu1  ;;  %v6517_v51 = vrot.slane %v6459_v8, %v6319_v1  ;;  %v6520_v19 = vrot.slane %v2991_v18, %v6319_v1 }
0x13f9   :  { %7840 = vst [vmem:[#allocation20_spill] sm:$0xff] %v6500_v63  ;;  %7841 = vst [vmem:[#allocation21_spill] sm:$0xff] %v6503_v11  ;;  %v3322_v54 = vmax.f32 %v3222_v14, 0.0  ;;  %v3324_v32 = vmax.f32 %v3224_v12, 0.0  ;;  %v5116_v52 = vpop.f32.mrb[21].mxu0  ;;  %v5137_v17 = vpop.f32.mrb[21].mxu1  ;;  %v7848_v18 = vcombine.high %v6373_v20, %v6373_v20  ;;  %v2434_v12 = vcombine.high %v6398_v56, %v6398_v56 }
0x13fa   :  { %7842 = vst [vmem:[#allocation22_spill] sm:$0xff] %v6506_v53  ;;  %7843 = vst [vmem:[#allocation23_spill] sm:$0xff] %v6509_v60  ;;  %v6530_v5 = vmul.f32 %v6347_v55, %v3321_v9  ;;  %v2442_v52 = vrot.slane %v6398_v56, %v6319_v1  ;;  %v6542_v17 = vcombine.high %v6437_v27, %v6437_v27 }
0x13fb   :  { %7844 = vst [vmem:[#allocation24_spill] sm:$0xff] %v6511_v21  ;;  %7845 = vst [vmem:[#allocation25_spill] sm:$0xff] %v6513_v59  ;;  %v6527_v59 = vmul.f32 %v6340_v37, %v3320_v31  ;;  %v2433_v14 = vrot.slane %v7848_v18, %v6319_v1  ;;  %v6546_v31 = vcombine.high %v6440_v28, %v6440_v28 }
0x13fc   :  { %7847 = vst [vmem:[#allocation27_spill] sm:$0xff] %v6530_v5  ;;  %v6550_v9 = vcombine.high %v6447_v48, %v6447_v48  ;;  %v6552_v20 = vpop.f32.mrb[22].mxu0  ;;  %v2456_v30 = vrot.slane %v2434_v12, %v6319_v1  ;;  %v6558_v56 = vcombine.high %v6456_v7, %v6456_v7  ;;  %v2464_v13 = vcombine.high %v2442_v52, %v2442_v52 }
0x13fd   :  { %7846 = vst [vmem:[#allocation26_spill] sm:$0xff] %v6527_v59  ;;  %7849 = vst [vmem:[#allocation28_spill] sm:$0xff] %v6552_v20  ;;  %v2435_v18 = vcombine.high %v2433_v14, %v2433_v14  ;;  %v2449_v21 = vrot.slane %v2433_v14, %v6319_v1  ;;  %v5119_v2 = vpop.f32.mrb[23].mxu0  ;;  %v3113_v59 = vadd.f32 %v6546_v31, %v2442_v52 }
0x13fe   :  { %v2125_v5 = vcombine.high %v6400_v58, %v6400_v58  ;;  %v2132_v60 = vrot.slane %v6400_v58, %v6319_v1  ;;  %v2466_v14 = vcombine.high %v2456_v30, %v2456_v30  ;;  %v3114_v12 = vadd.f32 %v6558_v56, %v2456_v30 }
0x13ff   :  { %v2463_v11 = vrot.slane %v2435_v18, %v6319_v1  ;;  %v2465_v63 = vcombine.high %v2449_v21, %v2449_v21  ;;  %v3115_v53 = vadd.f32 %v6437_v27, %v2464_v13  ;;  %v3117_v20 = vadd.f32 %v6542_v17, %v2449_v21 }
0x1400   :  { %v3276_v2 = vadd.f32 %v6359_v10, %v3113_v59  ;;  %v2139_v52 = vrot.slane %v2125_v5, %v6319_v1  ;;  %v3116_v44 = vadd.f32 %v6447_v48, %v2466_v14  ;;  %v3277_v18 = vadd.f32 %v6367_v57, %v3114_v12 }
0x1401   :  { %v2467_v36 = vcombine.high %v2463_v11, %v2463_v11  ;;  %v3118_v8 = vadd.f32 %v6550_v9, %v2463_v11  ;;  %v3119_v58 = vadd.f32 %v6440_v28, %v2465_v63  ;;  %v3278_v47 = vadd.f32 %v6326_v29, %v3115_v53 }
0x1402   :  { %v3280_v30 = vadd.f32 %v6355_v39, %v3117_v20  ;;  %v3376_v13 = vmax.f32 %v3276_v2, 0.0  ;;  %v6579_v59 = vadd.f32 %v6334_v33, %v3116_v44  ;;  %v6588_v63 = vmul.f32 %v6371_v16, %v3322_v54 }
0x1403   :  { %v3120_v21 = vadd.f32 %v6456_v7, %v2467_v36  ;;  %v6582_v5 = vadd.f32 %v6363_v15, %v3118_v8  ;;  %v6585_v14 = vadd.f32 %v6331_v35, %v3119_v58  ;;  %v3377_v11 = vmax.f32 %v3277_v18, 0.0 }
0x1404   :  { %7850 = vst [vmem:[#allocation29_spill] sm:$0xff] %v6579_v59  ;;  %v3378_v12 = vmax.f32 %v3278_v47, 0.0  ;;  %v3380_v53 = vmax.f32 %v3280_v30, 0.0  ;;  %v6591_v20 = vmul.f32 %v6344_v49, %v3324_v32  ;;  %v6598_v8 = vmul.f32 %v6380_v0, %v3376_v13 }
0x1405   :  { %7851 = vst [vmem:[#allocation30_spill] sm:$0xff] %v6582_v5  ;;  %7852 = vst [vmem:[#allocation31_spill] sm:$0xff] %v6585_v14  ;;  %v6594_v36 = vadd.f32 %v6337_v34, %v3120_v21  ;;  %v6603_v54 = vmul.f32 %v6384_v43, %v3377_v11  ;;  %v2140_v47 = vcombine.high %v2132_v60, %v2132_v60 }
0x1406   :  { %7853 = vst [vmem:[#allocation32_spill] sm:$0xff] %v6591_v20  ;;  %7855 = vst [vmem:[#allocation34_spill] sm:$0xff] %v6598_v8  ;;  %v6606_v18 = vmul.f32 %v6340_v37, %v3378_v12  ;;  %v2141_v32 = vcombine.high %v2139_v52, %v2139_v52  ;;  %v2148_v30 = vrot.slane %v2132_v60, %v6319_v1 }
0x1407   :  { %7854 = vst [vmem:[#allocation33_spill] sm:$0xff] %v6594_v36  ;;  %7856 = vst [vmem:[#allocation35_spill] sm:$0xff] %v6603_v54  ;;  %v2155_v21 = vrot.slane %v2139_v52, %v6319_v1  ;;  %v6611_v44 = vmul.f32 %v6371_v16, %v3380_v53  ;;  %v2162_v13 = vrot.slane %v2140_v47, %v6319_v1 }
0x1408   :  { %7857 = vst [vmem:[#allocation36_spill] sm:$0xff] %v6606_v18  ;;  %v2468_v58 = vcombine.high %v6402_v62, %v6402_v62  ;;  %v2475_v11 = vrot.slane %v6402_v62, %v6319_v1  ;;  %v2169_v2 = vrot.slane %v2141_v32, %v6319_v1  ;;  %v2170_v12 = vcombine.high %v2148_v30, %v2148_v30 }
0x1409   :  { %7858 = vst [vmem:[#allocation37_spill] sm:$0xff] %v6611_v44  ;;  %v2171_v8 = vcombine.high %v2155_v21, %v2155_v21  ;;  %v3065_v54 = vadd.f32 %v6411_v24, %v2148_v30  ;;  %v2172_v60 = vcombine.high %v2162_v13, %v2162_v13  ;;  %v3066_v52 = vadd.f32 %v6422_v46, %v2162_v13 }
0x140a   :  { %v3069_v53 = vadd.f32 %v6414_v25, %v2155_v21  ;;  %v2482_v44 = vrot.slane %v2468_v58, %v6319_v1  ;;  %v2173_v47 = vcombine.high %v2169_v2, %v2169_v2  ;;  %v3067_v18 = vadd.f32 %v6467_v4, %v2170_v12 }
0x140b   :  { %v3070_v14 = vadd.f32 %v6425_v38, %v2169_v2  ;;  %v3071_v62 = vadd.f32 %v6471_v23, %v2171_v8  ;;  %v3068_v32 = vadd.f32 %v6477_v22, %v2172_v60  ;;  %v3228_v5 = vadd.f32 %v6326_v29, %v3065_v54 }
0x140c   :  { %v3229_v30 = vadd.f32 %v6334_v33, %v3066_v52  ;;  %v3232_v59 = vadd.f32 %v6331_v35, %v3069_v53  ;;  %v3072_v13 = vadd.f32 %v6481_v61, %v2173_v47  ;;  %v3230_v21 = vadd.f32 %v6355_v39, %v3067_v18 }
0x140d   :  { %v6633_v58 = vadd.f32 %v6337_v34, %v3070_v14  ;;  %v6636_v12 = vadd.f32 %v6359_v10, %v3071_v62  ;;  %v6639_v8 = vadd.f32 %v6363_v15, %v3068_v32  ;;  %v3328_v2 = vmax.f32 %v3228_v5, 0.0 }
0x140e   :  { %v3329_v60 = vmax.f32 %v3229_v30, 0.0  ;;  %v3332_v54 = vmax.f32 %v3232_v59, 0.0  ;;  %v6643_v53 = vadd.f32 %v6367_v57, %v3072_v13  ;;  %v3330_v47 = vmax.f32 %v3230_v21, 0.0 }
0x140f   :  { %7859 = vst [vmem:[#allocation38_spill] sm:$0xff] %v6633_v58  ;;  %7860 = vst [vmem:[#allocation39_spill] sm:$0xff] %v6636_v12  ;;  %v2174_v18 = vcombine.high %v6417_v40, %v6417_v40  ;;  %v6651_v32 = vmul.f32 %v6340_v37, %v3328_v2  ;;  %v2483_v30 = vcombine.high %v2475_v11, %v2475_v11 }
0x1410   :  { %7861 = vst [vmem:[#allocation40_spill] sm:$0xff] %v6639_v8  ;;  %7862 = vst [vmem:[#allocation41_spill] sm:$0xff] %v6643_v53  ;;  %v6654_v59 = vmul.f32 %v6347_v55, %v3329_v60  ;;  %v6657_v5 = vmul.f32 %v6344_v49, %v3332_v54  ;;  %v2484_v13 = vcombine.high %v2482_v44, %v2482_v44  ;;  %v7915_v8 = vld [vmem:[#allocation24_spill] sm:$0xff] }
0x1411   :  { %7863 = vst [vmem:[#allocation42_spill] sm:$0xff] %v6651_v32  ;;  %v6661_v52 = vmul.f32 %v6371_v16, %v3330_v47  ;;  %v2491_v62 = vrot.slane %v2475_v11, %v6319_v1  ;;  %v2498_v20 = vrot.slane %v2482_v44, %v6319_v1  ;;  %v2505_v2 = vrot.slane %v2483_v30, %v6319_v1 }
0x1412   :  { %7864 = vst [vmem:[#allocation43_spill] sm:$0xff] %v6654_v59  ;;  %7865 = vst [vmem:[#allocation44_spill] sm:$0xff] %v6657_v5  ;;  %v2512_v14 = vrot.slane %v2484_v13, %v6319_v1  ;;  %v2181_v60 = vrot.slane %v6417_v40, %v6319_v1  ;;  %v2188_v54 = vrot.slane %v2174_v18, %v6319_v1 }
0x1413   :  { %7866 = vst [vmem:[#allocation45_spill] sm:$0xff] %v6661_v52  ;;  %v2513_v36 = vcombine.high %v2491_v62, %v2491_v62  ;;  %v2514_v5 = vcombine.high %v2498_v20, %v2498_v20  ;;  %v3121_v21 = vadd.f32 %v6546_v31, %v2491_v62  ;;  %v3125_v47 = vadd.f32 %v6542_v17, %v2498_v20 }
0x1414   :  { %v2515_v52 = vcombine.high %v2505_v2, %v2505_v2  ;;  %v2516_v32 = vcombine.high %v2512_v14, %v2512_v14  ;;  %v3122_v11 = vadd.f32 %v6558_v56, %v2505_v2  ;;  %v3126_v44 = vadd.f32 %v6550_v9, %v2512_v14 }
0x1415   :  { %v3123_v30 = vadd.f32 %v6437_v27, %v2513_v36  ;;  %v3127_v13 = vadd.f32 %v6440_v28, %v2514_v5  ;;  %v3284_v40 = vadd.f32 %v6359_v10, %v3121_v21  ;;  %v3288_v18 = vadd.f32 %v6355_v39, %v3125_v47 }
0x1416   :  { %v3124_v59 = vadd.f32 %v6447_v48, %v2515_v52  ;;  %v3128_v62 = vadd.f32 %v6456_v7, %v2516_v32  ;;  %v3285_v20 = vadd.f32 %v6367_v57, %v3122_v11  ;;  %v6682_v53 = vadd.f32 %v6363_v15, %v3126_v44 }
0x1417   :  { %v3286_v2 = vadd.f32 %v6326_v29, %v3123_v30  ;;  %v6686_v14 = vadd.f32 %v6331_v35, %v3127_v13  ;;  %v3384_v36 = vmax.f32 %v3284_v40, 0.0  ;;  %v3388_v5 = vmax.f32 %v3288_v18, 0.0 }
0x1418   :  { %7867 = vst [vmem:[#allocation46_spill] sm:$0xff] %v6682_v53  ;;  %v6689_v21 = vadd.f32 %v6334_v33, %v3124_v59  ;;  %v6692_v47 = vadd.f32 %v6337_v34, %v3128_v62  ;;  %v2517_v52 = vcombine.high %v6419_v45, %v6419_v45  ;;  %v2524_v32 = vrot.slane %v6419_v45, %v6319_v1 }
0x1419   :  { %7868 = vst [vmem:[#allocation47_spill] sm:$0xff] %v6686_v14  ;;  %v3385_v11 = vmax.f32 %v3285_v20, 0.0  ;;  %v3386_v44 = vmax.f32 %v3286_v2, 0.0  ;;  %v6702_v59 = vmul.f32 %v6380_v0, %v3384_v36  ;;  %v6705_v18 = vmul.f32 %v6371_v16, %v3388_v5 }
0x141a   :  { %7869 = vst [vmem:[#allocation48_spill] sm:$0xff] %v6689_v21  ;;  %7870 = vst [vmem:[#allocation49_spill] sm:$0xff] %v6692_v47  ;;  %v2189_v62 = vcombine.high %v2181_v60, %v2181_v60  ;;  %v2190_v58 = vcombine.high %v2188_v54, %v2188_v54  ;;  %v2197_v45 = vrot.slane %v2181_v60, %v6319_v1 }
0x141b   :  { %7871 = vst [vmem:[#allocation50_spill] sm:$0xff] %v6702_v59  ;;  %7872 = vst [vmem:[#allocation51_spill] sm:$0xff] %v6705_v18  ;;  %v2204_v20 = vrot.slane %v2188_v54, %v6319_v1  ;;  %v2531_v13 = vrot.slane %v2517_v52, %v6319_v1  ;;  %v2532_v30 = vcombine.high %v2524_v32, %v2524_v32 }
0x141c   :  { %v2211_v2 = vrot.slane %v2189_v62, %v6319_v1  ;;  %v2540_v40 = vrot.slane %v2524_v32, %v6319_v1  ;;  %v2218_v36 = vrot.slane %v2190_v58, %v6319_v1  ;;  %v2219_v14 = vcombine.high %v2197_v45, %v2197_v45 }
0x141d   :  { %v2220_v5 = vcombine.high %v2204_v20, %v2204_v20  ;;  %v3073_v18 = vadd.f32 %v6411_v24, %v2197_v45  ;;  %v3077_v60 = vadd.f32 %v6414_v25, %v2204_v20  ;;  %v2533_v47 = vcombine.high %v2531_v13, %v2531_v13 }
0x141e   :  { %v2221_v53 = vcombine.high %v2211_v2, %v2211_v2  ;;  %v3074_v12 = vadd.f32 %v6422_v46, %v2211_v2  ;;  %v2222_v54 = vcombine.high %v2218_v36, %v2218_v36  ;;  %v3075_v62 = vadd.f32 %v6467_v4, %v2219_v14 }
0x141f   :  { %v3078_v52 = vadd.f32 %v6425_v38, %v2218_v36  ;;  %v3079_v21 = vadd.f32 %v6471_v23, %v2220_v5  ;;  %v3236_v58 = vadd.f32 %v6326_v29, %v3073_v18  ;;  %v3240_v45 = vadd.f32 %v6331_v35, %v3077_v60 }
0x1420   :  { %v3076_v32 = vadd.f32 %v6477_v22, %v2221_v53  ;;  %v3237_v59 = vadd.f32 %v6334_v33, %v3074_v12  ;;  %v3080_v46 = vadd.f32 %v6481_v61, %v2222_v54  ;;  %v3238_v25 = vadd.f32 %v6355_v39, %v3075_v62 }
0x1421   :  { %v6727_v20 = vadd.f32 %v6337_v34, %v3078_v52  ;;  %v6730_v4 = vadd.f32 %v6359_v10, %v3079_v21  ;;  %v3336_v23 = vmax.f32 %v3236_v58, 0.0  ;;  %v3340_v53 = vmax.f32 %v3240_v45, 0.0 }
0x1422   :  { %v6733_v38 = vadd.f32 %v6363_v15, %v3076_v32  ;;  %v3337_v22 = vmax.f32 %v3237_v59, 0.0  ;;  %v6736_v12 = vmul.f32 %v6384_v43, %v3385_v11  ;;  %v6739_v14 = vmul.f32 %v6340_v37, %v3386_v44 }
0x1423   :  { %7873 = vst [vmem:[#allocation52_spill] sm:$0xff] %v6727_v20  ;;  %7874 = vst [vmem:[#allocation53_spill] sm:$0xff] %v6730_v4  ;;  %v6742_v61 = vadd.f32 %v6367_v57, %v3080_v46  ;;  %v3338_v18 = vmax.f32 %v3238_v25, 0.0  ;;  %v6748_v5 = vmul.f32 %v6340_v37, %v3336_v23  ;;  %v6754_v11 = vmul.f32 %v6344_v49, %v3340_v53 }
0x1424   :  { %7875 = vst [vmem:[#allocation54_spill] sm:$0xff] %v6733_v38  ;;  %7876 = vst [vmem:[#allocation55_spill] sm:$0xff] %v6736_v12  ;;  %v6751_v59 = vmul.f32 %v6347_v55, %v3337_v22  ;;  %v2547_v44 = vrot.slane %v2531_v13, %v6319_v1  ;;  %v2554_v60 = vrot.slane %v2532_v30, %v6319_v1 }
0x1425   :  { %7877 = vst [vmem:[#allocation56_spill] sm:$0xff] %v6739_v14  ;;  %7878 = vst [vmem:[#allocation57_spill] sm:$0xff] %v6742_v61  ;;  %v2561_v54 = vrot.slane %v2533_v47, %v6319_v1  ;;  %v2562_v62 = vcombine.high %v2540_v40, %v2540_v40  ;;  %v6761_v52 = vcombine.high %v6463_v50, %v6463_v50 }
0x1426   :  { %7879 = vst [vmem:[#allocation58_spill] sm:$0xff] %v6748_v5  ;;  %7880 = vst [vmem:[#allocation59_spill] sm:$0xff] %v6751_v59  ;;  %v6765_v32 = vcombine.high %v6520_v19, %v6520_v19  ;;  %v2563_v58 = vcombine.high %v2547_v44, %v2547_v44  ;;  %v2564_v45 = vcombine.high %v2554_v60, %v2554_v60 }
0x1427   :  { %7881 = vst [vmem:[#allocation60_spill] sm:$0xff] %v6754_v11  ;;  %v3129_v46 = vadd.f32 %v6546_v31, %v2540_v40  ;;  %v3130_v25 = vadd.f32 %v6558_v56, %v2554_v60  ;;  %v2565_v13 = vcombine.high %v2561_v54, %v2561_v54  ;;  %v6770_v30 = vadd.f32 %v6437_v27, %v2562_v62 }
0x1428   :  { %v3133_v47 = vadd.f32 %v6520_v19, %v2547_v44  ;;  %v3134_v23 = vadd.f32 %v6761_v52, %v2561_v54  ;;  %v3132_v22 = vadd.f32 %v6463_v50, %v2564_v45  ;;  %v3135_v53 = vadd.f32 %v6765_v32, %v2563_v58 }
0x1429   :  { %v3292_v36 = vadd.f32 %v6359_v10, %v3129_v46  ;;  %v3293_v21 = vadd.f32 %v6367_v57, %v3130_v25  ;;  %v3136_v31 = vadd.f32 %v6517_v51, %v2565_v13  ;;  %v2223_v44 = vcombine.high %v6451_v3, %v6451_v3 }
0x142a   :  { %v3296_v56 = vadd.f32 %v6334_v33, %v3133_v47  ;;  %v6781_v40 = vadd.f32 %v6355_v39, %v3134_v23  ;;  %v6786_v60 = vadd.f32 %v6326_v29, %v3132_v22  ;;  %v6789_v54 = vadd.f32 %v6363_v15, %v3135_v53 }
0x142b   :  { %v3392_v62 = vmax.f32 %v3292_v36, 0.0  ;;  %v3393_v58 = vmax.f32 %v3293_v21, 0.0  ;;  %v6793_v46 = vadd.f32 %v6331_v35, %v3136_v31  ;;  %v2230_v13 = vrot.slane %v6451_v3, %v6319_v1 }
0x142c   :  { %7882 = vst [vmem:[#allocation61_spill] sm:$0xff] %v6781_v40  ;;  %7883 = vst [vmem:[#allocation62_spill] sm:$0xff] %v6786_v60  ;;  %v3396_v25 = vmax.f32 %v3296_v56, 0.0  ;;  %v6798_v47 = vmul.f32 %v6371_v16, %v3338_v18  ;;  %v2237_v31 = vrot.slane %v2223_v44, %v6319_v1  ;;  %v6817_v2 = vcombine.high %v6428_v41, %v6428_v41 }
0x142d   :  { %7884 = vst [vmem:[#allocation63_spill] sm:$0xff] %v6789_v54  ;;  %7885 = vst [vmem:[#allocation64_spill] sm:$0xff] %v6793_v46  ;;  %v6804_v21 = vmul.f32 %v6380_v0, %v3392_v62  ;;  %v6807_v36 = vmul.f32 %v6384_v43, %v3393_v58  ;;  %v2238_v56 = vcombine.high %v2230_v13, %v2230_v13 }
0x142e   :  { %7886 = vst [vmem:[#allocation65_spill] sm:$0xff] %v6798_v47  ;;  %v6812_v18 = vmul.f32 %v6347_v55, %v3396_v25  ;;  %v2246_v45 = vrot.slane %v2230_v13, %v6319_v1  ;;  %v2239_v53 = vcombine.high %v2237_v31, %v2237_v31  ;;  %v2253_v62 = vrot.slane %v2237_v31, %v6319_v1 }
0x142f   :  { %7887 = vst [vmem:[#allocation66_spill] sm:$0xff] %v6804_v21  ;;  %7888 = vst [vmem:[#allocation67_spill] sm:$0xff] %v6807_v36  ;;  %v2260_v58 = vrot.slane %v2238_v56, %v6319_v1  ;;  %v6823_v44 = vcombine.high %v6431_v26, %v6431_v26  ;;  %v6827_v25 = vcombine.high %v6434_v42, %v6434_v42 }
0x1430   :  { %7889 = vst [vmem:[#allocation68_spill] sm:$0xff] %v6812_v18  ;;  %v2268_v22 = vcombine.high %v2246_v45, %v2246_v45  ;;  %v3081_v13 = vadd.f32 %v6411_v24, %v2246_v45  ;;  %v2566_v3 = vcombine.high %v6453_v6, %v6453_v6  ;;  %v2267_v23 = vrot.slane %v2239_v53, %v6319_v1  ;;  %v7890_v53 = vld [vmem:[#allocation16_spill] sm:$0xff] }
0x1431   :  { %v2269_v11 = vcombine.high %v2253_v62, %v2253_v62  ;;  %v2270_v31 = vcombine.high %v2260_v58, %v2260_v58  ;;  %v3082_v56 = vadd.f32 %v6428_v41, %v2260_v58  ;;  %v3085_v5 = vadd.f32 %v6827_v25, %v2253_v62 }
0x1432   :  { %v3083_v47 = vadd.f32 %v6434_v42, %v2268_v22  ;;  %v6837_v59 = vadd.f32 %v6326_v29, %v3081_v13  ;;  %v2573_v61 = vrot.slane %v6453_v6, %v6319_v1  ;;  %v2271_v24 = vcombine.high %v2267_v23, %v2267_v23 }
0x1433   :  { %v3084_v45 = vadd.f32 %v6817_v2, %v2270_v31  ;;  %v3086_v4 = vadd.f32 %v6431_v26, %v2267_v23  ;;  %v3087_v20 = vadd.f32 %v7890_v53, %v2269_v11  ;;  %v3245_v38 = vadd.f32 %v6326_v29, %v3082_v56 }
0x1434   :  { %v3246_v58 = vadd.f32 %v6334_v33, %v3083_v47  ;;  %v3248_v22 = vadd.f32 %v6363_v15, %v3085_v5  ;;  %v2580_v62 = vrot.slane %v2566_v3, %v6319_v1  ;;  %v3088_v13 = vadd.f32 %v6823_v44, %v2271_v24  ;;  %v7894_v47 = vld [vmem:[#allocation17_spill] sm:$0xff] }
0x1435   :  { %v6850_v18 = vadd.f32 %v6355_v39, %v3084_v45  ;;  %v6853_v6 = vadd.f32 %v6331_v35, %v3086_v4  ;;  %v6856_v23 = vadd.f32 %v6337_v34, %v3087_v20  ;;  %v3345_v11 = vmax.f32 %v3245_v38, 0.0  ;;  %v7899_v38 = vld [vmem:[#allocation18_spill] sm:$0xff] }
0x1436   :  { %v3346_v31 = vmax.f32 %v3246_v58, 0.0  ;;  %v2581_v56 = vcombine.high %v2573_v61, %v2573_v61  ;;  %v7895_v5 = vcombine.high %v7894_v47, %v7894_v47  ;;  %v6865_v3 = vadd.f32 %v6359_v10, %v3088_v13 }
0x1437   :  { %7891 = vst [vmem:[#allocation16_spill] sm:$0xff] %v6850_v18  ;;  %7892 = vst [vmem:[#allocation69_spill] sm:$0xff] %v6853_v6  ;;  %v3348_v45 = vmax.f32 %v3248_v22, 0.0  ;;  %v6872_v58 = vmul.f32 %v6340_v37, %v3345_v11  ;;  %v2582_v54 = vcombine.high %v2580_v62, %v2580_v62  ;;  %v2596_v13 = vrot.slane %v2580_v62, %v6319_v1 }
0x1438   :  { %7893 = vst [vmem:[#allocation70_spill] sm:$0xff] %v6856_v23  ;;  %v6862_v46 = vrot.slane %v7895_v5, %v6319_v1  ;;  %7896 = vst [vmem:[#allocation17_spill] sm:$0xff] %v6865_v3  ;;  %v6875_v47 = vmul.f32 %v6347_v55, %v3346_v31  ;;  %v2589_v5 = vrot.slane %v2573_v61, %v6319_v1 }
0x1439   :  { %7897 = vst [vmem:[#allocation71_spill] sm:$0xff] %v6872_v58  ;;  %v2603_v24 = vrot.slane %v2581_v56, %v6319_v1  ;;  %v2610_v4 = vrot.slane %v2582_v54, %v6319_v1  ;;  %v6883_v22 = vcombine.high %v6517_v51, %v6517_v51  ;;  %v2272_v31 = vcombine.high %v7899_v38, %v7899_v38 }
0x143a   :  { %7898 = vst [vmem:[#allocation72_spill] sm:$0xff] %v6875_v47  ;;  %v6887_v11 = vcombine.high %v6862_v46, %v6862_v46  ;;  %v2611_v20 = vcombine.high %v2589_v5, %v2589_v5  ;;  %v2612_v58 = vcombine.high %v2596_v13, %v2596_v13  ;;  %v3137_v62 = vadd.f32 %v6862_v46, %v2589_v5 }
0x143b   :  { %v2613_v61 = vcombine.high %v2603_v24, %v2603_v24  ;;  %v2614_v47 = vcombine.high %v2610_v4, %v2610_v4  ;;  %v3138_v56 = vadd.f32 %v6883_v22, %v2603_v24  ;;  %v3141_v54 = vadd.f32 %v6520_v19, %v2596_v13 }
0x143c   :  { %v3142_v23 = vadd.f32 %v6761_v52, %v2610_v4  ;;  %v3139_v6 = vadd.f32 %v6887_v11, %v2611_v20  ;;  %v3143_v40 = vadd.f32 %v6765_v32, %v2612_v58  ;;  %v3300_v60 = vadd.f32 %v6337_v34, %v3137_v62 }
0x143d   :  { %v3140_v18 = vadd.f32 %v6463_v50, %v2613_v61  ;;  %v3144_v21 = vadd.f32 %v6517_v51, %v2614_v47  ;;  %v3301_v36 = vadd.f32 %v6359_v10, %v3138_v56  ;;  %v3304_v5 = vadd.f32 %v6334_v33, %v3141_v54  ;;  %v7903_v61 = vld [vmem:[#allocation15_spill] sm:$0xff] }
0x143e   :  { %v6903_v24 = vadd.f32 %v6355_v39, %v3142_v23  ;;  %v3302_v13 = vadd.f32 %v6367_v57, %v3139_v6  ;;  %v6910_v20 = vadd.f32 %v6363_v15, %v3143_v40  ;;  %v3400_v58 = vmax.f32 %v3300_v60, 0.0  ;;  %v7906_v60 = vld [vmem:[#allocation14_spill] sm:$0xff] }
0x143f   :  { %v6907_v4 = vadd.f32 %v6326_v29, %v3140_v18  ;;  %v6913_v62 = vmul.f32 %v7903_v61, %v3348_v45  ;;  %v6916_v47 = vadd.f32 %v6331_v35, %v3144_v21  ;;  %v3401_v56 = vmax.f32 %v3301_v36, 0.0 }
0x1440   :  { %7900 = vst [vmem:[#allocation18_spill] sm:$0xff] %v6903_v24  ;;  %7902 = vst [vmem:[#allocation74_spill] sm:$0xff] %v6910_v20  ;;  %v3404_v54 = vmax.f32 %v3304_v5, 0.0  ;;  %v3402_v14 = vmax.f32 %v3302_v13, 0.0  ;;  %v6924_v49 = vmul.f32 %v7906_v60, %v3400_v58  ;;  %v2279_v21 = vrot.slane %v7899_v38, %v6319_v1  ;;  %v7910_v13 = vld [vmem:[#allocation19_spill] sm:$0xff] }
0x1441   :  { %7901 = vst [vmem:[#allocation73_spill] sm:$0xff] %v6907_v4  ;;  %7904 = vst [vmem:[#allocation15_spill] sm:$0xff] %v6913_v62  ;;  %v6929_v36 = vmul.f32 %v6380_v0, %v3401_v56  ;;  %v2286_v5 = vrot.slane %v2272_v31, %v6319_v1  ;;  %v2615_v18 = vcombine.high %v7910_v13, %v7910_v13 }
0x1442   :  { %7905 = vst [vmem:[#allocation75_spill] sm:$0xff] %v6916_v47  ;;  %7907 = vst [vmem:[#allocation14_spill] sm:$0xff] %v6924_v49  ;;  %v6932_v45 = vmul.f32 %v6347_v55, %v3404_v54  ;;  %v2287_v12 = vcombine.high %v2279_v21, %v2279_v21  ;;  %v2295_v40 = vrot.slane %v2279_v21, %v6319_v1 }
0x1443   :  { %7908 = vst [vmem:[#allocation76_spill] sm:$0xff] %v6929_v36  ;;  %v6940_v58 = vcombine.high %v7890_v53, %v7890_v53  ;;  %v2622_v38 = vrot.slane %v7910_v13, %v6319_v1  ;;  %v6945_v56 = vmul.f32 %v6384_v43, %v3402_v14  ;;  %v2288_v54 = vcombine.high %v2286_v5, %v2286_v5 }
0x1444   :  { %7909 = vst [vmem:[#allocation77_spill] sm:$0xff] %v6932_v45  ;;  %v2302_v6 = vrot.slane %v2286_v5, %v6319_v1  ;;  %v2629_v31 = vrot.slane %v2615_v18, %v6319_v1  ;;  %v2309_v23 = vrot.slane %v2287_v12, %v6319_v1  ;;  %v2317_v45 = vcombine.high %v2295_v40, %v2295_v40 }
0x1445   :  { %7911 = vst [vmem:[#allocation19_spill] sm:$0xff] %v6945_v56  ;;  %v3089_v21 = vadd.f32 %v6940_v58, %v2295_v40  ;;  %v2630_v47 = vcombine.high %v2622_v38, %v2622_v38  ;;  %v2316_v20 = vrot.slane %v2288_v54, %v6319_v1 }
0x1446   :  { %v2318_v24 = vcombine.high %v2302_v6, %v2302_v6  ;;  %v3093_v4 = vadd.f32 %v6827_v25, %v2302_v6  ;;  %v2631_v13 = vcombine.high %v2629_v31, %v2629_v31  ;;  %v2319_v62 = vcombine.high %v2309_v23, %v2309_v23 }
0x1447   :  { %v3090_v14 = vadd.f32 %v6428_v41, %v2309_v23  ;;  %v3091_v3 = vadd.f32 %v6434_v42, %v2317_v45  ;;  %v3252_v5 = vadd.f32 %v6367_v57, %v3089_v21  ;;  %v2320_v18 = vcombine.high %v2316_v20, %v2316_v20 }
0x1448   :  { %v3094_v12 = vadd.f32 %v6431_v26, %v2316_v20  ;;  %v3095_v49 = vadd.f32 %v7890_v53, %v2318_v24  ;;  %v3256_v40 = vadd.f32 %v6363_v15, %v3093_v4  ;;  %v3092_v54 = vadd.f32 %v6817_v2, %v2319_v62 }
0x1449   :  { %v3253_v36 = vadd.f32 %v6326_v29, %v3090_v14  ;;  %v3254_v6 = vadd.f32 %v6334_v33, %v3091_v3  ;;  %v3352_v56 = vmax.f32 %v3252_v5, 0.0  ;;  %v3096_v23 = vadd.f32 %v6823_v44, %v2320_v18 }
0x144a   :  { %v6964_v45 = vadd.f32 %v6331_v35, %v3094_v12  ;;  %v6967_v21 = vadd.f32 %v6337_v34, %v3095_v49  ;;  %v3356_v20 = vmax.f32 %v3256_v40, 0.0  ;;  %v6970_v24 = vadd.f32 %v6355_v39, %v3092_v54 }
0x144b   :  { %v3353_v4 = vmax.f32 %v3253_v36, 0.0  ;;  %v2321_v62 = vcombine.high %v7915_v8, %v7915_v8  ;;  %v2328_v3 = vrot.slane %v7915_v8, %v6319_v1  ;;  %v6977_v14 = vadd.f32 %v6359_v10, %v3096_v23 }
0x144c   :  { %7912 = vst [vmem:[#allocation78_spill] sm:$0xff] %v6964_v45  ;;  %7913 = vst [vmem:[#allocation79_spill] sm:$0xff] %v6967_v21  ;;  %v3354_v5 = vmax.f32 %v3254_v6, 0.0  ;;  %v6981_v49 = vmul.f32 %v6384_v43, %v3352_v56  ;;  %v6986_v36 = vmul.f32 %v7903_v61, %v3356_v20  ;;  %v2638_v54 = vrot.slane %v2622_v38, %v6319_v1 }
0x144d   :  { %7914 = vst [vmem:[#allocation80_spill] sm:$0xff] %v6970_v24  ;;  %v6990_v8 = vmul.f32 %v6340_v37, %v3353_v4  ;;  %v2645_v23 = vrot.slane %v2629_v31, %v6319_v1  ;;  %v2652_v6 = vrot.slane %v2630_v47, %v6319_v1  ;;  %v2659_v18 = vrot.slane %v2631_v13, %v6319_v1 }
0x144e   :  { %7916 = vst [vmem:[#allocation24_spill] sm:$0xff] %v6981_v49  ;;  %7917 = vst [vmem:[#allocation81_spill] sm:$0xff] %v6986_v36  ;;  %v2660_v56 = vcombine.high %v2638_v54, %v2638_v54  ;;  %v3145_v45 = vadd.f32 %v6862_v46, %v2638_v54  ;;  %v2335_v12 = vrot.slane %v2321_v62, %v6319_v1 }
0x144f   :  { %7918 = vst [vmem:[#allocation82_spill] sm:$0xff] %v6990_v8  ;;  %v2336_v40 = vcombine.high %v2328_v3, %v2328_v3  ;;  %v2661_v21 = vcombine.high %v2645_v23, %v2645_v23  ;;  %v2662_v20 = vcombine.high %v2652_v6, %v2652_v6  ;;  %v2663_v36 = vcombine.high %v2659_v18, %v2659_v18 }
0x1450   :  { %v3146_v38 = vadd.f32 %v6883_v22, %v2652_v6  ;;  %v3147_v4 = vadd.f32 %v6887_v11, %v2660_v56  ;;  %v3149_v8 = vadd.f32 %v6520_v19, %v2645_v23  ;;  %v3150_v31 = vadd.f32 %v6761_v52, %v2659_v18 }
0x1451   :  { %v3308_v47 = vadd.f32 %v6337_v34, %v3145_v45  ;;  %v3148_v13 = vadd.f32 %v6463_v50, %v2662_v20  ;;  %v3151_v54 = vadd.f32 %v6765_v32, %v2661_v21  ;;  %v3152_v62 = vadd.f32 %v6517_v51, %v2663_v36 }
0x1452   :  { %v3309_v24 = vadd.f32 %v6359_v10, %v3146_v38  ;;  %v3310_v49 = vadd.f32 %v6367_v57, %v3147_v4  ;;  %v3312_v6 = vadd.f32 %v6334_v33, %v3149_v8  ;;  %v7009_v56 = vadd.f32 %v6355_v39, %v3150_v31 }
0x1453   :  { %v3408_v19 = vmax.f32 %v3308_v47, 0.0  ;;  %v7012_v52 = vadd.f32 %v6326_v29, %v3148_v13  ;;  %v7015_v45 = vadd.f32 %v6363_v15, %v3151_v54  ;;  %v7018_v32 = vadd.f32 %v6331_v35, %v3152_v62  ;;  %v7923_v54 = vld [vmem:[#allocation25_spill] sm:$0xff] }
0x1454   :  { %7919 = vst [vmem:[#allocation83_spill] sm:$0xff] %v7009_v56  ;;  %v3409_v51 = vmax.f32 %v3309_v24, 0.0  ;;  %v7022_v18 = vmul.f32 %v6347_v55, %v3354_v5  ;;  %v3410_v36 = vmax.f32 %v3310_v49, 0.0  ;;  %v3412_v8 = vmax.f32 %v3312_v6, 0.0  ;;  %v7924_v6 = vld [vmem:[#allocation28_spill] sm:$0xff] }
0x1455   :  { %7920 = vst [vmem:[#allocation84_spill] sm:$0xff] %v7012_v52  ;;  %7921 = vst [vmem:[#allocation85_spill] sm:$0xff] %v7015_v45  ;;  %v7028_v4 = vmul.f32 %v7906_v60, %v3408_v19  ;;  %v2337_v47 = vcombine.high %v2335_v12, %v2335_v12  ;;  %v2344_v5 = vrot.slane %v2328_v3, %v6319_v1 }
0x1456   :  { %7922 = vst [vmem:[#allocation86_spill] sm:$0xff] %v7018_v32  ;;  %v7032_v24 = vmul.f32 %v6380_v0, %v3409_v51  ;;  %v2351_v49 = vrot.slane %v2335_v12, %v6319_v1  ;;  %v2358_v13 = vrot.slane %v2336_v40, %v6319_v1  ;;  %v2670_v62 = vrot.slane %v7923_v54, %v6319_v1 }
0x1457   :  { %v2370_v38 = vcombine.high %v7924_v6, %v7924_v6  ;;  %v2365_v19 = vrot.slane %v2337_v47, %v6319_v1  ;;  %v2366_v20 = vcombine.high %v2344_v5, %v2344_v5  ;;  %v3097_v31 = vadd.f32 %v6940_v58, %v2344_v5 }
0x1458   :  { %v2377_v51 = vrot.slane %v7924_v6, %v6319_v1  ;;  %v2367_v23 = vcombine.high %v2351_v49, %v2351_v49  ;;  %v2368_v3 = vcombine.high %v2358_v13, %v2358_v13  ;;  %v3098_v12 = vadd.f32 %v6428_v41, %v2358_v13 }
0x1459   :  { %v3101_v40 = vadd.f32 %v6827_v25, %v2351_v49  ;;  %v2369_v21 = vcombine.high %v2365_v19, %v2365_v19  ;;  %v3099_v54 = vadd.f32 %v6434_v42, %v2366_v20  ;;  %v3102_v32 = vadd.f32 %v6431_v26, %v2365_v19 }
0x145a   :  { %v3260_v45 = vadd.f32 %v6367_v57, %v3097_v31  ;;  %v3100_v47 = vadd.f32 %v6817_v2, %v2368_v3  ;;  %v3103_v5 = vadd.f32 %v7890_v53, %v2367_v23  ;;  %v3261_v56 = vadd.f32 %v6326_v29, %v3098_v12 }
0x145b   :  { %v3264_v6 = vadd.f32 %v6363_v15, %v3101_v40  ;;  %v3104_v52 = vadd.f32 %v6823_v44, %v2369_v21  ;;  %v3262_v13 = vadd.f32 %v6334_v33, %v3099_v54  ;;  %v7057_v25 = vadd.f32 %v6331_v35, %v3102_v32 }
0x145c   :  { %v3360_v42 = vmax.f32 %v3260_v45, 0.0  ;;  %v7060_v26 = vadd.f32 %v6355_v39, %v3100_v47  ;;  %v7063_v20 = vadd.f32 %v6337_v34, %v3103_v5  ;;  %v3361_v2 = vmax.f32 %v3261_v56, 0.0 }
0x145d   :  { %v3364_v53 = vmax.f32 %v3264_v6, 0.0  ;;  %v7066_v23 = vmul.f32 %v6384_v43, %v3410_v36  ;;  %v7069_v31 = vmul.f32 %v6347_v55, %v3412_v8  ;;  %v7072_v44 = vadd.f32 %v6359_v10, %v3104_v52 }
0x145e   :  { %v3362_v32 = vmax.f32 %v3262_v13, 0.0  ;;  %v7078_v19 = vmul.f32 %v6384_v43, %v3360_v42  ;;  %v7081_v56 = vmul.f32 %v6340_v37, %v3361_v2  ;;  %v2671_v8 = vcombine.high %v2670_v62, %v2670_v62 }
0x145f   :  { %7925 = vst [vmem:[#allocation25_spill] sm:$0xff] %v7069_v31  ;;  %v7084_v36 = vmul.f32 %v7903_v61, %v3364_v53  ;;  %v2678_v52 = vrot.slane %v2670_v62, %v6319_v1  ;;  %v2384_v12 = vrot.slane %v2370_v38, %v6319_v1  ;;  %v2385_v40 = vcombine.high %v2377_v51, %v2377_v51 }
0x1460   :  { %v2393_v54 = vrot.slane %v2377_v51, %v6319_v1  ;;  %v7091_v47 = vmul.f32 %v6347_v55, %v3362_v32  ;;  %v2685_v5 = vrot.slane %v2671_v8, %v6319_v1 }
0x1461   :  { %v2686_v6 = vcombine.high %v2678_v52, %v2678_v52  ;;  %v3153_v13 = vadd.f32 %v6862_v46, %v2678_v52  ;;  %v2386_v42 = vcombine.high %v2384_v12, %v2384_v12  ;;  %v2400_v2 = vrot.slane %v2384_v12, %v6319_v1 }
0x1462   :  { %v2407_v62 = vrot.slane %v2385_v40, %v6319_v1  ;;  %v2415_v53 = vcombine.high %v2393_v54, %v2393_v54  ;;  %v2687_v3 = vcombine.high %v2685_v5, %v2685_v5  ;;  %v3154_v38 = vadd.f32 %v6883_v22, %v2685_v5 }
0x1463   :  { %v3155_v49 = vadd.f32 %v6887_v11, %v2686_v6  ;;  %v3316_v51 = vadd.f32 %v6337_v34, %v3153_v13  ;;  %v2414_v32 = vrot.slane %v2386_v42, %v6319_v1  ;;  %v2416_v21 = vcombine.high %v2400_v2, %v2400_v2 }
0x1464   :  { %v2417_v8 = vcombine.high %v2407_v62, %v2407_v62  ;;  %v3105_v45 = vadd.f32 %v6940_v58, %v2393_v54  ;;  %v7103_v46 = vadd.f32 %v6463_v50, %v2687_v3  ;;  %v3317_v52 = vadd.f32 %v6359_v10, %v3154_v38 }
0x1465   :  { %v3318_v12 = vadd.f32 %v6367_v57, %v3155_v49  ;;  %v3416_v40 = vmax.f32 %v3316_v51, 0.0  ;;  %v2418_v31 = vcombine.high %v2414_v32, %v2414_v32  ;;  %v7108_v22 = vadd.f32 %v6428_v41, %v2407_v62 }
0x1466   :  { %v3107_v11 = vadd.f32 %v6437_v27, %v2415_v53  ;;  %v3108_v5 = vadd.f32 %v6447_v48, %v2417_v8  ;;  %v3417_v6 = vmax.f32 %v3317_v52, 0.0  ;;  %v3109_v58 = vadd.f32 %v6542_v17, %v2400_v2  ;;  %v7929_v8 = vld [vmem:[#allocation20_spill] sm:$0xff] }
0x1467   :  { %v3418_v13 = vmax.f32 %v3318_v12, 0.0  ;;  %v3294_v50 = vadd.f32 %v6326_v29, %v6770_v30  ;;  %v3110_v10 = vadd.f32 %v6550_v9, %v2414_v32  ;;  %v3111_v49 = vadd.f32 %v6440_v28, %v2416_v21 }
0x1468   :  { %v3112_v3 = vadd.f32 %v6456_v7, %v2418_v31  ;;  %v3268_v41 = vadd.f32 %v6367_v57, %v3105_v45  ;;  %v7120_v54 = vmul.f32 %v7906_v60, %v3416_v40  ;;  %v3270_v27 = vadd.f32 %v6326_v29, %v3107_v11  ;;  %v7931_v40 = vld [vmem:[#allocation21_spill] sm:$0xff] }
0x1469   :  { %v7124_v48 = vadd.f32 %v6334_v33, %v3108_v5  ;;  %v7127_v17 = vmul.f32 %v6380_v0, %v3417_v6  ;;  %v3272_v9 = vadd.f32 %v6355_v39, %v3109_v58  ;;  %v7131_v28 = vadd.f32 %v6363_v15, %v3110_v10  ;;  %v7935_v10 = vld [vmem:[#allocation27_spill] sm:$0xff] }
0x146a   :  { %v7134_v7 = vadd.f32 %v6331_v35, %v3111_v49  ;;  %v7137_v57 = vmul.f32 %v6384_v43, %v3418_v13  ;;  %v3368_v30 = vmax.f32 %v3268_v41, 0.0  ;;  %v3370_v31 = vmax.f32 %v3270_v27, 0.0  ;;  %v7933_v13 = vld [vmem:[#allocation23_spill] sm:$0xff]  ;;  %v7936_v49 = vld [vmem:[#allocation26_spill] sm:$0xff] }
0x146b   :  { %v3394_v45 = vmax.f32 %v3294_v50, 0.0  ;;  %v7140_v33 = vadd.f32 %v6337_v34, %v3112_v3  ;;  %v3371_v21 = vmax.f32 %v7124_v48, 0.0  ;;  %v3372_v42 = vmax.f32 %v3272_v9, 0.0  ;;  %v7927_v34 = vld [vmem:[#allocation22_spill] sm:$0xff]  ;;  %v7937_v9 = vld [vmem:[#allocation32_spill] sm:$0xff] }
0x146c   :  { %v3373_v39 = vmax.f32 %v7131_v28, 0.0  ;;  %v3374_v15 = vmax.f32 %v7134_v7, 0.0  ;;  %v7146_v2 = vmul.f32 %v6384_v43, %v3368_v30  ;;  %v7926_v62 = vmax.f32 %v6837_v59, 0.0  ;;  %v8042_v28 = vld [vmem:[#allocation35_spill] sm:$0xff] }
0x146d   :  { %v3557_v35 = vmul.f32 %v6340_v37, %v3394_v45  ;;  %v7153_v38 = vmul.f32 %v6340_v37, %v3370_v31  ;;  %v7928_v51 = vmax.f32 %v7927_v34, 0.0  ;;  %v7930_v52 = vmax.f32 %v7929_v8, 0.0  ;;  %v7938_v31 = vld [vmem:[#allocation40_spill] sm:$0xff] }
0x146e   :  { %v3507_v53 = vmul.f32 %v6340_v37, %v7926_v62  ;;  %v7932_v11 = vmax.f32 %v7931_v40, 0.0  ;;  %v7934_v58 = vmax.f32 %v7933_v13, 0.0  ;;  %v3683_v3 = vcombine.low %v7936_v49, %v7935_v10  ;;  %v7946_v49 = vld [vmem:[#allocation43_spill] sm:$0xff] }
0x146f   :  { %v3486_v32 = vmul.f32 %v7903_v61, %v7928_v51  ;;  %v3488_v12 = vmul.f32 %v7906_v60, %v7930_v52  ;;  %v4158_v6 = vrot.slane %v3557_v35, %v6319_v1  ;;  %v7172_v41 = vmul.f32 %v6371_v16, %v3372_v42  ;;  %v7940_v52 = vld [vmem:[#allocation38_spill] sm:$0xff] }
0x1470   :  { %v3489_v5 = vmul.f32 %v6380_v0, %v7932_v11  ;;  %v3836_v59 = vrot.slane %v3507_v53, %v6319_v1  ;;  %v3490_v50 = vmul.f32 %v6384_v43, %v7934_v58  ;;  %v7939_v45 = vmax.f32 %v7938_v31, 0.0 }
0x1471   :  { %v3684_v27 = vcombine.low %v6588_v63, %v3486_v32  ;;  %v3685_v30 = vcombine.low %v7937_v9, %v3488_v12  ;;  %v4165_v62 = vrot.slane %v4158_v6, %v6319_v1  ;;  %v3693_v51 = vrot.slane %v3683_v3, %v6319_v1  ;;  %v7942_v32 = vld [vmem:[#allocation39_spill] sm:$0xff]  ;;  %v7947_v3 = vld [vmem:[#allocation42_spill] sm:$0xff]  ;;  %v7948_v9 = vld [vmem:[#allocation45_spill] sm:$0xff] }
0x1472   :  { %v3494_v35 = vmul.f32 %v7903_v61, %v7939_v45  ;;  %v3843_v53 = vrot.slane %v3836_v59, %v6319_v1  ;;  %v3686_v34 = vcombine.low %v3489_v5, %v3490_v50  ;;  %v7941_v40 = vmax.f32 %v7940_v52, 0.0  ;;  %v7944_v59 = vld [vmem:[#allocation41_spill] sm:$0xff]  ;;  %v7949_v45 = vld [vmem:[#allocation44_spill] sm:$0xff] }
0x1473   :  { %v3700_v8 = vrot.slane %v3684_v27, %v6319_v1  ;;  %v3707_v42 = vrot.slane %v3685_v30, %v6319_v1  ;;  %v7943_v12 = vmax.f32 %v7942_v32, 0.0  ;;  %v4378_v13 = vsel %vm4353_vm4, %v4165_v62, 0.0 }
0x1474   :  { %v3496_v63 = vmul.f32 %v7906_v60, %v7941_v40  ;;  %v4354_v6 = vsel %vm4353_vm4, %v3843_v53, 0.0  ;;  %v3714_v5 = vrot.slane %v3686_v34, %v6319_v1  ;;  %v7945_v58 = vmax.f32 %v7944_v59, 0.0  ;;  %4379 = vadd.xlane.f32.xlu1 %v4378_v13  ;;  %v7950_v53 = vld [vmem:[#allocation29_spill] sm:$0xff] }
0x1475   :  { %v3497_v11 = vmul.f32 %v6380_v0, %v7943_v12  ;;  %4355 = vadd.xlane.f32.xlu0 %v4354_v6  ;;  %v3715_v10 = vcombine.low %v3693_v51, %v3700_v8  ;;  %v3732_v27 = vcombine.low %v7947_v3, %v7946_v49  ;;  %v3733_v30 = vcombine.low %v7948_v9, %v3494_v35  ;;  %v7952_v8 = vld [vmem:[#allocation30_spill] sm:$0xff]  ;;  %v7956_v59 = vld [vmem:[#allocation13_spill] sm:$0xff] }
0x1476   :  { %v3498_v50 = vmul.f32 %v6384_v43, %v7945_v58  ;;  %v3716_v31 = vcombine.low %v3707_v42, %v3714_v5  ;;  %v3734_v62 = vcombine.low %v7949_v45, %v3496_v63  ;;  %v7951_v40 = vmax.f32 %v7950_v53, 0.0 }
0x1477   :  { %v3723_v32 = vrot.slane %v3715_v10, %v6319_v1  ;;  %v3742_v12 = vrot.slane %v3732_v27, %v6319_v1  ;;  %v3749_v51 = vrot.slane %v3733_v30, %v6319_v1  ;;  %v7953_v13 = vmax.f32 %v7952_v8, 0.0  ;;  %v7957_v10 = vld [vmem:[#allocation33_spill] sm:$0xff]  ;;  %v7959_v27 = vld [vmem:[#allocation36_spill] sm:$0xff]  ;;  %v7962_v8 = vld [vmem:[#allocation50_spill] sm:$0xff] }
0x1478   :  { %v3735_v52 = vcombine.low %v3497_v11, %v3498_v50  ;;  %v3542_v34 = vmul.f32 %v6347_v55, %v7951_v40  ;;  %v3730_v35 = vrot.slane %v3716_v31, %v6319_v1  ;;  %v3756_v42 = vrot.slane %v3734_v62, %v6319_v1  ;;  %v7954_v11 = vld [vmem:[#allocation31_spill] sm:$0xff]  ;;  %v7960_v30 = vld [vmem:[#allocation37_spill] sm:$0xff] }
0x1479   :  { %v3544_v6 = vmul.f32 %v7903_v61, %v7953_v13  ;;  %v7955_v5 = vmax.f32 %v7954_v11, 0.0  ;;  %v3764_v50 = vcombine.low %v3742_v12, %v3749_v51  ;;  %v7958_v49 = vmax.f32 %v7957_v10, 0.0  ;;  %v7961_v31 = vld [vmem:[#allocation55_spill] sm:$0xff]  ;;  %v7963_v13 = vld [vmem:[#allocation48_spill] sm:$0xff] }
0x147a   :  { %v3763_v63 = vrot.slane %v3735_v52, %v6319_v1  ;;  %v4054_v9 = vcombine.low %v7959_v27, %v3542_v34  ;;  %v3731_v53 = vcombine.low %v3723_v32, %v3730_v35  ;;  %v4057_v62 = vcombine.low %v7962_v8, %v7961_v31  ;;  %v7965_v35 = vld [vmem:[#allocation46_spill] sm:$0xff]  ;;  %v7972_v8 = vld [vmem:[#allocation51_spill] sm:$0xff] }
0x147b   :  { %v3545_v58 = vmul.f32 %v7956_v59, %v7955_v5  ;;  %v3546_v3 = vmul.f32 %v7906_v60, %v7958_v49  ;;  %v4055_v45 = vcombine.low %v7960_v30, %v3544_v6  ;;  %v7964_v52 = vmax.f32 %v7963_v13, 0.0  ;;  %v7973_v13 = vld [vmem:[#allocation67_spill] sm:$0xff] }
0x147c   :  { %v3765_v40 = vcombine.low %v3756_v42, %v3763_v63  ;;  %v3772_v5 = vrot.slane %v3764_v50, %v6319_v1  ;;  %v4064_v51 = vrot.slane %v4054_v9, %v6319_v1  ;;  %v4344_v34 = vsel %vm4343_vm5, %v3731_v53, 0.0  ;;  %v7967_v50 = vld [vmem:[#allocation47_spill] sm:$0xff]  ;;  %v7969_v9 = vld [vmem:[#allocation49_spill] sm:$0xff] }
0x147d   :  { %v3550_v11 = vmul.f32 %v6347_v55, %v7964_v52  ;;  %v4056_v12 = vcombine.low %v3545_v58, %v3546_v3  ;;  %v4071_v10 = vrot.slane %v4055_v45, %v6319_v1  ;;  %v4085_v32 = vrot.slane %v4057_v62, %v6319_v1  ;;  %4345 = vadd.xlane.f32.xlu1 %v4344_v34  ;;  %v7974_v52 = vld [vmem:[#allocation66_spill] sm:$0xff] }
0x147e   :  { %v3779_v6 = vrot.slane %v3765_v40, %v6319_v1  ;;  %v7966_v42 = vmax.f32 %v7965_v35, 0.0  ;;  %v7968_v58 = vmax.f32 %v7967_v50, 0.0  ;;  %v7970_v30 = vmax.f32 %v7969_v9, 0.0  ;;  %v7971_v40 = vld [vmem:[#allocation56_spill] sm:$0xff] }
0x147f   :  { %v4078_v49 = vrot.slane %v4056_v12, %v6319_v1  ;;  %v4086_v27 = vcombine.low %v4064_v51, %v4071_v10  ;;  %v4103_v31 = vcombine.low %v7971_v40, %v3550_v11  ;;  %v4106_v35 = vcombine.low %v7974_v52, %v7973_v13  ;;  %v7975_v10 = vld [vmem:[#allocation62_spill] sm:$0xff]  ;;  %v7981_v40 = vld [vmem:[#allocation64_spill] sm:$0xff]  ;;  %v7984_v52 = vld [vmem:[#allocation19_spill] sm:$0xff] }
0x1480   :  { %v3552_v63 = vmul.f32 %v7903_v61, %v7966_v42  ;;  %v3553_v3 = vmul.f32 %v7956_v59, %v7968_v58  ;;  %v3554_v45 = vmul.f32 %v7906_v60, %v7970_v30  ;;  %v3780_v53 = vcombine.low %v3772_v5, %v3779_v6 }
0x1481   :  { %v4087_v34 = vcombine.low %v4078_v49, %v4085_v32  ;;  %v4094_v12 = vrot.slane %v4086_v27, %v6319_v1  ;;  %v7976_v42 = vmax.f32 %v7975_v10, 0.0  ;;  %v4113_v9 = vrot.slane %v4103_v31, %v6319_v1 }
0x1482   :  { %v4104_v62 = vcombine.low %v7972_v8, %v3552_v63  ;;  %v4105_v51 = vcombine.low %v3553_v3, %v3554_v45  ;;  %v4347_v58 = vsel %vm4343_vm5, %v3780_v53, 0.0  ;;  %v4134_v11 = vrot.slane %v4106_v35, %v6319_v1  ;;  %v7977_v63 = vld [vmem:[#allocation61_spill] sm:$0xff]  ;;  %v7979_v3 = vld [vmem:[#allocation63_spill] sm:$0xff]  ;;  %v7985_v35 = vld [vmem:[#allocation76_spill] sm:$0xff] }
0x1483   :  { %v3558_v50 = vmul.f32 %v6340_v37, %v7976_v42  ;;  %4348 = vadd.xlane.f32.xlu0 %v4347_v58  ;;  %v4101_v6 = vrot.slane %v4087_v34, %v6319_v1  ;;  %v7978_v49 = vmax.f32 %v7977_v63, 0.0  ;;  %v7980_v30 = vmax.f32 %v7979_v3, 0.0  ;;  %v7986_v58 = vld [vmem:[#allocation54_spill] sm:$0xff] }
0x1484   :  { %v4120_v5 = vrot.slane %v4104_v62, %v6319_v1  ;;  %v4127_v32 = vrot.slane %v4105_v51, %v6319_v1  ;;  %v7982_v31 = vmax.f32 %v7981_v40, 0.0  ;;  %v7983_v62 = vld [vmem:[#allocation68_spill] sm:$0xff]  ;;  %v4169_v34 = vcombine.low %v7985_v35, %v7984_v52  ;;  %v7995_v35 = vld [vmem:[#allocation59_spill] sm:$0xff] }
0x1485   :  { %v3560_v27 = vmul.f32 %v6371_v16, %v7978_v49  ;;  %v3561_v45 = vmul.f32 %v7903_v61, %v7980_v30  ;;  %v4166_v13 = vcombine.low %v3558_v50, %v7983_v62  ;;  %v4102_v10 = vcombine.low %v4094_v12, %v4101_v6  ;;  %v7988_v30 = vld [vmem:[#allocation14_spill] sm:$0xff]  ;;  %v7993_v62 = vld [vmem:[#allocation57_spill] sm:$0xff] }
0x1486   :  { %v4135_v53 = vcombine.low %v4113_v9, %v4120_v5  ;;  %v3562_v8 = vmul.f32 %v7956_v59, %v7982_v31  ;;  %v4136_v51 = vcombine.low %v4127_v32, %v4134_v11  ;;  %v7987_v63 = vmax.f32 %v7986_v58, 0.0  ;;  %v7989_v11 = vld [vmem:[#allocation52_spill] sm:$0xff]  ;;  %v7997_v58 = vld [vmem:[#allocation65_spill] sm:$0xff] }
0x1487   :  { %v4167_v42 = vcombine.low %v3560_v27, %v3561_v45  ;;  %v4176_v5 = vrot.slane %v4166_v13, %v6319_v1  ;;  %v4197_v40 = vrot.slane %v4169_v34, %v6319_v1  ;;  %v4372_v50 = vsel %vm4343_vm5, %v4102_v10, 0.0  ;;  %v7991_v45 = vld [vmem:[#allocation53_spill] sm:$0xff]  ;;  %v7996_v34 = vld [vmem:[#allocation58_spill] sm:$0xff] }
0x1488   :  { %v3502_v49 = vmul.f32 %v7903_v61, %v7987_v63  ;;  %v4143_v3 = vrot.slane %v4135_v53, %v6319_v1  ;;  %v4168_v9 = vcombine.low %v3562_v8, %v7988_v30  ;;  %v4150_v31 = vrot.slane %v4136_v51, %v6319_v1  ;;  %4373 = vadd.xlane.f32.xlu1 %v4372_v50  ;;  %v7998_v30 = vld [vmem:[#allocation60_spill] sm:$0xff] }
0x1489   :  { %v4183_v12 = vrot.slane %v4167_v42, %v6319_v1  ;;  %v7990_v6 = vmax.f32 %v7989_v11, 0.0  ;;  %v7992_v53 = vmax.f32 %v7991_v45, 0.0  ;;  %v7994_v13 = vmax.f32 %v7993_v62, 0.0 }
0x148a   :  { %v4190_v27 = vrot.slane %v4168_v9, %v6319_v1  ;;  %v3781_v10 = vcombine.low %v7996_v34, %v7995_v35  ;;  %v4151_v51 = vcombine.low %v4143_v3, %v4150_v31  ;;  %v3782_v63 = vcombine.low %v7997_v58, %v3502_v49  ;;  %v7999_v31 = vld [vmem:[#allocation16_spill] sm:$0xff] }
0x148b   :  { %v3504_v32 = vmul.f32 %v7906_v60, %v7990_v6  ;;  %v3505_v8 = vmul.f32 %v6380_v0, %v7992_v53  ;;  %v3506_v52 = vmul.f32 %v6384_v43, %v7994_v13  ;;  %v4198_v42 = vcombine.low %v4176_v5, %v4183_v12 }
0x148c   :  { %v4199_v50 = vcombine.low %v4190_v27, %v4197_v40  ;;  %v3791_v9 = vrot.slane %v3781_v10, %v6319_v1  ;;  %v3269_v45 = vadd.f32 %v6326_v29, %v7108_v22  ;;  %v4375_v53 = vsel %vm4343_vm5, %v4151_v51, 0.0  ;;  %v8001_v22 = vld [vmem:[#allocation69_spill] sm:$0xff] }
0x148d   :  { %v3783_v11 = vcombine.low %v7998_v30, %v3504_v32  ;;  %v3784_v6 = vcombine.low %v3505_v8, %v3506_v52  ;;  %v4206_v43 = vrot.slane %v4198_v42, %v6319_v1  ;;  %v3798_v62 = vrot.slane %v3782_v63, %v6319_v1  ;;  %4376 = vadd.xlane.f32.xlu0 %v4375_v53  ;;  %v8003_v52 = vld [vmem:[#allocation70_spill] sm:$0xff]  ;;  %v8005_v10 = vld [vmem:[#allocation17_spill] sm:$0xff] }
0x148e   :  { %v4213_v49 = vrot.slane %v4199_v50, %v6319_v1  ;;  %v3369_v40 = vmax.f32 %v3269_v45, 0.0  ;;  %v8000_v12 = vmax.f32 %v7999_v31, 0.0  ;;  %v8002_v8 = vmax.f32 %v8001_v22, 0.0  ;;  %v8008_v50 = vld [vmem:[#allocation71_spill] sm:$0xff]  ;;  %v8010_v31 = vld [vmem:[#allocation24_spill] sm:$0xff] }
0x148f   :  { %v3805_v3 = vrot.slane %v3783_v11, %v6319_v1  ;;  %v3812_v5 = vrot.slane %v3784_v6, %v6319_v1  ;;  %v3813_v27 = vcombine.low %v3791_v9, %v3798_v62  ;;  %v8004_v35 = vmax.f32 %v8003_v52, 0.0  ;;  %v8007_v11 = vld [vmem:[#allocation72_spill] sm:$0xff]  ;;  %v8009_v45 = vld [vmem:[#allocation15_spill] sm:$0xff] }
0x1490   :  { %v3510_v32 = vmul.f32 %v6371_v16, %v8000_v12  ;;  %v3512_v13 = vmul.f32 %v7956_v59, %v8002_v8  ;;  %v8006_v51 = vmax.f32 %v8005_v10, 0.0  ;;  %v4214_v58 = vcombine.low %v4206_v43, %v4213_v49 }
0x1491   :  { %v3513_v34 = vmul.f32 %v7906_v60, %v8004_v35  ;;  %v3814_v63 = vcombine.low %v3805_v3, %v3812_v5  ;;  %v3532_v30 = vmul.f32 %v6340_v37, %v3369_v40  ;;  %v3844_v6 = vcombine.low %v8008_v50, %v8007_v11  ;;  %v8011_v40 = vld [vmem:[#allocation80_spill] sm:$0xff] }
0x1492   :  { %v3514_v42 = vmul.f32 %v6380_v0, %v8006_v51  ;;  %v3821_v9 = vrot.slane %v3813_v27, %v6319_v1  ;;  %v3845_v53 = vcombine.low %v3510_v32, %v8009_v45  ;;  %v4381_v22 = vsel %vm4343_vm5, %v4214_v58, 0.0  ;;  %v8018_v45 = vld [vmem:[#allocation82_spill] sm:$0xff] }
0x1493   :  { %v3846_v62 = vcombine.low %v3512_v13, %v3513_v34  ;;  %v3828_v8 = vrot.slane %v3814_v63, %v6319_v1  ;;  %v3997_v52 = vrot.slane %v3532_v30, %v6319_v1  ;;  %v3854_v43 = vrot.slane %v3844_v6, %v6319_v1  ;;  %4382 = vadd.xlane.f32.xlu1 %v4381_v22  ;;  %v8013_v34 = vld [vmem:[#allocation78_spill] sm:$0xff] }
0x1494   :  { %v3847_v12 = vcombine.low %v3514_v42, %v8010_v31  ;;  %v3861_v3 = vrot.slane %v3845_v53, %v6319_v1  ;;  %v8012_v32 = vmax.f32 %v8011_v40, 0.0  ;;  %v8014_v10 = vmax.f32 %v8013_v34, 0.0  ;;  %v8015_v42 = vld [vmem:[#allocation79_spill] sm:$0xff]  ;;  %v8019_v31 = vld [vmem:[#allocation81_spill] sm:$0xff] }
0x1495   :  { %v3868_v49 = vrot.slane %v3846_v62, %v6319_v1  ;;  %v3829_v13 = vcombine.low %v3821_v9, %v3828_v8  ;;  %v4004_v35 = vrot.slane %v3997_v52, %v6319_v1  ;;  %v8016_v58 = vmax.f32 %v8015_v42, 0.0 }
0x1496   :  { %v3875_v5 = vrot.slane %v3847_v12, %v6319_v1  ;;  %v3518_v27 = vmul.f32 %v6371_v16, %v8012_v32  ;;  %v3520_v51 = vmul.f32 %v7956_v59, %v8014_v10  ;;  %v3876_v30 = vcombine.low %v3854_v43, %v3861_v3 }
0x1497   :  { %v3521_v63 = vmul.f32 %v7906_v60, %v8016_v58  ;;  %v8017_v50 = vmax.f32 %v6977_v14, 0.0  ;;  %v3893_v53 = vcombine.low %v8018_v45, %v7022_v18  ;;  %v4350_v9 = vsel %vm4343_vm5, %v3829_v13, 0.0 }
0x1498   :  { %v3877_v11 = vcombine.low %v3868_v49, %v3875_v5  ;;  %v4366_v62 = vsel %vm4353_vm4, %v4004_v35, 0.0  ;;  %v3894_v12 = vcombine.low %v3518_v27, %v8019_v31  ;;  %v3375_v8 = vmax.f32 %v7140_v33, 0.0  ;;  %4351 = vadd.xlane.f32.xlu0 %v4350_v9  ;;  %v8020_v5 = vld [vmem:[#allocation73_spill] sm:$0xff]  ;;  %v8022_v35 = vld [vmem:[#allocation18_spill] sm:$0xff] }
0x1499   :  { %v3522_v6 = vmul.f32 %v6380_v0, %v8017_v50  ;;  %v3895_v22 = vcombine.low %v3520_v51, %v3521_v63  ;;  %4367 = vadd.xlane.f32.xlu1 %v4366_v62  ;;  %v3884_v52 = vrot.slane %v3876_v30, %v6319_v1  ;;  %v3903_v3 = vrot.slane %v3893_v53, %v6319_v1  ;;  %v8024_v51 = vld [vmem:[#allocation74_spill] sm:$0xff]  ;;  %v8026_v63 = vld [vmem:[#allocation75_spill] sm:$0xff]  ;;  %v8028_v50 = vld [vmem:[#allocation77_spill] sm:$0xff] }
0x149a   :  { %v3891_v14 = vrot.slane %v3877_v11, %v6319_v1  ;;  %v3910_v18 = vrot.slane %v3894_v12, %v6319_v1  ;;  %v8021_v40 = vmax.f32 %v8020_v5, 0.0  ;;  %v8023_v34 = vmax.f32 %v8022_v35, 0.0 }
0x149b   :  { %v3896_v43 = vcombine.low %v3522_v6, %v7078_v19  ;;  %v3917_v49 = vrot.slane %v3895_v22, %v6319_v1  ;;  %v8025_v42 = vmax.f32 %v8024_v51, 0.0  ;;  %v8027_v30 = vmax.f32 %v8026_v63, 0.0 }
0x149c   :  { %v3566_v32 = vmul.f32 %v6340_v37, %v8021_v40  ;;  %v3892_v27 = vcombine.low %v3884_v52, %v3891_v14  ;;  %v3568_v10 = vmul.f32 %v6371_v16, %v8023_v34  ;;  %v3925_v58 = vcombine.low %v3903_v3, %v3910_v18  ;;  %v8033_v34 = vld [vmem:[#allocation84_spill] sm:$0xff] }
0x149d   :  { %v3924_v13 = vrot.slane %v3896_v43, %v6319_v1  ;;  %v3569_v19 = vmul.f32 %v7903_v61, %v8025_v42  ;;  %v3570_v11 = vmul.f32 %v7956_v59, %v8027_v30  ;;  %v4218_v45 = vcombine.low %v7032_v24, %v7066_v23 }
0x149e   :  { %v4215_v6 = vcombine.low %v3566_v32, %v8028_v50  ;;  %v4357_v53 = vsel %vm4343_vm5, %v3892_v27, 0.0  ;;  %v8029_v31 = vmax.f32 %v7060_v26, 0.0  ;;  %v3933_v22 = vrot.slane %v3925_v58, %v6319_v1  ;;  %v8037_v50 = vld [vmem:[#allocation85_spill] sm:$0xff] }
0x149f   :  { %v3926_v9 = vcombine.low %v3917_v49, %v3924_v13  ;;  %v4216_v62 = vcombine.low %v3568_v10, %v3569_v19  ;;  %4358 = vadd.xlane.f32.xlu0 %v4357_v53  ;;  %v4217_v52 = vcombine.low %v3570_v11, %v7028_v4  ;;  %v4246_v43 = vrot.slane %v4218_v45, %v6319_v1  ;;  %v8039_v53 = vld [vmem:[#allocation86_spill] sm:$0xff] }
0x14a0   :  { %v3526_v12 = vmul.f32 %v6371_v16, %v8029_v31  ;;  %v4225_v14 = vrot.slane %v4215_v6, %v6319_v1  ;;  %v8030_v23 = vmax.f32 %v7057_v25, 0.0  ;;  %v8031_v26 = vmax.f32 %v7063_v20, 0.0  ;;  %v8041_v31 = vld [vmem:[#allocation25_spill] sm:$0xff] }
0x14a1   :  { %v3940_v3 = vrot.slane %v3926_v9, %v6319_v1  ;;  %v4232_v24 = vrot.slane %v4216_v62, %v6319_v1  ;;  %v4239_v5 = vrot.slane %v4217_v52, %v6319_v1  ;;  %v8032_v4 = vmax.f32 %v7072_v44, 0.0 }
0x14a2   :  { %v3528_v18 = vmul.f32 %v7956_v59, %v8030_v23  ;;  %v3529_v49 = vmul.f32 %v7906_v60, %v8031_v26  ;;  %v3942_v32 = vcombine.low %v7081_v56, %v7091_v47  ;;  %v3943_v27 = vcombine.low %v3526_v12, %v7084_v36  ;;  %v8035_v47 = vld [vmem:[#allocation83_spill] sm:$0xff] }
0x14a3   :  { %v3530_v40 = vmul.f32 %v6380_v0, %v8032_v4  ;;  %v3941_v13 = vcombine.low %v3933_v22, %v3940_v3  ;;  %v4247_v35 = vcombine.low %v4225_v14, %v4232_v24  ;;  %v8034_v10 = vmax.f32 %v8033_v34, 0.0 }
0x14a4   :  { %v3944_v25 = vcombine.low %v3528_v18, %v3529_v49  ;;  %v4248_v51 = vcombine.low %v4239_v5, %v4246_v43  ;;  %v3952_v19 = vrot.slane %v3942_v32, %v6319_v1  ;;  %v3959_v44 = vrot.slane %v3943_v27, %v6319_v1 }
0x14a5   :  { %v3574_v20 = vmul.f32 %v6340_v37, %v8034_v10  ;;  %v3945_v42 = vcombine.low %v3530_v40, %v7146_v2  ;;  %v4360_v0 = vsel %vm4343_vm5, %v3941_v13, 0.0  ;;  %v4255_v56 = vrot.slane %v4247_v35, %v6319_v1  ;;  %v8043_v13 = vld [vmem:[#allocation34_spill] sm:$0xff]  ;;  %v8044_v10 = vld [vmem:[#allocation12_spill] sm:$0xff] }
0x14a6   :  { %v3966_v36 = vrot.slane %v3944_v25, %v6319_v1  ;;  %v8036_v58 = vmax.f32 %v8035_v47, 0.0  ;;  %4361 = vadd.xlane.f32.xlu1 %v4360_v0  ;;  %v4262_v30 = vrot.slane %v4248_v51, %v6319_v1  ;;  %v3974_v2 = vcombine.low %v3952_v19, %v3959_v44 }
0x14a7   :  { %v3973_v11 = vrot.slane %v3945_v42, %v6319_v1  ;;  %v8038_v6 = vmax.f32 %v8037_v50, 0.0  ;;  %v8040_v9 = vmax.f32 %v8039_v53, 0.0  ;;  %v4264_v12 = vcombine.low %v3574_v20, %v8041_v31 }
0x14a8   :  { %v3576_v63 = vmul.f32 %v6371_v16, %v8036_v58  ;;  %v4267_v22 = vcombine.low %v7127_v17, %v7137_v57  ;;  %v3319_v16 = vadd.f32 %v6326_v29, %v7103_v46  ;;  %v4263_v52 = vcombine.low %v4255_v56, %v4262_v30 }
0x14a9   :  { %v3577_v45 = vmul.f32 %v7903_v61, %v8038_v6  ;;  %v3578_v62 = vmul.f32 %v7956_v59, %v8040_v9  ;;  %v3975_v14 = vcombine.low %v3966_v36, %v3973_v11  ;;  %v3982_v43 = vrot.slane %v3974_v2, %v6319_v1 }
0x14aa   :  { %v4274_v23 = vrot.slane %v4264_v12, %v6319_v1  ;;  %v4295_v18 = vrot.slane %v4267_v22, %v6319_v1  ;;  %v3419_v26 = vmax.f32 %v3319_v16, 0.0  ;;  %v4384_v49 = vsel %vm4343_vm5, %v4263_v52, 0.0 }
0x14ab   :  { %v4265_v3 = vcombine.low %v3576_v63, %v3577_v45  ;;  %v4266_v24 = vcombine.low %v3578_v62, %v7120_v54  ;;  %v3989_v5 = vrot.slane %v3975_v14, %v6319_v1  ;;  %v3534_v29 = vmul.f32 %v6347_v55, %v3371_v21  ;;  %4385 = vadd.xlane.f32.xlu0 %v4384_v49  ;;  %v5026_v63 = vld [vmem:[#allocation2] ss:$0 sm:$0xff] }
0x14ac   :  { %v3582_v54 = vmul.f32 %v6340_v37, %v3419_v26  ;;  %v3536_v57 = vmul.f32 %v7903_v61, %v3373_v39  ;;  %v3537_v4 = vmul.f32 %v7956_v59, %v3374_v15  ;;  %v3538_v48 = vmul.f32 %v7906_v60, %v3375_v8  ;;  %v5007_v59 = vld [vmem:[#allocation3] ss:$0 sm:$0xff] }
0x14ad   :  { %v4281_v17 = vrot.slane %v4265_v3, %v6319_v1  ;;  %v4288_v46 = vrot.slane %v4266_v24, %v6319_v1  ;;  %v3990_v40 = vcombine.low %v3982_v43, %v3989_v5  ;;  %v4005_v55 = vcombine.low %v7153_v38, %v3534_v29 }
0x14ae   :  { %v4319_v27 = vrot.slane %v3582_v54, %v6319_v1  ;;  %v4006_v37 = vcombine.low %v7172_v41, %v3536_v57  ;;  %v4008_v61 = vcombine.low %v8043_v13, %v8042_v28  ;;  %v4007_v39 = vcombine.low %v3537_v4, %v3538_v48 }
0x14af   :  { %v4296_v32 = vcombine.low %v4274_v23, %v4281_v17  ;;  %v4297_v21 = vcombine.low %v4288_v46, %v4295_v18  ;;  %v4363_v7 = vsel %vm4343_vm5, %v3990_v40, 0.0  ;;  %v4015_v15 = vrot.slane %v4005_v55, %v6319_v1  ;;  %v8046_v17 = vld [vmem:[#allocation9_spill] sm:$0xff] }
0x14b0   :  { %4364 = vadd.xlane.f32.xlu1 %v4363_v7  ;;  %v4326_v38 = vrot.slane %v4319_v27, %v6319_v1  ;;  %v4022_v8 = vrot.slane %v4006_v37, %v6319_v1  ;;  %v4029_v41 = vrot.slane %v4007_v39, %v6319_v1  ;;  %v4036_v35 = vrot.slane %v4008_v61, %v6319_v1 }
0x14b1   :  { %v4304_v33 = vrot.slane %v4296_v32, %v6319_v1  ;;  %v4311_v60 = vrot.slane %v4297_v21, %v6319_v1  ;;  %v7449_v20 = vadd.f32 %v5007_v59, %v8044_v10  ;;  %v8045_v3 = vlaneseq }
0x14b2   :  { %v4037_v34 = vcombine.low %v4015_v15, %v4022_v8  ;;  %v4390_v51 = vsel %vm4353_vm4, %v4326_v38, 0.0  ;;  %v4038_v42 = vcombine.low %v4029_v41, %v4036_v35  ;;  %vm4936_vm4 = vcmask 48128  }
0x14b3   :  { %v4312_v25 = vcombine.low %v4304_v33, %v4311_v60  ;;  %v1719_v36 = vsel %vm1718_vm6, %v7449_v20, -inf  ;;  %v1731_v58 = vsel %vm1730_vm7, %v7449_v20, -inf  ;;  %v7461_v24 = vand.u32 127, %v8045_v3 }
0x14b4   :  { %4391 = vadd.xlane.f32.xlu1 %v4390_v51  ;;  %v4045_v44 = vrot.slane %v4037_v34, %v6319_v1  ;;  %v4052_v0 = vrot.slane %v4038_v42, %v6319_v1  ;;  %vm4864_vm7 = vcmask 531912  }
0x14b5   :  { %v4387_v19 = vsel %vm4343_vm5, %v4312_v25, 0.0  ;;  %v4441_v26 = vadd.s32 4294967288, %v7461_v24  ;;  %v4448_v49 = vadd.s32 4294967280, %v7461_v24  ;;  %v4455_v5 = vadd.s32 4294967272, %v7461_v24 }
0x14b6   :  { %4388 = vadd.xlane.f32.xlu0 %v4387_v19  ;;  %v4053_v56 = vcombine.low %v4045_v44, %v4052_v0  ;;  %v7468_v29 = vsub.s32 %v7461_v24, %v8046_v17 }
0x14b7   :  { %v7471_v54 = vsub.s32 %v4441_v26, %v8046_v17  ;;  %v7474_v57 = vsub.s32 %v4448_v49, %v8046_v17  ;;  %v7477_v4 = vsub.s32 %v4455_v5, %v8046_v17  ;;  %v1747_v49 = vsel %vm1746_vm15, %v7449_v20, -inf }
0x14b8   :  { %1720 = vmax.xlane.f32.xlu1 %v1719_v36  ;;  %v4369_v47 = vsel %vm4343_vm5, %v4053_v56, 0.0  ;;  %v1764_v5 = vsel %vm1763_vm0, %v7449_v20, -inf  ;;  %vm1791_vm5 = vcmask 60416   ;;  %vm4944_vm15 = vcmask 539648  }
0x14ba   :  { %4370 = vadd.xlane.f32.xlu0 %v4369_v47 }
0x14bc   :  { %1732 = vmax.xlane.f32.xlu1 %v1731_v58 }
0x14d0   :  { %4400 = vperm.xlu0 %5449, %v5026_v63  }
0x1501   :  { %v4380_v30 = vpop.xlane.xlu1 %4379 }
0x1502   :  { %v4356_v2 = vpop.xlane.xlu0 %4355 }
0x150a   :  { %v4346_v11 = vpop.xlane.xlu1 %4345 }
0x1510   :  { %v4349_v6 = vpop.xlane.xlu0 %4348 }
0x1515   :  { %v4374_v50 = vpop.xlane.xlu1 %4373 }
0x151a   :  { %v4377_v45 = vpop.xlane.xlu0 %4376 }
0x1520   :  { %v4383_v1 = vpop.xlane.xlu1 %4382 }
0x1525   :  { %v4352_v9 = vpop.xlane.xlu0 %4351 }
0x1526   :  { %v4368_v53 = vpop.xlane.xlu1 %4367 }
0x152c   :  { %v4359_v31 = vpop.xlane.xlu0 %4358 }
0x1533   :  { %v4362_v62 = vpop.xlane.xlu1 %4361 }
0x1538   :  { %v4386_v22 = vpop.xlane.xlu0 %4385 }
0x153d   :  { %v4365_v12 = vpop.xlane.xlu1 %4364 }
0x1541   :  { %v4392_v16 = vpop.xlane.xlu1 %4391 }
0x1543   :  { %v4389_v52 = vpop.xlane.xlu0 %4388 }
0x1545   :  { %v1721_v14 = vpop.xlane.xlu1 %1720 }
0x1546   :  { %v1722_v43 = vsub.f32 %v7449_v20, %v1721_v14 }
0x1547   :  { %v4371_v18 = vpop.xlane.xlu0 %4370 }
0x1548   :  { %v1723_v23 = vmul.f32 1.442695, %v1722_v43 }
0x154a   :  { %5546 = vpow2.f32 %v1723_v23 }
0x154f   :  { %v4401_v46 = vpop.permute.xlu0 %4400 }
0x1550   :  { %v7479_v40 = vadd.f32 %v4401_v46, %v4346_v11  ;;  %v7481_v32 = vadd.f32 %v4401_v46, %v4349_v6  ;;  %v7483_v48 = vadd.f32 %v4401_v46, %v4352_v9  ;;  %v7485_v55 = vadd.f32 %v4401_v46, %v4356_v2 }
0x1551   :  { %v7487_v21 = vadd.f32 %v4401_v46, %v4359_v31  ;;  %v7489_v27 = vadd.f32 %v4401_v46, %v4362_v62  ;;  %v7491_v37 = vadd.f32 %v4401_v46, %v4365_v12  ;;  %v7493_v28 = vadd.f32 %v4401_v46, %v4368_v53  ;;  %v1733_v31 = vpop.xlane.xlu1 %1732 }
0x1552   :  { %v7495_v13 = vadd.f32 %v4401_v46, %v4371_v18  ;;  %v7497_v61 = vadd.f32 %v4401_v46, %v4374_v50  ;;  %v7499_v7 = vadd.f32 %v4401_v46, %v4377_v45  ;;  %v7501_v39 = vadd.f32 %v4401_v46, %v4380_v30 }
0x1553   :  { %v7503_v15 = vadd.f32 %v4401_v46, %v4383_v1  ;;  %v7505_v59 = vadd.f32 %v4401_v46, %v4386_v22  ;;  %v7507_v33 = vadd.f32 %v4401_v46, %v4389_v52  ;;  %v7509_v60 = vadd.f32 %v4401_v46, %v4392_v16 }
0x1554   :  { %v7511_v38 = vpop.eup %5546  ;;  %v4440_v8 = vrot.slane %v7479_v40, %v7468_v29  ;;  %v4445_v41 = vrot.slane %v7481_v32, %v7471_v54  ;;  %v4452_v35 = vrot.slane %v7483_v48, %v7474_v57  ;;  %v4459_v25 = vrot.slane %v7485_v55, %v7477_v4 }
0x1555   :  { %v1725_v34 = vsel %vm1718_vm6, %v7511_v38, 0.0  ;;  %v4465_v10 = vrot.slane %v7487_v21, %v7468_v29  ;;  %v4469_v51 = vrot.slane %v7489_v27, %v7471_v54  ;;  %v4474_v42 = vrot.slane %v7491_v37, %v7474_v57 }
0x1556   :  { %1726 = vadd.xlane.f32.xlu1 %v1725_v34  ;;  %v4447_v19 = vsel %vm4446_vm8, %v4445_v41, %v4440_v8  ;;  %v4479_v44 = vrot.slane %v7493_v28, %v7477_v4  ;;  %v4484_v0 = vrot.slane %v7495_v13, %v7468_v29  ;;  %v4488_v56 = vrot.slane %v7497_v61, %v7471_v54 }
0x1557   :  { %v4454_v36 = vsel %vm4453_vm9, %v4452_v35, %v4447_v19  ;;  %v4470_v47 = vsel %vm4446_vm8, %v4469_v51, %v4465_v10  ;;  %v4493_v58 = vrot.slane %v7499_v7, %v7474_v57  ;;  %v4498_v63 = vrot.slane %v7501_v39, %v7477_v4  ;;  %v8047_v51 = vld [vmem:[#allocation11_spill] sm:$0xff] }
0x1558   :  { %v4461_v30 = vsel %vm4460_vm10, %v4459_v25, %v4454_v36  ;;  %v4475_v11 = vsel %vm4453_vm9, %v4474_v42, %v4470_v47  ;;  %v4489_v2 = vsel %vm4446_vm8, %v4488_v56, %v4484_v0  ;;  %v4503_v50 = vrot.slane %v7503_v15, %v7468_v29 }
0x1559   :  { %v4480_v6 = vsel %vm4460_vm10, %v4479_v44, %v4475_v11  ;;  %v4494_v1 = vsel %vm4453_vm9, %v4493_v58, %v4489_v2  ;;  %v4507_v45 = vrot.slane %v7505_v59, %v7471_v54  ;;  %v4512_v53 = vrot.slane %v7507_v33, %v7474_v57  ;;  %v8048_v44 = vld [vmem:[#allocation10_spill] sm:$0xff] }
0x155a   :  { %v4499_v9 = vsel %vm4460_vm10, %v4498_v63, %v4494_v1  ;;  %v4520_v62 = vsel %vm4519_vm11, %v4480_v6, %v4461_v30  ;;  %v4517_v22 = vrot.slane %v7509_v60, %v7477_v4  ;;  %v1734_v43 = vsub.f32 %v7449_v20, %v1733_v31 }
0x155b   :  { %v4508_v12 = vsel %vm4446_vm8, %v4507_v45, %v4503_v50  ;;  %v4522_v16 = vsel %vm4521_vm12, %v4499_v9, %v4520_v62  ;;  %v4540_v30 = vsub.s32 2, %v8046_v17  ;;  %v1781_v62 = vsel %vm1780_vm1, %v7449_v20, -inf }
0x155c   :  { %v4513_v52 = vsel %vm4453_vm9, %v4512_v53, %v4508_v12  ;;  %v1735_v18 = vmul.f32 1.442695, %v1734_v43 }
0x155d   :  { %v4518_v14 = vsel %vm4460_vm10, %v4517_v22, %v4513_v52 }
0x155e   :  { %v4524_v3 = vsel %vm4523_vm13, %v4518_v14, %v4522_v16  ;;  %5548 = vpow2.f32 %v1735_v18 }
0x155f   :  { %v4526_v23 = vsel %vm1774_vm14, %v4524_v3, -inf  ;;  %v4544_v3 = vsub.s32 3, %v8046_v17 }
0x1560   :  { %4527 = vmax.xlane.f32.xlu1 %v4526_v23 }
0x1568   :  { %v7564_v26 = vpop.eup %5548 }
0x1571   :  { %1738 = vrot.lane.b32.xlu1 %v7564_v26, %s5655_s7 }
0x1595   :  { %1748 = vmax.xlane.f32.xlu1 %v1747_v49 }
0x1599   :  { %1765 = vmax.xlane.f32.xlu1 %v1764_v5 }
0x15e3   :  { %v7569_v46 = vpop.xlane.xlu1 %1726 }
0x15ed   :  { %v4528_v8 = vpop.xlane.xlu1 %4527 }
0x15ee   :  { %v4533_v42 = vrot.slane %v4528_v8, %v8047_v51  ;;  %v4537_v0 = vrot.slane %v4528_v8, %v8048_v44  ;;  %v4541_v50 = vrot.slane %v4528_v8, %v4540_v30  ;;  %v4545_v49 = vrot.slane %v4528_v8, %v4544_v3 }
0x15f0   :  { %v4550_v56 = vsub.f32 %v7479_v40, %v4533_v42  ;;  %v4554_v36 = vsub.f32 %v7487_v21, %v4537_v0  ;;  %v4555_v58 = vsub.f32 %v7489_v27, %v4537_v0  ;;  %v4552_v11 = vsub.f32 %v7483_v48, %v4533_v42 }
0x15f1   :  { %v1739_v41 = vpop.permute.xlu1 %1738  ;;  %v4556_v6 = vsub.f32 %v7491_v37, %v4537_v0  ;;  %v4558_v21 = vsub.f32 %v7495_v13, %v4541_v50  ;;  %v4551_v31 = vsub.f32 %v7481_v32, %v4533_v42  ;;  %v4559_v16 = vsub.f32 %v7497_v61, %v4541_v50 }
0x15f2   :  { %v1741_v19 = vsel %vm1718_vm6, %v1739_v41, 0.0  ;;  %v4566_v47 = vmul.f32 1.442695, %v4550_v56  ;;  %v4574_v63 = vmul.f32 1.442695, %v4554_v36  ;;  %v4553_v14 = vsub.f32 %v7485_v55, %v4533_v42 }
0x15f3   :  { %v4576_v2 = vmul.f32 1.442695, %v4555_v58  ;;  %v4570_v1 = vmul.f32 1.442695, %v4552_v11  ;;  %v4578_v27 = vmul.f32 1.442695, %v4556_v6  ;;  %v4557_v23 = vsub.f32 %v7493_v28, %v4537_v0 }
0x15f4   :  { %v4582_v48 = vmul.f32 1.442695, %v4558_v21  ;;  %v4568_v52 = vmul.f32 1.442695, %v4551_v31  ;;  %v4584_v43 = vmul.f32 1.442695, %v4559_v16  ;;  %v4560_v32 = vsub.f32 %v7499_v7, %v4541_v50 }
0x15f5   :  { %v4572_v18 = vmul.f32 1.442695, %v4553_v14  ;;  %v4580_v5 = vmul.f32 1.442695, %v4557_v23  ;;  %v4562_v55 = vsub.f32 %v7503_v15, %v4545_v49  ;;  %v4563_v28 = vsub.f32 %v7505_v59, %v4545_v49 }
0x15f6   :  { %v4586_v61 = vmul.f32 1.442695, %v4560_v32  ;;  %v4561_v7 = vsub.f32 %v7501_v39, %v4541_v50  ;;  %v4564_v15 = vsub.f32 %v7507_v33, %v4545_v49  ;;  %v4565_v59 = vsub.f32 %v7509_v60, %v4545_v49 }
0x15f7   :  { %v4590_v8 = vmul.f32 1.442695, %v4562_v55  ;;  %vm4857_vm6 = vcmask 466312  }
0x15f8   :  { %v4594_v56 = vmul.f32 1.442695, %v4564_v15 }
0x1622   :  { %v1749_v35 = vpop.xlane.xlu1 %1748 }
0x1623   :  { %v1750_v25 = vsub.f32 %v7449_v20, %v1749_v35 }
0x1625   :  { %v1751_v34 = vmul.f32 1.442695, %v1750_v25 }
0x1626   :  { %v1766_v36 = vpop.xlane.xlu1 %1765 }
0x1627   :  { %5550 = vpow2.f32 %v1751_v34  ;;  %v4592_v34 = vmul.f32 1.442695, %v4563_v28  ;;  %v1767_v58 = vsub.f32 %v7449_v20, %v1766_v36 }
0x1628   :  { %5552 = vpow2.f32 %v4566_v47  ;;  %v4596_v47 = vmul.f32 1.442695, %v4565_v59 }
0x1629   :  { %5554 = vpow2.f32 %v4574_v63  ;;  %v1768_v63 = vmul.f32 1.442695, %v1767_v58 }
0x162a   :  { %5556 = vpow2.f32 %v4576_v2 }
0x162b   :  { %5558 = vpow2.f32 %v4570_v1 }
0x162c   :  { %5560 = vpow2.f32 %v4578_v27 }
0x162d   :  { %5562 = vpow2.f32 %v4582_v48 }
0x162e   :  { %5564 = vpow2.f32 %v4568_v52 }
0x162f   :  { %5566 = vpow2.f32 %v4584_v43 }
0x1630   :  { %5568 = vpow2.f32 %v4572_v18 }
0x1631   :  { %v7572_v10 = vpop.eup %5550  ;;  %5570 = vpow2.f32 %v4580_v5 }
0x1632   :  { %1754 = vrot.lane.b32.xlu0 %v7572_v10, %s5656_s10  ;;  %v7586_v40 = vpop.eup %5552  ;;  %5572 = vpow2.f32 %v4586_v61 }
0x1633   :  { %v7590_v45 = vpop.eup %5554  ;;  %5574 = vpow2.f32 %v4590_v8 }
0x1634   :  { %v7593_v53 = vpop.eup %5556  ;;  %5576 = vpow2.f32 %v4592_v34 }
0x1635   :  { %v7596_v37 = vpop.eup %5558 }
0x1636   :  { %v7599_v9 = vpop.eup %5560 }
0x1637   :  { %v7602_v13 = vpop.eup %5562 }
0x1638   :  { %v7614_v41 = vpop.eup %5564 }
0x1639   :  { %v7618_v35 = vpop.eup %5566 }
0x163a   :  { %v7622_v25 = vpop.eup %5568 }
0x163b   :  { %v7626_v42 = vpop.eup %5570 }
0x163c   :  { %v7630_v0 = vpop.eup %5572 }
0x163d   :  { %v7634_v39 = vpop.eup %5574 }
0x163e   :  { %v7638_v33 = vpop.eup %5576 }
0x1651   :  { %1742 = vadd.xlane.f32.xlu0 %v1741_v19  ;;  %v4588_v19 = vmul.f32 1.442695, %v4561_v7 }
0x1653   :  { %5578 = vpow2.f32 %v4588_v19 }
0x1654   :  { %5580 = vpow2.f32 %v4594_v56 }
0x1655   :  { %5582 = vpow2.f32 %v4596_v47 }
0x1656   :  { %5584 = vpow2.f32 %v1768_v63 }
0x1657   :  { %5586 = vrcp.f32 %v7569_v46 }
0x165d   :  { %v7641_v11 = vpop.eup %5578 }
0x165e   :  { %v7644_v60 = vpop.eup %5580 }
0x165f   :  { %v7647_v2 = vpop.eup %5582 }
0x1660   :  { %v7651_v50 = vpop.eup %5584 }
0x1661   :  { %v5587_v1 = vpop.eup %5586 }
0x1662   :  { %v1729_v27 = vmul.f32 %v5587_v1, %v7511_v38 }
0x1667   :  { %4615 = vperm.xlu0 %5449, %v7586_v40  }
0x166b   :  { %4627 = vperm.xlu0 %5449, %v7590_v45  }
0x166f   :  { %4630 = vperm.xlu0 %5449, %v7593_v53  }
0x1673   :  { %4621 = vperm.xlu0 %5449, %v7596_v37  }
0x1677   :  { %4633 = vperm.xlu0 %5449, %v7599_v9  }
0x167b   :  { %4639 = vperm.xlu0 %5449, %v7602_v13  }
0x169a   :  { %1782 = vmax.xlane.f32.xlu0 %v1781_v62 }
0x16a4   :  { %v1755_v12 = vpop.permute.xlu0 %1754 }
0x16a5   :  { %v1758_v22 = vsel %vm1757_vm2, %v1755_v12, 0.0 }
0x16a6   :  { %1759 = vadd.xlane.f32.xlu1 %v1758_v22 }
0x16b7   :  { %4618 = vperm.xlu1 %5448, %v7614_v41  }
0x16bb   :  { %4642 = vperm.xlu1 %5448, %v7618_v35  }
0x16bf   :  { %4624 = vperm.xlu1 %5448, %v7622_v25  }
0x16c3   :  { %4636 = vperm.xlu1 %5448, %v7626_v42  }
0x16c7   :  { %4645 = vperm.xlu1 %5448, %v7630_v0  }
0x16cb   :  { %4651 = vperm.xlu1 %5448, %v7634_v39  }
0x16cf   :  { %4654 = vperm.xlu1 %5448, %v7638_v33  }
0x16d3   :  { %4648 = vperm.xlu1 %5448, %v7641_v11  }
0x16d7   :  { %4657 = vperm.xlu1 %5448, %v7644_v60  }
0x16db   :  { %4660 = vperm.xlu1 %5448, %v7647_v2  }
0x16de   :  { %v1743_v6 = vpop.xlane.xlu0 %1742 }
0x16df   :  { %5588 = vrcp.f32 %v1743_v6  ;;  %1771 = vrot.lane.b32.xlu1 %v7651_v50, %s5657_s11 }
0x16e6   :  { %v4616_v12 = vpop.permute.xlu0 %4615 }
0x16e7   :  { %v4665_v15 = vrot.slane %v4616_v12, %v7468_v29 }
0x16e9   :  { %v5589_v21 = vpop.eup %5588 }
0x16ea   :  { %v1745_v48 = vmul.f32 %v5589_v21, %v7564_v26  ;;  %v4628_v16 = vpop.permute.xlu0 %4627 }
0x16eb   :  { %v4684_v19 = vrot.slane %v4628_v16, %v7468_v29 }
0x16ec   :  { %v4935_v62 = vsel %vm4934_vm3, %v1729_v27, %v1745_v48 }
0x16ee   :  { %v4631_v18 = vpop.permute.xlu0 %4630 }
0x16ef   :  { %v4688_v28 = vrot.slane %v4631_v18, %v7471_v54 }
0x16f1   :  { %v4689_v63 = vsel %vm4446_vm8, %v4688_v28, %v4684_v19 }
0x16f2   :  { %v4622_v38 = vpop.permute.xlu0 %4621 }
0x16f3   :  { %v4674_v27 = vrot.slane %v4622_v38, %v7474_v57 }
0x16f6   :  { %v4634_v26 = vpop.permute.xlu0 %4633 }
0x16f7   :  { %v4693_v34 = vrot.slane %v4634_v26, %v7474_v57 }
0x16f9   :  { %v4694_v48 = vsel %vm4453_vm9, %v4693_v34, %v4689_v63 }
0x16fa   :  { %v4640_v8 = vpop.permute.xlu0 %4639 }
0x16fb   :  { %v4703_v36 = vrot.slane %v4640_v8, %v7468_v29 }
0x1733   :  { %v1760_v31 = vpop.xlane.xlu1 %1759 }
0x1734   :  { %5590 = vrcp.f32 %v1760_v31 }
0x1737   :  { %v4619_v22 = vpop.permute.xlu1 %4618 }
0x1738   :  { %v4669_v7 = vrot.slane %v4619_v22, %v7471_v54 }
0x173a   :  { %v4670_v6 = vsel %vm4446_vm8, %v4669_v7, %v4665_v15 }
0x173b   :  { %v4643_v46 = vpop.permute.xlu1 %4642  ;;  %v4675_v16 = vsel %vm4453_vm9, %v4674_v27, %v4670_v6 }
0x173e   :  { %v5591_v52 = vpop.eup %5590 }
0x173f   :  { %v1762_v14 = vmul.f32 %v5591_v52, %v7572_v10  ;;  %v4625_v43 = vpop.permute.xlu1 %4624  ;;  %v4707_v10 = vrot.slane %v4643_v46, %v7471_v54 }
0x1740   :  { %v4679_v1 = vrot.slane %v4625_v43, %v7477_v4 }
0x1741   :  { %v7657_v23 = vsel %vm4936_vm4, %v4935_v62, %v1762_v14  ;;  %v4708_v62 = vsel %vm4446_vm8, %v4707_v10, %v4703_v36 }
0x1743   :  { %v4637_v49 = vpop.permute.xlu1 %4636 }
0x1744   :  { %v4698_v59 = vrot.slane %v4637_v49, %v7477_v4 }
0x1746   :  { %v4699_v12 = vsel %vm4460_vm10, %v4698_v59, %v4694_v48 }
0x1747   :  { %v4646_v32 = vpop.permute.xlu1 %4645 }
0x1748   :  { %v4712_v56 = vrot.slane %v4646_v32, %v7474_v57 }
0x174a   :  { %v4713_v22 = vsel %vm4453_vm9, %v4712_v56, %v4708_v62  ;;  %v4852_v62 = vadd.s32 4294967247, %v7461_v24 }
0x174b   :  { %v4652_v5 = vpop.permute.xlu1 %4651 }
0x174c   :  { %v4722_v46 = vrot.slane %v4652_v5, %v7468_v29 }
0x174f   :  { %v4655_v55 = vpop.permute.xlu1 %4654 }
0x1750   :  { %v4726_v21 = vrot.slane %v4655_v55, %v7471_v54  ;;  %v4680_v54 = vsel %vm4460_vm10, %v4679_v1, %v4675_v16 }
0x1752   :  { %v4727_v43 = vsel %vm4446_vm8, %v4726_v21, %v4722_v46  ;;  %v4866_v46 = vadd.s32 4294967231, %v7461_v24  ;;  %vm4871_vm8 = vcmask 597512  }
0x1753   :  { %v4649_v61 = vpop.permute.xlu1 %4648 }
0x1754   :  { %v4717_v47 = vrot.slane %v4649_v61, %v7477_v4  ;;  %v1783_v61 = vpop.xlane.xlu0 %1782 }
0x1756   :  { %v4718_v52 = vsel %vm4460_vm10, %v4717_v47, %v4713_v22 }
0x1757   :  { %v4658_v58 = vpop.permute.xlu1 %4657 }
0x1758   :  { %v4731_v31 = vrot.slane %v4658_v58, %v7474_v57  ;;  %v4738_v57 = vsel %vm4519_vm11, %v4699_v12, %v4680_v54  ;;  %v4859_v12 = vadd.s32 4294967239, %v7461_v24 }
0x1759   :  { %v4739_v38 = vsel %vm4521_vm12, %v4718_v52, %v4738_v57  ;;  %v4869_v57 = vsub.s32 %v4866_v46, %v8046_v17 }
0x175a   :  { %v4732_v49 = vsel %vm4453_vm9, %v4731_v31, %v4727_v43  ;;  %v4862_v43 = vsub.s32 %v4859_v12, %v8046_v17  ;;  %vm4938_vm9 = vcmask 64512  }
0x175b   :  { %v4661_v14 = vpop.permute.xlu1 %4660 }
0x175c   :  { %v4736_v18 = vrot.slane %v4661_v14, %v7477_v4  ;;  %v1784_v4 = vsub.f32 %v7449_v20, %v1783_v61 }
0x175e   :  { %v4737_v32 = vsel %vm4460_vm10, %v4736_v18, %v4732_v49  ;;  %v1785_v28 = vmul.f32 1.442695, %v1784_v4  ;;  %vm4940_vm10 = vcmask 269312  }
0x175f   :  { %v1772_v29 = vpop.permute.xlu1 %1771  ;;  %v4740_v5 = vsel %vm4523_vm13, %v4737_v32, %v4739_v38 }
0x1760   :  { %v4742_v26 = vsel %vm1774_vm14, %v4740_v5, 0.0  ;;  %v1775_v55 = vsel %vm1774_vm14, %v1772_v29, 0.0  ;;  %5592 = vpow2.f32 %v1785_v28  ;;  %vm4942_vm14 = vcmask 334848  }
0x1761   :  { %4743 = vadd.xlane.f32.xlu0 %v4742_v26  ;;  %1776 = vadd.xlane.f32.xlu1 %v1775_v55 }
0x176a   :  { %v7693_v8 = vpop.eup %5592 }
0x1777   :  { %1788 = vrot.lane.b32.xlu0 %v7693_v8, %s5658_s27 }
0x17ee   :  { %v4744_v7 = vpop.xlane.xlu0 %4743 }
0x17ef   :  { %5594 = vrcp.f32 %v4744_v7 }
0x17f2   :  { %v1789_v34 = vpop.permute.xlu0 %1788 }
0x17f3   :  { %v1792_v10 = vsel %vm1791_vm5, %v1789_v34, 0.0 }
0x17f4   :  { %1793 = vadd.xlane.f32.xlu0 %v1792_v10 }
0x17f9   :  { %v5595_v15 = vpop.eup %5594 }
0x17fa   :  { %v4750_v19 = vrot.slane %v5595_v15, %v8047_v51  ;;  %v4754_v20 = vrot.slane %v5595_v15, %v8048_v44  ;;  %v4758_v44 = vrot.slane %v5595_v15, %v4540_v30 }
0x17fc   :  { %v4767_v59 = vmul.f32 %v7586_v40, %v4750_v19  ;;  %v4771_v56 = vmul.f32 %v7590_v45, %v4754_v20  ;;  %v4772_v36 = vmul.f32 %v7593_v53, %v4754_v20  ;;  %v4768_v47 = vmul.f32 %v7614_v41, %v4750_v19 }
0x17fd   :  { %v4769_v58 = vmul.f32 %v7596_v37, %v4750_v19  ;;  %v4770_v63 = vmul.f32 %v7622_v25, %v4750_v19  ;;  %v4773_v51 = vmul.f32 %v7599_v9, %v4754_v20  ;;  %v4777_v40 = vmul.f32 %v7630_v0, %v4758_v44  ;;  %v1777_v0 = vpop.xlane.xlu1 %1776 }
0x17fe   :  { %4800 = vperm.xlu1 %5448, %v4767_v59   ;;  %v4775_v45 = vmul.f32 %v7602_v13, %v4758_v44  ;;  %v4762_v53 = vrot.slane %v5595_v15, %v4544_v3  ;;  %v4776_v41 = vmul.f32 %v7618_v35, %v4758_v44  ;;  %v4774_v30 = vmul.f32 %v7626_v42, %v4754_v20 }
0x17ff   :  { %v4778_v13 = vmul.f32 %v7641_v11, %v4758_v44  ;;  %5596 = vrcp.f32 %v1777_v0  ;;  %v4847_v11 = vadd.s32 4294967255, %v7461_v24 }
0x1800   :  { %v4780_v37 = vmul.f32 %v7638_v33, %v4762_v53  ;;  %v4781_v9 = vmul.f32 %v7644_v60, %v4762_v53  ;;  %v4779_v25 = vmul.f32 %v7634_v39, %v4762_v53  ;;  %v4782_v3 = vmul.f32 %v7647_v2, %v4762_v53 }
0x1801   :  { %v4855_v2 = vsub.s32 %v4852_v62, %v8046_v17  ;;  %v4850_v16 = vsub.s32 %v4847_v11, %v8046_v17 }
0x1802   :  { %4812 = vperm.xlu1 %5448, %v4771_v56  }
0x1806   :  { %4815 = vperm.xlu1 %5448, %v4772_v36  }
0x1809   :  { %v5597_v24 = vpop.eup %5596 }
0x180a   :  { %4803 = vperm.xlu0 %5449, %v4768_v47   ;;  %4806 = vperm.xlu1 %5448, %v4769_v58   ;;  %v1779_v36 = vmul.f32 %v5597_v24, %v7651_v50 }
0x180e   :  { %4809 = vperm.xlu0 %5449, %v4770_v63   ;;  %4818 = vperm.xlu1 %5448, %v4773_v51  }
0x1812   :  { %4830 = vperm.xlu0 %5449, %v4777_v40   ;;  %4824 = vperm.xlu1 %5448, %v4775_v45  }
0x1816   :  { %4839 = vperm.xlu0 %5449, %v4780_v37   ;;  %4827 = vperm.xlu1 %5448, %v4776_v41  }
0x181a   :  { %4842 = vperm.xlu0 %5449, %v4781_v9   ;;  %4821 = vperm.xlu1 %5448, %v4774_v30  }
0x181e   :  { %4836 = vperm.xlu1 %5448, %v4779_v25  }
0x1822   :  { %4833 = vperm.xlu1 %5448, %v4778_v13   ;;  %v4939_v13 = vsel %vm4938_vm9, %v7657_v23, %v1779_v36 }
0x1826   :  { %4845 = vperm.xlu1 %5448, %v4782_v3  }
0x187d   :  { %v4801_v33 = vpop.permute.xlu1 %4800 }
0x187e   :  { %v4851_v32 = vrot.slane %v4801_v33, %v4850_v16 }
0x1881   :  { %v4813_v35 = vpop.permute.xlu1 %4812  ;;  %v1794_v1 = vpop.xlane.xlu0 %1793 }
0x1882   :  { %5598 = vrcp.f32 %v1794_v1  ;;  %v4876_v38 = vrot.slane %v4813_v35, %v4850_v16 }
0x1885   :  { %v4816_v6 = vpop.permute.xlu1 %4815 }
0x1886   :  { %v4880_v14 = vrot.slane %v4816_v6, %v4855_v2 }
0x1888   :  { %v4881_v61 = vsel %vm4857_vm6, %v4880_v14, %v4876_v38 }
0x1889   :  { %v4807_v21 = vpop.permute.xlu1 %4806  ;;  %v4804_v60 = vpop.permute.xlu0 %4803 }
0x188a   :  { %v4856_v54 = vrot.slane %v4804_v60, %v4855_v2  ;;  %v4863_v28 = vrot.slane %v4807_v21, %v4862_v43 }
0x188c   :  { %v4858_v4 = vsel %vm4857_vm6, %v4856_v54, %v4851_v32  ;;  %v5599_v10 = vpop.eup %5598 }
0x188d   :  { %v4819_v27 = vpop.permute.xlu1 %4818  ;;  %v4810_v42 = vpop.permute.xlu0 %4809  ;;  %v4865_v51 = vsel %vm4864_vm7, %v4863_v28, %v4858_v4  ;;  %v1796_v53 = vmul.f32 %v5599_v10, %v7693_v8 }
0x188e   :  { %v4885_v29 = vrot.slane %v4819_v27, %v4862_v43  ;;  %v4870_v15 = vrot.slane %v4810_v42, %v4869_v57 }
0x188f   :  { %v4941_v3 = vsel %vm4940_vm10, %v4939_v13, %v1796_v53 }
0x1890   :  { %v4886_v56 = vsel %vm4864_vm7, %v4885_v29, %v4881_v61  ;;  %v4872_v37 = vsel %vm4871_vm8, %v4870_v15, %v4865_v51 }
0x1891   :  { %v4825_v48 = vpop.permute.xlu1 %4824  ;;  %v4831_v31 = vpop.permute.xlu0 %4830 }
0x1892   :  { %v4895_v5 = vrot.slane %v4825_v48, %v4850_v16  ;;  %v4904_v19 = vrot.slane %v4831_v31, %v4862_v43 }
0x1895   :  { %v4828_v39 = vpop.permute.xlu1 %4827  ;;  %v4840_v52 = vpop.permute.xlu0 %4839 }
0x1896   :  { %v4899_v18 = vrot.slane %v4828_v39, %v4855_v2  ;;  %v4918_v17 = vrot.slane %v4840_v52, %v4855_v2 }
0x1898   :  { %v4900_v7 = vsel %vm4857_vm6, %v4899_v18, %v4895_v5 }
0x1899   :  { %v4822_v22 = vpop.permute.xlu1 %4821  ;;  %v4843_v59 = vpop.permute.xlu0 %4842  ;;  %v4905_v63 = vsel %vm4864_vm7, %v4904_v19, %v4900_v7 }
0x189a   :  { %v4890_v26 = vrot.slane %v4822_v22, %v4869_v57  ;;  %v4923_v44 = vrot.slane %v4843_v59, %v4862_v43 }
0x189c   :  { %v4891_v47 = vsel %vm4871_vm8, %v4890_v26, %v4886_v56 }
0x189d   :  { %v4837_v49 = vpop.permute.xlu1 %4836  ;;  %v4930_v50 = vsel %vm4519_vm11, %v4891_v47, %v4872_v37 }
0x189e   :  { %v4914_v55 = vrot.slane %v4837_v49, %v4850_v16 }
0x18a0   :  { %v4919_v58 = vsel %vm4857_vm6, %v4918_v17, %v4914_v55 }
0x18a1   :  { %v4834_v34 = vpop.permute.xlu1 %4833  ;;  %v4924_v9 = vsel %vm4864_vm7, %v4923_v44, %v4919_v58 }
0x18a2   :  { %v4909_v20 = vrot.slane %v4834_v34, %v4869_v57 }
0x18a4   :  { %v4910_v40 = vsel %vm4871_vm8, %v4909_v20, %v4905_v63 }
0x18a5   :  { %v4846_v45 = vpop.permute.xlu1 %4845  ;;  %v4931_v30 = vsel %vm4521_vm12, %v4910_v40, %v4930_v50 }
0x18a6   :  { %v4928_v41 = vrot.slane %v4846_v45, %v4869_v57 }
0x18a8   :  { %v4929_v25 = vsel %vm4871_vm8, %v4928_v41, %v4924_v9 }
0x18a9   :  { %v4932_v8 = vsel %vm4523_vm13, %v4929_v25, %v4931_v30 }
0x18aa   :  { %v4943_v0 = vsel %vm4942_vm14, %v4941_v3, %v4932_v8 }
0x18ab   :  { %v4945_v33 = vsel %vm4944_vm15, %v4943_v0, 0.0 }
0x18ac   :  { %4946 = vst [vmem:[#allocation6] sm:$0xf] %v4945_v33 }
0x18ad   :  { %5633 = shalt.err (!%p5630_p12)
}
0x18ae   :  { %s5634_s30 = scalar_lea.hbm %s7770_s13, 64 }
0x18af   :  { %p5635_p13 = scmp.ne.s32.totalorder %s7770_s13, %s5634_s30  ;;  %p5638_p0 = scmp.lt.u32.totalorder %s5634_s30, %s7770_s13 }
0x18b1   :  { %p5640_p1 = pnand %p5638_p0, %p5635_p13 }
0x18b3   :  { %5643 = shalt.err (!%p5640_p1)
}
0x18b4   :  { %4956 = dma.vmem_to_hbm [thread:$0]  %s4954_s6, 64, %s7770_s13, [#allocation5]  }
0x18b5   :  { %5646 = dma.done.wait [#allocation5], 64  }
0x18b6   :  { %5647 = vsyncadd [#allocation5], 4294967232 }
0x18b7   :  { %4960 = vsyncpa [#allocation4], 1 }
0x18b8   :  { %4961 = vsyncpa [#allocation5], 1 }

</bundles_post_ra>
